<compile_context>
chip_gen: v5e
topology: v5e:2x2
jax: 0.10.0
libtpu: 0.0.40
codegen_flags: <defaults>
</compile_context>

<pallas_src>
import jax
import jax.numpy as jnp
from jax.experimental import pallas as pl
from jax.experimental.pallas import tpu as pltpu

F_IN = 78  # model input features


def _leaky_relu(x, slope=0.2):
    return jnp.where(x > 0, x, slope * x)


def dnn_nids_kernel(x_ref,
                    w1_ref, b1_ref,
                    w2_ref, b2_ref,
                    w3_ref, b3_ref,
                    w4_ref, b4_ref,
                    o_ref):
    # In-kernel bf16 cast (avoids a separate HBM pad/cast pass in the wrapper).
    x = x_ref[...].astype(jnp.bfloat16)                               # (tb, 78) bf16

    h = jnp.dot(x, w1_ref[...], preferred_element_type=jnp.float32)  # (tb, 128) f32
    h = _leaky_relu(h + b1_ref[...])

    h = jnp.dot(h.astype(jnp.bfloat16), w2_ref[...],
                preferred_element_type=jnp.float32)                  # (tb, 256)
    h = _leaky_relu(h + b2_ref[...])

    h = jnp.dot(h.astype(jnp.bfloat16), w3_ref[...],
                preferred_element_type=jnp.float32)                  # (tb, 128)
    h = _leaky_relu(h + b3_ref[...])

    # Final 128 -> 1 layer as VPU multiply + XLU lane-reduction (f32), then a
    # sigmoid over a single lane.  Output block is (tb, 1): minimal writeback.
    z = jnp.sum(h * w4_ref[...], axis=-1, keepdims=True) + b4_ref[...]  # (tb, 1)
    o_ref[...] = jax.nn.sigmoid(z).astype(o_ref.dtype)


def dnn_nids_forward(x, params, *, tb=512):
    """x: (B, 78) float32; params: dict of (in,out) f32 weights and (1,out) f32 biases."""
    B, F = x.shape
    assert F == F_IN
    assert tb % 8 == 0, "batch tile must be a multiple of 8"

    B_pad = ((B + tb - 1) // tb) * tb
    xp = x if B_pad == B else jnp.pad(x, ((0, B_pad - B), (0, 0)))

    # One-time, tiny weight casts / transpose (weights are ~150 KB total).
    w1 = params["w1"].astype(jnp.bfloat16)      # (78, 128)
    w2 = params["w2"].astype(jnp.bfloat16)      # (128, 256)
    w3 = params["w3"].astype(jnp.bfloat16)      # (256, 128)
    w4 = params["w4"].T                         # (1, 128) f32, used on the VPU
    b1, b2, b3, b4 = params["b1"], params["b2"], params["b3"], params["b4"]

    full = lambda arr: pl.BlockSpec(arr.shape, lambda i: (0, 0))

    out = pl.pallas_call(
        dnn_nids_kernel,
        out_shape=jax.ShapeDtypeStruct((B_pad, 1), jnp.float32),
        grid=(B_pad // tb,),
        in_specs=[
            pl.BlockSpec((tb, F_IN), lambda i: (i, 0)),   # x: tiled over batch only
            full(w1), full(b1),
            full(w2), full(b2),
            full(w3), full(b3),
            full(w4), full(b4),
        ],
        out_specs=pl.BlockSpec((tb, 1), lambda i: (i, 0)),
        compiler_params=pltpu.CompilerParams(
            dimension_semantics=("parallel",)),
    )(xp, w1, b1, w2, b2, w3, b3, w4, b4)

    return out if B_pad == B else out[:B]


def init_params(key):
    """Deterministic init mimicking PyTorch Linear default (U[-1/sqrt(fan_in), +])."""
    dims = [(78, 128), (128, 256), (256, 128), (128, 1)]
    params = {}
    for idx, (fan_in, fan_out) in enumerate(dims, start=1):
        key, kw, kb = jax.random.split(key, 3)
        bound = 1.0 / jnp.sqrt(jnp.float32(fan_in))
        params[f"w{idx}"] = jax.random.uniform(
            kw, (fan_in, fan_out), jnp.float32, minval=-bound, maxval=bound)
        params[f"b{idx}"] = jax.random.uniform(
            kb, (1, fan_out), jnp.float32, minval=-bound, maxval=bound)
    return params


def reference_forward_f32(x, p):
    h = _leaky_relu(x @ p["w1"] + p["b1"])
    h = _leaky_relu(h @ p["w2"] + p["b2"])
    h = _leaky_relu(h @ p["w3"] + p["b3"])
    return jax.nn.sigmoid(h @ p["w4"] + p["b4"])


def reference_forward_bf16(x, p):
    """Matches the kernel's numerics: bf16 matmul inputs for layers 1-3 with
    f32 accumulation/elementwise; final 128->1 layer fully in f32."""
    def lin_bf16(h, w, b):
        return jnp.dot(h.astype(jnp.bfloat16), w.astype(jnp.bfloat16),
                       preferred_element_type=jnp.float32) + b
    h = _leaky_relu(lin_bf16(x, p["w1"], p["b1"]))
    h = _leaky_relu(lin_bf16(h, p["w2"], p["b2"]))
    h = _leaky_relu(lin_bf16(h, p["w3"], p["b3"]))
    return jax.nn.sigmoid(h @ p["w4"] + p["b4"])


if __name__ == "__main__":
    key = jax.random.PRNGKey(0)
    key, kx = jax.random.split(key)

    # B=1024 with tb=512 -> exactly 2 parallel grid steps (balanced on v7x's
    # two TensorCores) while amortizing per-step pipeline overhead.
    B = 1024
    x = jax.random.normal(kx, (B, F_IN), jnp.float32)
    params = init_params(key)

    out = dnn_nids_forward(x, params, tb=512)
    out = jax.block_until_ready(out)
    assert out.shape == (B, 1)

    ref_bf16 = reference_forward_bf16(x, params)
    ref_f32 = reference_forward_f32(x, params)
    assert jnp.allclose(out, ref_bf16, atol=2e-3, rtol=2e-3), \
        "mismatch vs bf16-matched JAX reference"
    assert float(jnp.max(jnp.abs(out - ref_f32))) < 2e-2, \
        "mismatch vs f32 JAX reference (bf16 error budget exceeded)"

    # TODO(synk): if real NIDS feature magnitudes make the in-kernel bf16 cast
    # too lossy, keep the first matmul's LHS in f32 (cheap; kernel is not
    # MXU-bound on v6e/v7x).

    print("KERNEL_OK")
</pallas_src>

<mosaic_0001>
module attributes {stable_mosaic.version = 11 : i64} {
  func.func @dnn_nids_kernel(%arg0: i32, %arg1: memref<512x78xf32, #tpu.memory_space<vmem>>, %arg2: memref<78x128xbf16, #tpu.memory_space<vmem>>, %arg3: memref<1x128xf32, #tpu.memory_space<vmem>>, %arg4: memref<128x256xbf16, #tpu.memory_space<vmem>>, %arg5: memref<1x256xf32, #tpu.memory_space<vmem>>, %arg6: memref<256x128xbf16, #tpu.memory_space<vmem>>, %arg7: memref<1x128xf32, #tpu.memory_space<vmem>>, %arg8: memref<1x128xf32, #tpu.memory_space<vmem>>, %arg9: memref<1x1xf32, #tpu.memory_space<vmem>>, %arg10: memref<512x1xf32, #tpu.memory_space<vmem>>) attributes {dimension_semantics = [#tpu.dimension_semantics<parallel>], iteration_bounds = array<i64: 2>, scalar_prefetch = 0 : i64, scratch_operands = 0 : i64, tpu.core_type = #tpu.core_type<tc>, window_params = [{transform_indices = @transform_0, window_bounds = array<i64: 512, 78>}, {pipeline_mode = #tpu.pipeline_mode<synchronous>, transform_indices = @transform_1, window_bounds = array<i64: 78, 128>}, {pipeline_mode = #tpu.pipeline_mode<synchronous>, transform_indices = @transform_2, window_bounds = array<i64: 1, 128>}, {pipeline_mode = #tpu.pipeline_mode<synchronous>, transform_indices = @transform_3, window_bounds = array<i64: 128, 256>}, {pipeline_mode = #tpu.pipeline_mode<synchronous>, transform_indices = @transform_4, window_bounds = array<i64: 1, 256>}, {pipeline_mode = #tpu.pipeline_mode<synchronous>, transform_indices = @transform_5, window_bounds = array<i64: 256, 128>}, {pipeline_mode = #tpu.pipeline_mode<synchronous>, transform_indices = @transform_6, window_bounds = array<i64: 1, 128>}, {pipeline_mode = #tpu.pipeline_mode<synchronous>, transform_indices = @transform_7, window_bounds = array<i64: 1, 128>}, {pipeline_mode = #tpu.pipeline_mode<synchronous>, transform_indices = @transform_8, window_bounds = array<i64: 1, 1>}, {transform_indices = @transform_9, window_bounds = array<i64: 512, 1>}]} {
    %c0 = arith.constant 0 : index
    %c0_0 = arith.constant 0 : index
    %0 = vector.load %arg1[%c0, %c0_0] : memref<512x78xf32, #tpu.memory_space<vmem>>, vector<512x78xf32>
    %1 = arith.truncf %0 : vector<512x78xf32> to vector<512x78xbf16>
    %c0_1 = arith.constant 0 : index
    %c0_2 = arith.constant 0 : index
    %2 = vector.load %arg2[%c0_1, %c0_2] : memref<78x128xbf16, #tpu.memory_space<vmem>>, vector<78x128xbf16>
    %cst = arith.constant dense<0.000000e+00> : vector<512x128xf32>
    %3 = tpu.matmul %1, %2, %cst {dimension_numbers = #tpu.dot_dimension_numbers<[1], [0], [0], [1], [0, 0, 1, 1], [], []>} : vector<512x78xbf16>, vector<78x128xbf16>, vector<512x128xf32> -> vector<512x128xf32>
    %c0_3 = arith.constant 0 : index
    %c0_4 = arith.constant 0 : index
    %4 = vector.load %arg3[%c0_3, %c0_4] : memref<1x128xf32, #tpu.memory_space<vmem>>, vector<1x128xf32>
    %5 = vector.broadcast %4 : vector<1x128xf32> to vector<512x128xf32>
    %6 = arith.addf %3, %5 : vector<512x128xf32>
    %cst_5 = arith.constant 0.000000e+00 : f32
    %7 = vector.broadcast %cst_5 : f32 to vector<512x128xf32>
    %8 = arith.cmpf ogt, %6, %7 : vector<512x128xf32>
    %cst_6 = arith.constant 2.000000e-01 : f32
    %9 = vector.broadcast %cst_6 : f32 to vector<512x128xf32>
    %10 = arith.mulf %9, %6 : vector<512x128xf32>
    %11 = arith.select %8, %6, %10 : vector<512x128xi1>, vector<512x128xf32>
    %12 = arith.truncf %11 : vector<512x128xf32> to vector<512x128xbf16>
    %c0_7 = arith.constant 0 : index
    %c0_8 = arith.constant 0 : index
    %13 = vector.load %arg4[%c0_7, %c0_8] : memref<128x256xbf16, #tpu.memory_space<vmem>>, vector<128x256xbf16>
    %cst_9 = arith.constant dense<0.000000e+00> : vector<512x256xf32>
    %14 = tpu.matmul %12, %13, %cst_9 {dimension_numbers = #tpu.dot_dimension_numbers<[1], [0], [0], [1], [0, 0, 1, 1], [], []>} : vector<512x128xbf16>, vector<128x256xbf16>, vector<512x256xf32> -> vector<512x256xf32>
    %c0_10 = arith.constant 0 : index
    %c0_11 = arith.constant 0 : index
    %15 = vector.load %arg5[%c0_10, %c0_11] : memref<1x256xf32, #tpu.memory_space<vmem>>, vector<1x256xf32>
    %16 = vector.broadcast %15 : vector<1x256xf32> to vector<512x256xf32>
    %17 = arith.addf %14, %16 : vector<512x256xf32>
    %cst_12 = arith.constant 0.000000e+00 : f32
    %18 = vector.broadcast %cst_12 : f32 to vector<512x256xf32>
    %19 = arith.cmpf ogt, %17, %18 : vector<512x256xf32>
    %cst_13 = arith.constant 2.000000e-01 : f32
    %20 = vector.broadcast %cst_13 : f32 to vector<512x256xf32>
    %21 = arith.mulf %20, %17 : vector<512x256xf32>
    %22 = arith.select %19, %17, %21 : vector<512x256xi1>, vector<512x256xf32>
    %23 = arith.truncf %22 : vector<512x256xf32> to vector<512x256xbf16>
    %c0_14 = arith.constant 0 : index
    %c0_15 = arith.constant 0 : index
    %24 = vector.load %arg6[%c0_14, %c0_15] : memref<256x128xbf16, #tpu.memory_space<vmem>>, vector<256x128xbf16>
    %cst_16 = arith.constant dense<0.000000e+00> : vector<512x128xf32>
    %25 = tpu.matmul %23, %24, %cst_16 {dimension_numbers = #tpu.dot_dimension_numbers<[1], [0], [0], [1], [0, 0, 1, 1], [], []>} : vector<512x256xbf16>, vector<256x128xbf16>, vector<512x128xf32> -> vector<512x128xf32>
    %c0_17 = arith.constant 0 : index
    %c0_18 = arith.constant 0 : index
    %26 = vector.load %arg7[%c0_17, %c0_18] : memref<1x128xf32, #tpu.memory_space<vmem>>, vector<1x128xf32>
    %27 = vector.broadcast %26 : vector<1x128xf32> to vector<512x128xf32>
    %28 = arith.addf %25, %27 : vector<512x128xf32>
    %cst_19 = arith.constant 0.000000e+00 : f32
    %29 = vector.broadcast %cst_19 : f32 to vector<512x128xf32>
    %30 = arith.cmpf ogt, %28, %29 : vector<512x128xf32>
    %cst_20 = arith.constant 2.000000e-01 : f32
    %31 = vector.broadcast %cst_20 : f32 to vector<512x128xf32>
    %32 = arith.mulf %31, %28 : vector<512x128xf32>
    %33 = arith.select %30, %28, %32 : vector<512x128xi1>, vector<512x128xf32>
    %c0_21 = arith.constant 0 : index
    %c0_22 = arith.constant 0 : index
    %34 = vector.load %arg8[%c0_21, %c0_22] : memref<1x128xf32, #tpu.memory_space<vmem>>, vector<1x128xf32>
    %35 = vector.broadcast %34 : vector<1x128xf32> to vector<512x128xf32>
    %36 = arith.mulf %33, %35 : vector<512x128xf32>
    %cst_23 = arith.constant dense<0.000000e+00> : vector<512xf32>
    %37 = vector.multi_reduction <add>, %36, %cst_23 [1] : vector<512x128xf32> to vector<512xf32>
    %38 = vector.shape_cast %37 : vector<512xf32> to vector<512x1xf32>
    %c0_24 = arith.constant 0 : index
    %c0_25 = arith.constant 0 : index
    %39 = vector.load %arg9[%c0_24, %c0_25] : memref<1x1xf32, #tpu.memory_space<vmem>>, vector<1x1xf32>
    %40 = vector.broadcast %39 : vector<1x1xf32> to vector<512x1xf32>
    %41 = arith.addf %38, %40 : vector<512x1xf32>
    %42 = arith.negf %41 : vector<512x1xf32>
    %43 = math.exp %42 : vector<512x1xf32>
    %cst_26 = arith.constant 1.000000e+00 : f32
    %44 = vector.broadcast %cst_26 : f32 to vector<512x1xf32>
    %45 = arith.addf %44, %43 : vector<512x1xf32>
    %46 = arith.divf %44, %45 : vector<512x1xf32>
    %c0_27 = arith.constant 0 : index
    %c0_28 = arith.constant 0 : index
    %47 = vector.load %arg10[%c0_27, %c0_28] : memref<512x1xf32, #tpu.memory_space<vmem>>, vector<512x1xf32>
    tpu.vector_store %arg10[%c0_27, %c0_28], %46 {strides = array<i32>} : memref<512x1xf32, #tpu.memory_space<vmem>>, vector<512x1xf32>,
    return
  }
  func.func @transform_0(%arg0: i32) -> (i32, i32) {
    %c0_i32 = arith.constant 0 : i32
    %c0_i32_0 = arith.constant 0 : i32
    return %arg0, %c0_i32 : i32, i32
  }
  func.func @transform_1(%arg0: i32) -> (i32, i32) {
    %c0_i32 = arith.constant 0 : i32
    %c0_i32_0 = arith.constant 0 : i32
    %c0_i32_1 = arith.constant 0 : i32
    return %c0_i32, %c0_i32_0 : i32, i32
  }
  func.func @transform_2(%arg0: i32) -> (i32, i32) {
    %c0_i32 = arith.constant 0 : i32
    %c0_i32_0 = arith.constant 0 : i32
    %c0_i32_1 = arith.constant 0 : i32
    return %c0_i32, %c0_i32_0 : i32, i32
  }
  func.func @transform_3(%arg0: i32) -> (i32, i32) {
    %c0_i32 = arith.constant 0 : i32
    %c0_i32_0 = arith.constant 0 : i32
    %c0_i32_1 = arith.constant 0 : i32
    return %c0_i32, %c0_i32_0 : i32, i32
  }
  func.func @transform_4(%arg0: i32) -> (i32, i32) {
    %c0_i32 = arith.constant 0 : i32
    %c0_i32_0 = arith.constant 0 : i32
    %c0_i32_1 = arith.constant 0 : i32
    return %c0_i32, %c0_i32_0 : i32, i32
  }
  func.func @transform_5(%arg0: i32) -> (i32, i32) {
    %c0_i32 = arith.constant 0 : i32
    %c0_i32_0 = arith.constant 0 : i32
    %c0_i32_1 = arith.constant 0 : i32
    return %c0_i32, %c0_i32_0 : i32, i32
  }
  func.func @transform_6(%arg0: i32) -> (i32, i32) {
    %c0_i32 = arith.constant 0 : i32
    %c0_i32_0 = arith.constant 0 : i32
    %c0_i32_1 = arith.constant 0 : i32
    return %c0_i32, %c0_i32_0 : i32, i32
  }
  func.func @transform_7(%arg0: i32) -> (i32, i32) {
    %c0_i32 = arith.constant 0 : i32
    %c0_i32_0 = arith.constant 0 : i32
    %c0_i32_1 = arith.constant 0 : i32
    return %c0_i32, %c0_i32_0 : i32, i32
  }
  func.func @transform_8(%arg0: i32) -> (i32, i32) {
    %c0_i32 = arith.constant 0 : i32
    %c0_i32_0 = arith.constant 0 : i32
    %c0_i32_1 = arith.constant 0 : i32
    return %c0_i32, %c0_i32_0 : i32, i32
  }
  func.func @transform_9(%arg0: i32) -> (i32, i32) {
    %c0_i32 = arith.constant 0 : i32
    %c0_i32_0 = arith.constant 0 : i32
    return %arg0, %c0_i32 : i32, i32
  }
}

</mosaic_0001>

<bundles_post_ra>
// kernel: tpu_custom_call.1
= control target key start
LH: loop header
LB: loop body
LE: loop exit
PB: predicated region body
PF: predicated region fallthrough
CT: control target
= control target key end

     0   :  { %s4780_s11 = smov 0   ;;  %s6420_s0 = inlined_call_operand.vmem [shape: f32[1024,78], index: 0, kind: input, shape index: {}]   ;;  %s6421_s1 = inlined_call_operand.vmem [shape: bf16[78,128], index: 1, kind: input, shape index: {}]   ;;  %s6422_s2 = inlined_call_operand.vmem [shape: f32[1,128], index: 2, kind: input, shape index: {}]   ;;  %s6423_s3 = inlined_call_operand.vmem [shape: bf16[128,256], index: 3, kind: input, shape index: {}]   ;;  %s6424_s4 = inlined_call_operand.vmem [shape: f32[1,256], index: 4, kind: input, shape index: {}]   ;;  %s6425_s5 = inlined_call_operand.vmem [shape: bf16[256,128], index: 5, kind: input, shape index: {}]   ;;  %s6426_s6 = inlined_call_operand.vmem [shape: f32[1,128], index: 6, kind: input, shape index: {}]   ;;  %s6427_s7 = inlined_call_operand.vmem [shape: f32[1,128], index: 7, kind: input, shape index: {}]   ;;  %s6428_s8 = inlined_call_operand.<no memory space> [shape: f32[1,1], index: 8, kind: input, shape index: {}]   ;;  %s6429_s9 = inlined_call_operand.vmem [shape: f32[1024,1], index: 9, kind: output, shape index: {}]  }
   0x1   :  { %v14_v0 = vstv %s6428_s8 }
   0x2   :  { %15 = vst [vmem:[#allocation2] sm:$0x1] %v14_v0 }
   0x3 LB: > { %s4123_s12 = sadd.s32 4294967295, %s4725_s11   ;;  %p4127_p0 = scmp.ge.s32.totalorder %s4725_s11, 1  ;;  %s4725_s11 = sphi %s4780_s11, %s21_s11  }
   0x4   : > { %p290_p1 = scmp.lt.s32.totalorder %s4725_s11, 3 }
   0x6   : > { %p291_p2 = pnand %p4127_p0, %p290_p1 }
   0x7   : > { %s4128_s16 = sshll.u32 (!%p291_p2), %s4123_s12, 6 }
   0x8   : > { %294 = sbr.rel (%p291_p2) target bundleno = 1131 (0x46b), region = 56  ;;  %p327_p3 = scmp.lt.s32.totalorder (!%p291_p2), %s4128_s16, 127 }
   0xd   : > { %v4150_v1 = vld [vmem:[%s6421_s1 + $0x20] sm:$0xf]  ;;  %v4382_v2 = vld [vmem:[%s6421_s1 + $0x20] sm:$0x70]  ;;  %vm575_vm0 = vcmask 1046528   ;;  %v4381_v5 = vld [vmem:[%s6421_s1 + $0x18] sm:$0xff] }
   0xe   : > { %v4151_v3 = vor.u32 %v4382_v2, %v4150_v1  ;;  %s6471_s16 = smov (!%p327_p3, %s4128_s16), 127  ;;  %v4380_v6 = vld [vmem:[%s6421_s1 + $0x10] sm:$0xff]  ;;  %v4379_v7 = vld [vmem:[%s6421_s1 + $0x8] sm:$0xff]  ;;  %v4378_v8 = vld [vmem:[%s6421_s1] sm:$0xff]  ;;  %vm478_vm1 = vcmask 637952  }
   0xf   : > { %s4129_s21 = sshll.u32 %s6471_s16, 3  ;;  %v4242_v9 = vld [vmem:[%s6423_s3 + $0x70] sm:$0xf]  ;;  %v4398_v10 = vld [vmem:[%s6423_s3 + $0x74] sm:$0xf0] }
  0x10   : > { %v577_v4 = vsel %vm575_vm0, %v4151_v3, 0  ;;  %s4811_s26 = scalar_lea.vmem %s6420_s0, %s4129_s21  ;;  %v4397_v12 = vld [vmem:[%s6423_s3 + $0x74] sm:$0xf]  ;;  %v4244_v13 = vld [vmem:[%s6423_s3 + $0x78] sm:$0xf0]  ;;  %v4243_v17 = vor.u32 %v4398_v10, %v4242_v9  ;;  %s5481_s27 = scalar_lea.vmem %s6429_s9, %s4129_s21 }
  0x11   : > { %582 = vmatpush.bf16.msra.mxu0 %v577_v4  ;;  %4415 = vmatpush.bf16.msra.mxu1 %v577_v4  ;;  %v339_v11 = vld [vmem:[%s4811_s26] sm:$0xff]  ;;  %v340_v14 = vld [vmem:[%s4811_s26 + $0x8] sm:$0xff]  ;;  %v357_v15 = vld [vmem:[%s4811_s26 + $0x90] sm:$0xff]  ;;  %v4247_v22 = vor.u32 %v4397_v12, %v4244_v13 }
  0x12   : > { %4416 = vmatpush.bf16.msra.mxu2 %v577_v4  ;;  %4417 = vmatpush.bf16.msra.mxu3 %v577_v4  ;;  %v358_v16 = vld [vmem:[%s4811_s26 + $0x98] sm:$0xff]  ;;  %v375_v18 = vld [vmem:[%s4811_s26 + $0x120] sm:$0xff]  ;;  %v376_v19 = vld [vmem:[%s4811_s26 + $0x128] sm:$0xff]  ;;  %v403_v23 = vpack.c.bf16 %v340_v14, %v339_v11 }
  0x13   : > { %v4234_v20 = vld [vmem:[%s6423_s3 + $0x60] sm:$0xf]  ;;  %v4396_v21 = vld [vmem:[%s6423_s3 + $0x64] sm:$0xf0]  ;;  %v412_v24 = vpack.c.bf16 %v358_v16, %v357_v15  ;;  %v421_v25 = vpack.c.bf16 %v376_v19, %v375_v18  ;;  %v4226_v27 = vld [vmem:[%s6423_s3 + $0x50] sm:$0xf] }
  0x14   : > { %v4235_v26 = vor.u32 %v4396_v21, %v4234_v20  ;;  %v4394_v28 = vld [vmem:[%s6423_s3 + $0x54] sm:$0xf0]  ;;  %v4395_v29 = vld [vmem:[%s6423_s3 + $0x64] sm:$0xf]  ;;  %v4236_v30 = vld [vmem:[%s6423_s3 + $0x68] sm:$0xf0] }
  0x15   : > { %583 = vmatpush.bf16.msra.mxu0 %v4381_v5  ;;  %4418 = vmatpush.bf16.msra.mxu1 %v4381_v5  ;;  %v4227_v31 = vor.u32 %v4394_v28, %v4226_v27  ;;  %v4239_v32 = vor.u32 %v4395_v29, %v4236_v30  ;;  %v341_v33 = vld [vmem:[%s4811_s26 + $0x10] sm:$0xff]  ;;  %v342_v34 = vld [vmem:[%s4811_s26 + $0x18] sm:$0xff]  ;;  %v359_v35 = vld [vmem:[%s4811_s26 + $0xa0] sm:$0xff] }
  0x16   : > { %4419 = vmatpush.bf16.msra.mxu2 %v4381_v5  ;;  %4420 = vmatpush.bf16.msra.mxu3 %v4381_v5  ;;  %v360_v36 = vld [vmem:[%s4811_s26 + $0xa8] sm:$0xff]  ;;  %v377_v37 = vld [vmem:[%s4811_s26 + $0x130] sm:$0xff]  ;;  %v378_v38 = vld [vmem:[%s4811_s26 + $0x138] sm:$0xff]  ;;  %v404_v39 = vpack.c.bf16 %v342_v34, %v341_v33 }
  0x17   : > { %v413_v40 = vpack.c.bf16 %v360_v36, %v359_v35  ;;  %v422_v41 = vpack.c.bf16 %v378_v38, %v377_v37  ;;  %v4218_v42 = vld [vmem:[%s6423_s3 + $0x40] sm:$0xf]  ;;  %v4392_v43 = vld [vmem:[%s6423_s3 + $0x44] sm:$0xf0]  ;;  %v4393_v44 = vld [vmem:[%s6423_s3 + $0x54] sm:$0xf] }
  0x18   : > { %v4219_v45 = vor.u32 %v4392_v43, %v4218_v42  ;;  %v4228_v46 = vld [vmem:[%s6423_s3 + $0x58] sm:$0xf0]  ;;  %v343_v48 = vld [vmem:[%s4811_s26 + $0x20] sm:$0xff]  ;;  %v344_v49 = vld [vmem:[%s4811_s26 + $0x28] sm:$0xff] }
  0x19   : > { %584 = vmatpush.bf16.msra.mxu0 %v4380_v6  ;;  %4421 = vmatpush.bf16.msra.mxu1 %v4380_v6  ;;  %v4231_v47 = vor.u32 %v4393_v44, %v4228_v46  ;;  %v361_v50 = vld [vmem:[%s4811_s26 + $0xb0] sm:$0xff]  ;;  %v362_v51 = vld [vmem:[%s4811_s26 + $0xb8] sm:$0xff]  ;;  %v379_v52 = vld [vmem:[%s4811_s26 + $0x140] sm:$0xff]  ;;  %v405_v54 = vpack.c.bf16 %v344_v49, %v343_v48 }
  0x1a   : > { %4422 = vmatpush.bf16.msra.mxu2 %v4380_v6  ;;  %4423 = vmatpush.bf16.msra.mxu3 %v4380_v6  ;;  %v380_v53 = vld [vmem:[%s4811_s26 + $0x148] sm:$0xff]  ;;  %v414_v55 = vpack.c.bf16 %v362_v51, %v361_v50  ;;  %v4210_v57 = vld [vmem:[%s6423_s3 + $0x30] sm:$0xf]  ;;  %v4390_v58 = vld [vmem:[%s6423_s3 + $0x34] sm:$0xf0] }
  0x1b   : > { %v423_v56 = vpack.c.bf16 %v380_v53, %v379_v52  ;;  %v4391_v59 = vld [vmem:[%s6423_s3 + $0x44] sm:$0xf]  ;;  %v4211_v60 = vor.u32 %v4390_v58, %v4210_v57  ;;  %v4220_v61 = vld [vmem:[%s6423_s3 + $0x48] sm:$0xf0]  ;;  %v345_v63 = vld [vmem:[%s4811_s26 + $0x30] sm:$0xff] }
  0x1c   : > { %v4223_v62 = vor.u32 %v4391_v59, %v4220_v61  ;;  %v346_v0 = vld [vmem:[%s4811_s26 + $0x38] sm:$0xff]  ;;  %v363_v1 = vld [vmem:[%s4811_s26 + $0xc0] sm:$0xff]  ;;  %v364_v2 = vld [vmem:[%s4811_s26 + $0xc8] sm:$0xff] }
  0x1d   : > { %585 = vmatpush.bf16.msra.mxu0 %v4379_v7  ;;  %4424 = vmatpush.bf16.msra.mxu1 %v4379_v7  ;;  %v381_v3 = vld [vmem:[%s4811_s26 + $0x150] sm:$0xff]  ;;  %v382_v4 = vld [vmem:[%s4811_s26 + $0x158] sm:$0xff]  ;;  %v406_v5 = vpack.c.bf16 %v346_v0, %v345_v63  ;;  %v415_v6 = vpack.c.bf16 %v364_v2, %v363_v1  ;;  %v4388_v9 = vld [vmem:[%s6423_s3 + $0x24] sm:$0xf0] }
  0x1e   : > { %4425 = vmatpush.bf16.msra.mxu2 %v4379_v7  ;;  %4426 = vmatpush.bf16.msra.mxu3 %v4379_v7  ;;  %v424_v7 = vpack.c.bf16 %v382_v4, %v381_v3  ;;  %v4389_v10 = vld [vmem:[%s6423_s3 + $0x34] sm:$0xf]  ;;  %v4212_v12 = vld [vmem:[%s6423_s3 + $0x38] sm:$0xf0]  ;;  %v347_v14 = vld [vmem:[%s4811_s26 + $0x40] sm:$0xff] }
  0x1f   : > { %v4215_v13 = vor.u32 %v4389_v10, %v4212_v12  ;;  %v348_v15 = vld [vmem:[%s4811_s26 + $0x48] sm:$0xff]  ;;  %v365_v16 = vld [vmem:[%s4811_s26 + $0xd0] sm:$0xff]  ;;  %v383_v18 = vld [vmem:[%s4811_s26 + $0x160] sm:$0xff] }
  0x20   : > { %v384_v19 = vld [vmem:[%s4811_s26 + $0x168] sm:$0xff]  ;;  %v407_v20 = vpack.c.bf16 %v348_v15, %v347_v14  ;;  %v4386_v27 = vld [vmem:[%s6423_s3 + $0x14] sm:$0xf0]  ;;  %v349_v29 = vld [vmem:[%s4811_s26 + $0x50] sm:$0xff] }
  0x21   : > { %586 = vmatpush.bf16.msra.mxu0 %v4378_v8  ;;  %4427 = vmatpush.bf16.msra.mxu1 %v4378_v8  ;;  %v350_v30 = vld [vmem:[%s4811_s26 + $0x58] sm:$0xff]  ;;  %v385_v33 = vld [vmem:[%s4811_s26 + $0x170] sm:$0xff]  ;;  %v352_v42 = vld [vmem:[%s4811_s26 + $0x68] sm:$0xff] }
  0x22   : > { %4428 = vmatpush.bf16.msra.mxu2 %v4378_v8  ;;  %4429 = vmatpush.bf16.msra.mxu3 %v4378_v8  ;;  %v4202_v8 = vld [vmem:[%s6423_s3 + $0x20] sm:$0xf]  ;;  %v386_v34 = vld [vmem:[%s4811_s26 + $0x178] sm:$0xff]  ;;  %v408_v35 = vpack.c.bf16 %v350_v30, %v349_v29  ;;  %v4385_v38 = vld [vmem:[%s6423_s3 + $0x14] sm:$0xf] }
  0x23   : > { %v4203_v11 = vor.u32 %v4388_v9, %v4202_v8  ;;  %v426_v37 = vpack.c.bf16 %v386_v34, %v385_v33  ;;  %v369_v43 = vld [vmem:[%s4811_s26 + $0xf0] sm:$0xff]  ;;  %v370_v44 = vld [vmem:[%s4811_s26 + $0xf8] sm:$0xff]  ;;  %v388_v46 = vld [vmem:[%s4811_s26 + $0x188] sm:$0xff] }
  0x24   : > { %4152 = vmatmul.msk.bf16.vlgmr.msra.gmra.mxu0 %vm478_vm1, %v403_v23  ;;  %4161 = vmatmul.msk.bf16.vlgmr.msra.gmra.mxu1 %vm478_vm1, %v412_v24  ;;  %v4387_v23 = vld [vmem:[%s6423_s3 + $0x24] sm:$0xf]  ;;  %v4204_v24 = vld [vmem:[%s6423_s3 + $0x28] sm:$0xf0]  ;;  %v418_v48 = vpack.c.bf16 %v370_v44, %v369_v43  ;;  %v4186_v50 = vld [vmem:[%s6423_s3] sm:$0xf] }
  0x25   : > { %1074 = vmatpush.bf16.msrb.mxu1 %v4243_v17  ;;  %4170 = vmatmul.msk.bf16.vlgmr.msra.gmra.mxu2 %vm478_vm1, %v421_v25  ;;  %v366_v17 = vld [vmem:[%s4811_s26 + $0xd8] sm:$0xff]  ;;  %v4194_v25 = vld [vmem:[%s6423_s3 + $0x10] sm:$0xf]  ;;  %v4384_v51 = vld [vmem:[%s6423_s3 + $0x4] sm:$0xf0] }
  0x26   : > { %1243 = vmatpush.bf16.msrb.mxu2 %v4247_v22  ;;  %v416_v21 = vpack.c.bf16 %v366_v17, %v365_v16  ;;  %v425_v22 = vpack.c.bf16 %v384_v19, %v383_v18  ;;  %v4195_v28 = vor.u32 %v4386_v27, %v4194_v25  ;;  %v4187_v52 = vor.u32 %v4384_v51, %v4186_v50  ;;  %v4383_v53 = vld [vmem:[%s6423_s3 + $0x4] sm:$0xf]  ;;  %v354_v57 = vld [vmem:[%s4811_s26 + $0x78] sm:$0xff]  ;;  %v372_v59 = vld [vmem:[%s4811_s26 + $0x108] sm:$0xff] }
  0x27   : > { %v371_v58 = vld [vmem:[%s4811_s26 + $0x100] sm:$0xff]  ;;  %v390_v61 = vld [vmem:[%s4811_s26 + $0x198] sm:$0xff]  ;;  %v356_v2 = vld [vmem:[%s4811_s26 + $0x88] sm:$0xff] }
  0x28   : > { %v419_v63 = vpack.c.bf16 %v372_v59, %v371_v58  ;;  %v355_v1 = vld [vmem:[%s4811_s26 + $0x80] sm:$0xff]  ;;  %v373_v3 = vld [vmem:[%s4811_s26 + $0x110] sm:$0xff]  ;;  %v374_v4 = vld [vmem:[%s4811_s26 + $0x118] sm:$0xff] }
  0x29   : > { %1075 = vmatpush.bf16.msrb.mxu1 %v4235_v26  ;;  %v4207_v26 = vor.u32 %v4387_v23, %v4204_v24  ;;  %v4991_v9 = vld [vmem:[%s6422_s2] ss:$0 sm:$0xff] }
  0x2a   : > { %1244 = vmatpush.bf16.msrb.mxu2 %v4239_v32  ;;  %v368_v32 = vld [vmem:[%s4811_s26 + $0xe8] sm:$0xff] }
  0x2d   : > { %1076 = vmatpush.bf16.msrb.mxu1 %v4227_v31  ;;  %v367_v31 = vld [vmem:[%s4811_s26 + $0xe0] sm:$0xff] }
  0x2e   : > { %1245 = vmatpush.bf16.msrb.mxu2 %v4231_v47  ;;  %v417_v36 = vpack.c.bf16 %v368_v32, %v367_v31 }
  0x31   : > { %1077 = vmatpush.bf16.msrb.mxu1 %v4219_v45  ;;  %v387_v45 = vld [vmem:[%s4811_s26 + $0x180] sm:$0xff] }
  0x32   : > { %1246 = vmatpush.bf16.msrb.mxu2 %v4223_v62  ;;  %v427_v49 = vpack.c.bf16 %v388_v46, %v387_v45 }
  0x34   : > { %4153 = vmatmul.msk.bf16.gmra.mxu0 %vm478_vm1, %v404_v39  ;;  %4162 = vmatmul.msk.bf16.gmra.mxu1 %vm478_vm1, %v413_v40  ;;  %v4196_v39 = vld [vmem:[%s6423_s3 + $0x18] sm:$0xf0] }
  0x35   : > { %4171 = vmatmul.msk.bf16.gmra.mxu2 %vm478_vm1, %v422_v41  ;;  %1078 = vmatpush.bf16.msrb.mxu1 %v4211_v60  ;;  %v4199_v40 = vor.u32 %v4385_v38, %v4196_v39  ;;  %v351_v41 = vld [vmem:[%s4811_s26 + $0x60] sm:$0xff]  ;;  %v389_v60 = vld [vmem:[%s4811_s26 + $0x190] sm:$0xff] }
  0x36   : > { %1247 = vmatpush.bf16.msrb.mxu2 %v4215_v13  ;;  %v409_v47 = vpack.c.bf16 %v352_v42, %v351_v41  ;;  %v428_v0 = vpack.c.bf16 %v390_v61, %v389_v60 }
  0x39   : > { %1079 = vmatpush.bf16.msrb.mxu1 %v4203_v11 }
  0x3a   : > { %1248 = vmatpush.bf16.msrb.mxu2 %v4207_v26 }
  0x3d   : > { %1080 = vmatpush.bf16.msrb.mxu1 %v4195_v28 }
  0x3e   : > { %1249 = vmatpush.bf16.msrb.mxu2 %v4199_v40 }
  0x41   : > { %1081 = vmatpush.bf16.msrb.mxu1 %v4187_v52 }
  0x44   : > { %4154 = vmatmul.msk.bf16.gmra.mxu0 %vm478_vm1, %v405_v54  ;;  %4163 = vmatmul.msk.bf16.gmra.mxu1 %vm478_vm1, %v414_v55  ;;  %v4188_v54 = vld [vmem:[%s6423_s3 + $0x8] sm:$0xf0]  ;;  %v353_v55 = vld [vmem:[%s4811_s26 + $0x70] sm:$0xff] }
  0x45   : > { %4172 = vmatmul.msk.bf16.gmra.mxu2 %vm478_vm1, %v423_v56  ;;  %v4191_v56 = vor.u32 %v4383_v53, %v4188_v54  ;;  %v410_v62 = vpack.c.bf16 %v354_v57, %v353_v55 }
  0x47   : > { %1250 = vmatpush.bf16.msrb.mxu2 %v4191_v56 }
  0x54   : > { %4155 = vmatmul.msk.bf16.gmra.mxu0 %vm478_vm1, %v406_v5  ;;  %4164 = vmatmul.msk.bf16.gmra.mxu1 %vm478_vm1, %v415_v6  ;;  %v411_v5 = vpack.c.bf16 %v356_v2, %v355_v1  ;;  %v420_v6 = vpack.c.bf16 %v374_v4, %v373_v3  ;;  %v4406_v2 = vld [vmem:[%s6425_s5 + $0x38] sm:$0xff]  ;;  %v393_v3 = vld [vmem:[%s4811_s26 + $0x1b0] sm:$0xff] }
  0x55   : > { %4173 = vmatmul.msk.bf16.gmra.mxu2 %vm478_vm1, %v424_v7  ;;  %v394_v4 = vld [vmem:[%s4811_s26 + $0x1b8] sm:$0xff]  ;;  %1992 = vmatpush.bf16.msrb.mxu3 %v4406_v2 }
  0x64   : > { %4156 = vmatmul.msk.bf16.gmra.mxu0 %vm478_vm1, %v407_v20  ;;  %4165 = vmatmul.msk.bf16.gmra.mxu1 %vm478_vm1, %v416_v21 }
  0x65   : > { %4174 = vmatmul.msk.bf16.gmra.mxu2 %vm478_vm1, %v425_v22 }
  0x74   : > { %4157 = vmatmul.msk.bf16.gmra.mxu0 %vm478_vm1, %v408_v35  ;;  %4166 = vmatmul.msk.bf16.gmra.mxu1 %vm478_vm1, %v417_v36  ;;  %v391_v35 = vld [vmem:[%s4811_s26 + $0x1a0] sm:$0xff]  ;;  %v392_v36 = vld [vmem:[%s4811_s26 + $0x1a8] sm:$0xff] }
  0x75   : > { %4175 = vmatmul.msk.bf16.gmra.mxu2 %vm478_vm1, %v426_v37  ;;  %v5008_v37 = vld [vmem:[%s6425_s5 + $0x78] sm:$0xff]  ;;  %v429_v41 = vpack.c.bf16 %v392_v36, %v391_v35 }
  0x76   : > { %2161 = vmatpush.bf16.msrb.mxu0 %v5008_v37 }
  0x77   : > { %4178 = vmatmul.msk.bf16.vlgmr.msra.gmra.mxu3 %vm478_vm1, %v429_v41 }
  0x84   : > { %4158 = vmatmul.msk.bf16.gmra.mxu0 %vm478_vm1, %v409_v47  ;;  %4167 = vmatmul.msk.bf16.gmra.mxu1 %vm478_vm1, %v418_v48 }
  0x85   : > { %4176 = vmatmul.msk.bf16.gmra.mxu2 %vm478_vm1, %v427_v49 }
  0x94   : > { %4159 = vmatmul.msk.bf16.gmra.mxu0 %vm478_vm1, %v410_v62  ;;  %4168 = vmatmul.msk.bf16.gmra.mxu1 %vm478_vm1, %v419_v63 }
  0x95   : > { %4177 = vmatmul.msk.bf16.gmra.mxu2 %vm478_vm1, %v428_v0 }
  0xa1   : > { %v588_v7 = vpop.f32.mrf.mxu0  ;;  %v633_v8 = vpop.f32.mrf.mxu1 }
  0xa2   : > { %v589_v10 = vadd.f32 %v4991_v9, %v588_v7  ;;  %v634_v11 = vadd.f32 %v4991_v9, %v633_v8  ;;  %v430_v8 = vpack.c.bf16 %v394_v4, %v393_v3 }
  0xa4   : > { %4160 = vmatmul.msk.bf16.gmra.mxu0 %vm478_vm1, %v411_v5  ;;  %4169 = vmatmul.msk.bf16.gmra.mxu1 %vm478_vm1, %v420_v6  ;;  %v812_v15 = vmul.f32 0.2, %v589_v10  ;;  %v830_v16 = vmul.f32 0.2, %v634_v11  ;;  %vm748_vm2 = vcmp.gt.f32.partialorder %v589_v10, 0.0  ;;  %vm766_vm3 = vcmp.gt.f32.partialorder %v634_v11, 0.0 }
  0xa5   : > { %4179 = vmatmul.msk.bf16.gmra.mxu3 %vm478_vm1, %v430_v8  ;;  %v4403_v8 = vld [vmem:[%s6425_s5 + $0x20] sm:$0xff] }
  0xa6   : > { %v876_v22 = vsel %vm748_vm2, %v589_v10, %v812_v15  ;;  %v894_v24 = vsel %vm766_vm3, %v634_v11, %v830_v16 }
  0xa8   : > { %v678_v12 = vpop.f32.mrf.mxu2 }
  0xa9   : > { %v590_v13 = vpop.f32.mrf.mxu0  ;;  %v635_v14 = vpop.f32.mrf.mxu1  ;;  %v679_v19 = vadd.f32 %v4991_v9, %v678_v12 }
  0xaa   : > { %v591_v17 = vadd.f32 %v4991_v9, %v590_v13  ;;  %v636_v18 = vadd.f32 %v4991_v9, %v635_v14 }
  0xab   : > { %v848_v27 = vmul.f32 0.2, %v679_v19  ;;  %vm784_vm6 = vcmp.gt.f32.partialorder %v679_v19, 0.0 }
  0xac   : > { %vm749_vm4 = vcmp.gt.f32.partialorder %v591_v17, 0.0  ;;  %v813_v20 = vmul.f32 0.2, %v591_v17  ;;  %vm767_vm5 = vcmp.gt.f32.partialorder %v636_v18, 0.0  ;;  %v831_v21 = vmul.f32 0.2, %v636_v18 }
  0xad   : > { %v912_v34 = vsel %vm784_vm6, %v679_v19, %v848_v27 }
  0xae   : > { %v877_v23 = vsel %vm749_vm4, %v591_v17, %v813_v20  ;;  %v895_v25 = vsel %vm767_vm5, %v636_v18, %v831_v21  ;;  %v5038_v21 = vld [vmem:[%s6425_s5 + $0x70] sm:$0xff] }
  0xaf   : > { %v940_v26 = vpack.c.bf16 %v877_v23, %v876_v22  ;;  %v5000_v28 = vpack.c.bf16 %v895_v25, %v894_v24  ;;  %v4405_v22 = vld [vmem:[%s6425_s5 + $0x30] sm:$0xff]  ;;  %2162 = vmatpush.bf16.msrb.mxu0 %v5038_v21 }
  0xb0   : > { %v680_v29 = vpop.f32.mrf.mxu2  ;;  %1993 = vmatpush.bf16.msrb.mxu3 %v4405_v22 }
  0xb1   : > { %v593_v30 = vpop.f32.mrf.mxu0  ;;  %v638_v31 = vpop.f32.mrf.mxu1  ;;  %1251 = vmatmul.bf16.vlgmr.msrb.gmra.mxu2 %v940_v26  ;;  %v681_v32 = vadd.f32 %v4991_v9, %v680_v29 }
  0xb2   : > { %v594_v39 = vadd.f32 %v4991_v9, %v593_v30  ;;  %v639_v40 = vadd.f32 %v4991_v9, %v638_v31 }
  0xb3   : > { %vm785_vm7 = vcmp.gt.f32.partialorder %v681_v32, 0.0  ;;  %v849_v33 = vmul.f32 0.2, %v681_v32 }
  0xb4   : > { %1082 = vmatmul.bf16.vlgmr.msrb.gmra.mxu1 %v940_v26  ;;  %v814_v46 = vmul.f32 0.2, %v594_v39  ;;  %v832_v47 = vmul.f32 0.2, %v639_v40  ;;  %vm768_vm8 = vcmp.gt.f32.partialorder %v639_v40, 0.0  ;;  %vm750_vm9 = vcmp.gt.f32.partialorder %v594_v39, 0.0 }
  0xb5   : > { %v913_v38 = vsel %vm785_vm7, %v681_v32, %v849_v33 }
  0xb6   : > { %v5012_v42 = vpack.c.bf16 %v913_v38, %v912_v34  ;;  %v878_v53 = vsel %vm750_vm9, %v594_v39, %v814_v46  ;;  %v896_v55 = vsel %vm768_vm8, %v639_v40, %v832_v47  ;;  %v395_v38 = vld [vmem:[%s4811_s26 + $0x1c0] sm:$0xff]  ;;  %v396_v39 = vld [vmem:[%s4811_s26 + $0x1c8] sm:$0xff] }
  0xb8   : > { %v683_v43 = vpop.f32.mrf.mxu2 }
  0xb9   : > { %v595_v44 = vpop.f32.mrf.mxu0  ;;  %v640_v45 = vpop.f32.mrf.mxu1  ;;  %v684_v50 = vadd.f32 %v4991_v9, %v683_v43 }
  0xba   : > { %v596_v48 = vadd.f32 %v4991_v9, %v595_v44  ;;  %v641_v49 = vadd.f32 %v4991_v9, %v640_v45  ;;  %v431_v44 = vpack.c.bf16 %v396_v39, %v395_v38 }
  0xbb   : > { %v850_v58 = vmul.f32 0.2, %v684_v50  ;;  %vm786_vm12 = vcmp.gt.f32.partialorder %v684_v50, 0.0 }
  0xbc   : > { %v815_v51 = vmul.f32 0.2, %v596_v48  ;;  %vm769_vm10 = vcmp.gt.f32.partialorder %v641_v49, 0.0  ;;  %v833_v52 = vmul.f32 0.2, %v641_v49  ;;  %vm751_vm11 = vcmp.gt.f32.partialorder %v596_v48, 0.0  ;;  %4180 = vmatmul.msk.bf16.gmra.mxu3 %vm478_vm1, %v431_v44 }
  0xbd   : > { %v914_v1 = vsel %vm786_vm12, %v684_v50, %v850_v58 }
  0xbe   : > { %v879_v54 = vsel %vm751_vm11, %v596_v48, %v815_v51  ;;  %v897_v56 = vsel %vm769_vm10, %v641_v49, %v833_v52 }
  0xbf   : > { %v941_v57 = vpack.c.bf16 %v879_v54, %v878_v53  ;;  %v5019_v59 = vpack.c.bf16 %v897_v56, %v896_v55  ;;  %v4404_v56 = vld [vmem:[%s6425_s5 + $0x28] sm:$0xff] }
  0xc0   : > { %v685_v60 = vpop.f32.mrf.mxu2  ;;  %1994 = vmatpush.bf16.msrb.mxu3 %v4404_v56 }
  0xc1   : > { %v598_v61 = vpop.f32.mrf.mxu0  ;;  %v643_v62 = vpop.f32.mrf.mxu1  ;;  %1256 = vmatmul.bf16.gmra.mxu2 %v941_v57  ;;  %v686_v63 = vadd.f32 %v4991_v9, %v685_v60 }
  0xc2   : > { %v599_v6 = vadd.f32 %v4991_v9, %v598_v61  ;;  %v644_v7 = vadd.f32 %v4991_v9, %v643_v62 }
  0xc3   : > { %vm787_vm13 = vcmp.gt.f32.partialorder %v686_v63, 0.0  ;;  %v851_v0 = vmul.f32 0.2, %v686_v63 }
  0xc4   : > { %1087 = vmatmul.bf16.gmra.mxu1 %v941_v57  ;;  %v816_v14 = vmul.f32 0.2, %v599_v6  ;;  %v834_v15 = vmul.f32 0.2, %v644_v7  ;;  %vm770_vm14 = vcmp.gt.f32.partialorder %v644_v7, 0.0  ;;  %vm752_vm15 = vcmp.gt.f32.partialorder %v599_v6, 0.0  ;;  %1995 = vmatpush.bf16.msrb.mxu3 %v4403_v8 }
  0xc5   : > { %v915_v5 = vsel %vm787_vm13, %v686_v63, %v851_v0  ;;  %v5063_v57 = vld [vmem:[%s6425_s5 + $0x68] sm:$0xff] }
  0xc6   : > { %v5029_v10 = vpack.c.bf16 %v915_v5, %v914_v1  ;;  %v880_v23 = vsel %vm752_vm15, %v599_v6, %v816_v14  ;;  %v898_v25 = vsel %vm770_vm14, %v644_v7, %v834_v15  ;;  %2163 = vmatpush.bf16.msrb.mxu0 %v5063_v57 }
  0xc8   : > { %v688_v11 = vpop.f32.mrf.mxu2 }
  0xc9   : > { %v600_v12 = vpop.f32.mrf.mxu0  ;;  %v645_v13 = vpop.f32.mrf.mxu1  ;;  %v689_v18 = vadd.f32 %v4991_v9, %v688_v11  ;;  %v397_v11 = vld [vmem:[%s4811_s26 + $0x1d0] sm:$0xff] }
  0xca   : > { %v601_v16 = vadd.f32 %v4991_v9, %v600_v12  ;;  %v646_v17 = vadd.f32 %v4991_v9, %v645_v13  ;;  %v398_v12 = vld [vmem:[%s4811_s26 + $0x1d8] sm:$0xff] }
  0xcb   : > { %v852_v29 = vmul.f32 0.2, %v689_v18  ;;  %vm788_vm3 = vcmp.gt.f32.partialorder %v689_v18, 0.0 }
  0xcc   : > { %v817_v19 = vmul.f32 0.2, %v601_v16  ;;  %vm771_vm0 = vcmp.gt.f32.partialorder %v646_v17, 0.0  ;;  %v835_v20 = vmul.f32 0.2, %v646_v17  ;;  %vm753_vm2 = vcmp.gt.f32.partialorder %v601_v16, 0.0 }
  0xcd   : > { %v916_v36 = vsel %vm788_vm3, %v689_v18, %v852_v29 }
  0xce   : > { %v881_v24 = vsel %vm753_vm2, %v601_v16, %v817_v19  ;;  %v899_v26 = vsel %vm771_vm0, %v646_v17, %v835_v20  ;;  %v432_v16 = vpack.c.bf16 %v398_v12, %v397_v11 }
  0xcf   : > { %v942_v27 = vpack.c.bf16 %v881_v24, %v880_v23  ;;  %v5044_v30 = vpack.c.bf16 %v899_v26, %v898_v25 }
  0xd0   : > { %v690_v31 = vpop.f32.mrf.mxu2  ;;  %4181 = vmatmul.msk.bf16.gmra.mxu3 %vm478_vm1, %v432_v16 }
  0xd1   : > { %v603_v32 = vpop.f32.mrf.mxu0  ;;  %v648_v33 = vpop.f32.mrf.mxu1  ;;  %1261 = vmatmul.bf16.gmra.mxu2 %v942_v27  ;;  %v691_v34 = vadd.f32 %v4991_v9, %v690_v31  ;;  %v5085_v31 = vld [vmem:[%s6425_s5 + $0x60] sm:$0xff] }
  0xd2   : > { %v604_v41 = vadd.f32 %v4991_v9, %v603_v32  ;;  %v649_v43 = vadd.f32 %v4991_v9, %v648_v33  ;;  %2164 = vmatpush.bf16.msrb.mxu0 %v5085_v31 }
  0xd3   : > { %vm789_vm4 = vcmp.gt.f32.partialorder %v691_v34, 0.0  ;;  %v853_v35 = vmul.f32 0.2, %v691_v34 }
  0xd4   : > { %1092 = vmatmul.bf16.gmra.mxu1 %v942_v27  ;;  %v818_v49 = vmul.f32 0.2, %v604_v41  ;;  %v836_v50 = vmul.f32 0.2, %v649_v43  ;;  %vm772_vm5 = vcmp.gt.f32.partialorder %v649_v43, 0.0  ;;  %vm754_vm6 = vcmp.gt.f32.partialorder %v604_v41, 0.0 }
  0xd5   : > { %v917_v40 = vsel %vm789_vm4, %v691_v34, %v853_v35 }
  0xd6   : > { %v5051_v45 = vpack.c.bf16 %v917_v40, %v916_v36  ;;  %v882_v58 = vsel %vm754_vm6, %v604_v41, %v818_v49  ;;  %v900_v61 = vsel %vm772_vm5, %v649_v43, %v836_v50  ;;  %v399_v49 = vld [vmem:[%s4811_s26 + $0x1e0] sm:$0xff]  ;;  %v400_v50 = vld [vmem:[%s4811_s26 + $0x1e8] sm:$0xff] }
  0xd8   : > { %v693_v46 = vpop.f32.mrf.mxu2 }
  0xd9   : > { %v605_v47 = vpop.f32.mrf.mxu0  ;;  %v650_v48 = vpop.f32.mrf.mxu1  ;;  %v694_v53 = vadd.f32 %v4991_v9, %v693_v46 }
  0xda   : > { %v606_v51 = vadd.f32 %v4991_v9, %v605_v47  ;;  %v651_v52 = vadd.f32 %v4991_v9, %v650_v48  ;;  %v4402_v48 = vld [vmem:[%s6425_s5 + $0x18] sm:$0xff] }
  0xdb   : > { %v854_v0 = vmul.f32 0.2, %v694_v53  ;;  %vm790_vm9 = vcmp.gt.f32.partialorder %v694_v53, 0.0  ;;  %1996 = vmatpush.bf16.msrb.mxu3 %v4402_v48  ;;  %v4400_v48 = vld [vmem:[%s6425_s5 + $0x8] sm:$0xff] }
  0xdc   : > { %v819_v54 = vmul.f32 0.2, %v606_v51  ;;  %vm773_vm7 = vcmp.gt.f32.partialorder %v651_v52, 0.0  ;;  %v837_v55 = vmul.f32 0.2, %v651_v52  ;;  %vm755_vm8 = vcmp.gt.f32.partialorder %v606_v51, 0.0 }
  0xdd   : > { %v918_v7 = vsel %vm790_vm9, %v694_v53, %v854_v0 }
  0xde   : > { %v883_v60 = vsel %vm755_vm8, %v606_v51, %v819_v54  ;;  %v901_v62 = vsel %vm773_vm7, %v651_v52, %v837_v55  ;;  %v433_v54 = vpack.c.bf16 %v400_v50, %v399_v49 }
  0xdf   : > { %v943_v63 = vpack.c.bf16 %v883_v60, %v882_v58  ;;  %v5066_v1 = vpack.c.bf16 %v901_v62, %v900_v61 }
  0xe0   : > { %v695_v2 = vpop.f32.mrf.mxu2  ;;  %4182 = vmatmul.msk.bf16.gmra.mxu3 %vm478_vm1, %v433_v54 }
  0xe1   : > { %v608_v3 = vpop.f32.mrf.mxu0  ;;  %v653_v4 = vpop.f32.mrf.mxu1  ;;  %1266 = vmatmul.bf16.gmra.mxu2 %v943_v63  ;;  %v696_v5 = vadd.f32 %v4991_v9, %v695_v2 }
  0xe2   : > { %v609_v14 = vadd.f32 %v4991_v9, %v608_v3  ;;  %v654_v15 = vadd.f32 %v4991_v9, %v653_v4 }
  0xe3   : > { %vm791_vm10 = vcmp.gt.f32.partialorder %v696_v5, 0.0  ;;  %v855_v6 = vmul.f32 0.2, %v696_v5 }
  0xe4   : > { %1097 = vmatmul.bf16.gmra.mxu1 %v943_v63  ;;  %v820_v22 = vmul.f32 0.2, %v609_v14  ;;  %v838_v23 = vmul.f32 0.2, %v654_v15  ;;  %vm756_vm11 = vcmp.gt.f32.partialorder %v609_v14, 0.0  ;;  %vm774_vm12 = vcmp.gt.f32.partialorder %v654_v15, 0.0 }
  0xe5   : > { %v919_v13 = vsel %vm791_vm10, %v696_v5, %v855_v6  ;;  %v4401_v5 = vld [vmem:[%s6425_s5 + $0x10] sm:$0xff]  ;;  %v5110_v6 = vld [vmem:[%s6425_s5 + $0x58] sm:$0xff] }
  0xe6   : > { %v5076_v17 = vpack.c.bf16 %v919_v13, %v918_v7  ;;  %v884_v32 = vsel %vm756_vm11, %v609_v14, %v820_v22  ;;  %v902_v34 = vsel %vm774_vm12, %v654_v15, %v838_v23  ;;  %1997 = vmatpush.bf16.msrb.mxu3 %v4401_v5  ;;  %2165 = vmatpush.bf16.msrb.mxu0 %v5110_v6 }
  0xe8   : > { %v698_v18 = vpop.f32.mrf.mxu2 }
  0xe9   : > { %v610_v19 = vpop.f32.mrf.mxu0  ;;  %v655_v20 = vpop.f32.mrf.mxu1  ;;  %v699_v26 = vadd.f32 %v4991_v9, %v698_v18 }
  0xea   : > { %v611_v24 = vadd.f32 %v4991_v9, %v610_v19  ;;  %v656_v25 = vadd.f32 %v4991_v9, %v655_v20  ;;  %1998 = vmatpush.bf16.msrb.mxu3 %v4400_v48 }
  0xeb   : > { %v856_v38 = vmul.f32 0.2, %v699_v26  ;;  %vm792_vm15 = vcmp.gt.f32.partialorder %v699_v26, 0.0 }
  0xec   : > { %vm757_vm13 = vcmp.gt.f32.partialorder %v611_v24, 0.0  ;;  %v821_v27 = vmul.f32 0.2, %v611_v24  ;;  %vm775_vm14 = vcmp.gt.f32.partialorder %v656_v25, 0.0  ;;  %v839_v29 = vmul.f32 0.2, %v656_v25 }
  0xed   : > { %v920_v47 = vsel %vm792_vm15, %v699_v26, %v856_v38 }
  0xee   : > { %v885_v33 = vsel %vm757_vm13, %v611_v24, %v821_v27  ;;  %v903_v35 = vsel %vm775_vm14, %v656_v25, %v839_v29  ;;  %v401_v24 = vld [vmem:[%s4811_s26 + $0x1f0] sm:$0xff]  ;;  %v402_v25 = vld [vmem:[%s4811_s26 + $0x1f8] sm:$0xff] }
  0xef   : > { %v944_v36 = vpack.c.bf16 %v885_v33, %v884_v32  ;;  %v5088_v39 = vpack.c.bf16 %v903_v35, %v902_v34  ;;  %v434_v32 = vpack.c.bf16 %v402_v25, %v401_v24 }
  0xf0   : > { %v700_v40 = vpop.f32.mrf.mxu2 }
  0xf1   : > { %v613_v41 = vpop.f32.mrf.mxu0  ;;  %v658_v43 = vpop.f32.mrf.mxu1  ;;  %1271 = vmatmul.bf16.gmra.mxu2 %v944_v36  ;;  %v701_v44 = vadd.f32 %v4991_v9, %v700_v40  ;;  %4183 = vmatmul.msk.bf16.gmra.mxu3 %vm478_vm1, %v434_v32 }
  0xf2   : > { %v614_v52 = vadd.f32 %v4991_v9, %v613_v41  ;;  %v659_v53 = vadd.f32 %v4991_v9, %v658_v43 }
  0xf3   : > { %vm793_vm0 = vcmp.gt.f32.partialorder %v701_v44, 0.0  ;;  %v857_v46 = vmul.f32 0.2, %v701_v44 }
  0xf4   : > { %1102 = vmatmul.bf16.gmra.mxu1 %v944_v36  ;;  %v822_v61 = vmul.f32 0.2, %v614_v52  ;;  %v840_v62 = vmul.f32 0.2, %v659_v53  ;;  %vm758_vm2 = vcmp.gt.f32.partialorder %v614_v52, 0.0  ;;  %vm776_vm3 = vcmp.gt.f32.partialorder %v659_v53, 0.0 }
  0xf5   : > { %v921_v51 = vsel %vm793_vm0, %v701_v44, %v857_v46 }
  0xf6   : > { %v5098_v55 = vpack.c.bf16 %v921_v51, %v920_v47  ;;  %v886_v7 = vsel %vm758_vm2, %v614_v52, %v822_v61  ;;  %v904_v11 = vsel %vm776_vm3, %v659_v53, %v840_v62 }
  0xf8   : > { %v703_v56 = vpop.f32.mrf.mxu2 }
  0xf9   : > { %v615_v58 = vpop.f32.mrf.mxu0  ;;  %v660_v60 = vpop.f32.mrf.mxu1  ;;  %v704_v2 = vadd.f32 %v4991_v9, %v703_v56 }
  0xfa   : > { %v616_v63 = vadd.f32 %v4991_v9, %v615_v58  ;;  %v661_v0 = vadd.f32 %v4991_v9, %v660_v60 }
  0xfb   : > { %v858_v14 = vmul.f32 0.2, %v704_v2  ;;  %vm794_vm6 = vcmp.gt.f32.partialorder %v704_v2, 0.0 }
  0xfc   : > { %vm759_vm4 = vcmp.gt.f32.partialorder %v616_v63, 0.0  ;;  %v823_v3 = vmul.f32 0.2, %v616_v63  ;;  %vm777_vm5 = vcmp.gt.f32.partialorder %v661_v0, 0.0  ;;  %v841_v4 = vmul.f32 0.2, %v661_v0 }
  0xfd   : > { %v922_v23 = vsel %vm794_vm6, %v704_v2, %v858_v14  ;;  %v5135_v2 = vld [vmem:[%s6425_s5 + $0x50] sm:$0xff] }
  0xfe   : > { %v887_v8 = vsel %vm759_vm4, %v616_v63, %v823_v3  ;;  %v905_v12 = vsel %vm777_vm5, %v661_v0, %v841_v4  ;;  %2166 = vmatpush.bf16.msrb.mxu0 %v5135_v2 }
  0xff   : > { %v945_v13 = vpack.c.bf16 %v887_v8, %v886_v7  ;;  %v5113_v15 = vpack.c.bf16 %v905_v12, %v904_v11  ;;  %v4399_v8 = vld [vmem:[%s6425_s5] sm:$0xff] }
 0x100   : > { %v705_v16 = vpop.f32.mrf.mxu2  ;;  %1999 = vmatpush.bf16.msrb.mxu3 %v4399_v8 }
 0x101   : > { %v618_v18 = vpop.f32.mrf.mxu0  ;;  %v663_v19 = vpop.f32.mrf.mxu1  ;;  %1276 = vmatmul.bf16.gmra.mxu2 %v945_v13  ;;  %v706_v20 = vadd.f32 %v4991_v9, %v705_v16 }
 0x102   : > { %v619_v27 = vadd.f32 %v4991_v9, %v618_v18  ;;  %v664_v29 = vadd.f32 %v4991_v9, %v663_v19 }
 0x103   : > { %vm795_vm7 = vcmp.gt.f32.partialorder %v706_v20, 0.0  ;;  %v859_v22 = vmul.f32 0.2, %v706_v20 }
 0x104   : > { %1107 = vmatmul.bf16.gmra.mxu1 %v945_v13  ;;  %v824_v38 = vmul.f32 0.2, %v619_v27  ;;  %v842_v40 = vmul.f32 0.2, %v664_v29  ;;  %vm760_vm8 = vcmp.gt.f32.partialorder %v619_v27, 0.0  ;;  %vm778_vm9 = vcmp.gt.f32.partialorder %v664_v29, 0.0  ;;  %4430 = vmatpush.bf16.msra.mxu3 %v5008_v37 }
 0x105   : > { %v923_v26 = vsel %vm795_vm7, %v706_v20, %v859_v22  ;;  %v4408_v22 = vld [vmem:[%s6425_s5 + $0x48] sm:$0xff] }
 0x106   : > { %v5120_v33 = vpack.c.bf16 %v923_v26, %v922_v23  ;;  %v888_v49 = vsel %vm760_vm8, %v619_v27, %v824_v38  ;;  %v906_v51 = vsel %vm778_vm9, %v664_v29, %v842_v40  ;;  %2167 = vmatpush.bf16.msrb.mxu0 %v4408_v22 }
 0x108   : > { %v708_v34 = vpop.f32.mrf.mxu2  ;;  %4431 = vmatpush.bf16.msra.mxu3 %v5038_v21 }
 0x109   : > { %v620_v35 = vpop.f32.mrf.mxu0  ;;  %v665_v36 = vpop.f32.mrf.mxu1  ;;  %v709_v44 = vadd.f32 %v4991_v9, %v708_v34  ;;  %v4407_v34 = vld [vmem:[%s6425_s5 + $0x40] sm:$0xff] }
 0x10a   : > { %v621_v41 = vadd.f32 %v4991_v9, %v620_v35  ;;  %v666_v43 = vadd.f32 %v4991_v9, %v665_v36  ;;  %2168 = vmatpush.bf16.msrb.mxu0 %v4407_v34 }
 0x10b   : > { %v860_v54 = vmul.f32 0.2, %v709_v44  ;;  %vm796_vm1 = vcmp.gt.f32.partialorder %v709_v44, 0.0 }
 0x10c   : > { %vm761_vm10 = vcmp.gt.f32.partialorder %v621_v41, 0.0  ;;  %v825_v46 = vmul.f32 0.2, %v621_v41  ;;  %vm779_vm11 = vcmp.gt.f32.partialorder %v666_v43, 0.0  ;;  %v843_v47 = vmul.f32 0.2, %v666_v43  ;;  %4432 = vmatpush.bf16.msra.mxu3 %v5063_v57 }
 0x10d   : > { %v924_v0 = vsel %vm796_vm1, %v709_v44, %v860_v54 }
 0x10e   : > { %v889_v50 = vsel %vm761_vm10, %v621_v41, %v825_v46  ;;  %v907_v52 = vsel %vm779_vm11, %v666_v43, %v843_v47 }
 0x10f   : > { %v946_v53 = vpack.c.bf16 %v889_v50, %v888_v49  ;;  %v5129_v56 = vpack.c.bf16 %v907_v52, %v906_v51 }
 0x110   : > { %v710_v58 = vpop.f32.mrf.mxu2  ;;  %4433 = vmatpush.bf16.msra.mxu3 %v5085_v31 }
 0x111   : > { %v623_v60 = vpop.f32.mrf.mxu0  ;;  %v668_v61 = vpop.f32.mrf.mxu1  ;;  %1281 = vmatmul.bf16.gmra.mxu2 %v946_v53  ;;  %v711_v62 = vadd.f32 %v4991_v9, %v710_v58 }
 0x112   : > { %v624_v4 = vadd.f32 %v4991_v9, %v623_v60  ;;  %v669_v5 = vadd.f32 %v4991_v9, %v668_v61 }
 0x113   : > { %vm797_vm12 = vcmp.gt.f32.partialorder %v711_v62, 0.0  ;;  %v861_v63 = vmul.f32 0.2, %v711_v62 }
 0x114   : > { %1112 = vmatmul.bf16.gmra.mxu1 %v946_v53  ;;  %v826_v14 = vmul.f32 0.2, %v624_v4  ;;  %v844_v16 = vmul.f32 0.2, %v669_v5  ;;  %vm762_vm13 = vcmp.gt.f32.partialorder %v624_v4, 0.0  ;;  %vm780_vm14 = vcmp.gt.f32.partialorder %v669_v5, 0.0  ;;  %4434 = vmatpush.bf16.msra.mxu3 %v5110_v6 }
 0x115   : > { %v925_v3 = vsel %vm797_vm12, %v711_v62, %v861_v63  ;;  %v988_v63 = vld [vmem:[%s6424_s4] sm:$0x3] }
 0x116   : > { %v5139_v7 = vpack.c.bf16 %v925_v3, %v924_v0  ;;  %v890_v25 = vsel %vm762_vm13, %v624_v4, %v826_v14  ;;  %v908_v27 = vsel %vm780_vm14, %v669_v5, %v844_v16  ;;  %v5174_v3 = vperm.slane %v988_v63, 0 }
 0x117   : > { %v5176_v5 = vperm.slane %v988_v63, 1 }
 0x118   : > { %v713_v11 = vpop.f32.mrf.mxu2  ;;  %4435 = vmatpush.bf16.msra.mxu3 %v5135_v2 }
 0x119   : > { %v625_v12 = vpop.f32.mrf.mxu0  ;;  %v670_v13 = vpop.f32.mrf.mxu1  ;;  %v714_v20 = vadd.f32 %v4991_v9, %v713_v11 }
 0x11a   : > { %v626_v18 = vadd.f32 %v4991_v9, %v625_v12  ;;  %v671_v19 = vadd.f32 %v4991_v9, %v670_v13 }
 0x11b   : > { %v862_v32 = vmul.f32 0.2, %v714_v20  ;;  %vm798_vm2 = vcmp.gt.f32.partialorder %v714_v20, 0.0 }
 0x11c   : > { %vm763_vm15 = vcmp.gt.f32.partialorder %v626_v18, 0.0  ;;  %v827_v23 = vmul.f32 0.2, %v626_v18  ;;  %vm781_vm0 = vcmp.gt.f32.partialorder %v671_v19, 0.0  ;;  %v845_v24 = vmul.f32 0.2, %v671_v19  ;;  %4436 = vmatpush.bf16.msra.mxu3 %v4408_v22 }
 0x11d   : > { %v926_v43 = vsel %vm798_vm2, %v714_v20, %v862_v32 }
 0x11e   : > { %v891_v26 = vsel %vm763_vm15, %v626_v18, %v827_v23  ;;  %v909_v29 = vsel %vm781_vm0, %v671_v19, %v845_v24 }
 0x11f   : > { %v947_v37 = vpack.c.bf16 %v891_v26, %v890_v25  ;;  %v5156_v35 = vpack.c.bf16 %v909_v29, %v908_v27 }
 0x120   : > { %v715_v36 = vpop.f32.mrf.mxu2  ;;  %4437 = vmatpush.bf16.msra.mxu3 %v4407_v34 }
 0x121   : > { %v628_v38 = vpop.f32.mrf.mxu0  ;;  %v673_v40 = vpop.f32.mrf.mxu1  ;;  %1286 = vmatmul.bf16.gmra.mxu2 %v947_v37  ;;  %v716_v41 = vadd.f32 %v4991_v9, %v715_v36 }
 0x122   : > { %v629_v46 = vadd.f32 %v4991_v9, %v628_v38  ;;  %v674_v47 = vadd.f32 %v4991_v9, %v673_v40 }
 0x123   : > { %vm799_vm3 = vcmp.gt.f32.partialorder %v716_v41, 0.0  ;;  %v863_v21 = vmul.f32 0.2, %v716_v41 }
 0x124   : > { %1117 = vmatmul.bf16.gmra.mxu1 %v947_v37  ;;  %v828_v51 = vmul.f32 0.2, %v629_v46  ;;  %v846_v52 = vmul.f32 0.2, %v674_v47  ;;  %vm764_vm4 = vcmp.gt.f32.partialorder %v629_v46, 0.0  ;;  %vm782_vm5 = vcmp.gt.f32.partialorder %v674_v47, 0.0 }
 0x125   : > { %v927_v44 = vsel %vm799_vm3, %v716_v41, %v863_v21 }
 0x126   : > { %v5163_v48 = vpack.c.bf16 %v927_v44, %v926_v43  ;;  %v892_v60 = vsel %vm764_vm4, %v629_v46, %v828_v51  ;;  %v910_v61 = vsel %vm782_vm5, %v674_v47, %v846_v52 }
 0x129   : > { %v630_v49 = vpop.f32.mrf.mxu0  ;;  %v675_v50 = vpop.f32.mrf.mxu1 }
 0x12a   : > { %v631_v53 = vadd.f32 %v4991_v9, %v630_v49  ;;  %v676_v57 = vadd.f32 %v4991_v9, %v675_v50 }
 0x12c   : > { %vm765_vm6 = vcmp.gt.f32.partialorder %v631_v53, 0.0  ;;  %v829_v54 = vmul.f32 0.2, %v631_v53  ;;  %vm783_vm7 = vcmp.gt.f32.partialorder %v676_v57, 0.0  ;;  %v847_v58 = vmul.f32 0.2, %v676_v57 }
 0x12e   : > { %v893_v31 = vsel %vm765_vm6, %v631_v53, %v829_v54  ;;  %v911_v62 = vsel %vm783_vm7, %v676_v57, %v847_v58 }
 0x12f   : > { %v948_v0 = vpack.c.bf16 %v893_v31, %v892_v60  ;;  %v5172_v9 = vpack.c.bf16 %v911_v62, %v910_v61 }
 0x131   : > { %v1083_v6 = vpop.f32.mrf.mxu1  ;;  %1291 = vmatmul.bf16.gmra.mxu2 %v948_v0 }
 0x132   : > { %v1084_v8 = vadd.f32 %v1083_v6, %v5174_v3 }
 0x134   : > { %1122 = vmatmul.bf16.gmra.mxu1 %v948_v0  ;;  %v1252_v4 = vpop.f32.mrf.mxu2  ;;  %v1540_v12 = vmul.f32 0.2, %v1084_v8  ;;  %vm1412_vm8 = vcmp.gt.f32.partialorder %v1084_v8, 0.0 }
 0x135   : > { %v1253_v2 = vadd.f32 %v1252_v4, %v5176_v5 }
 0x136   : > { %v1668_v20 = vsel %vm1412_vm8, %v1084_v8, %v1540_v12 }
 0x137   : > { %v1541_v18 = vmul.f32 0.2, %v1253_v2  ;;  %vm1413_vm10 = vcmp.gt.f32.partialorder %v1253_v2, 0.0 }
 0x139   : > { %v1085_v11 = vpop.f32.mrf.mxu1  ;;  %v1669_v26 = vsel %vm1413_vm10, %v1253_v2, %v1541_v18 }
 0x13a   : > { %v1086_v13 = vadd.f32 %v1085_v11, %v5174_v3 }
 0x13c   : > { %vm1414_vm9 = vcmp.gt.f32.partialorder %v1086_v13, 0.0  ;;  %v1542_v14 = vmul.f32 0.2, %v1086_v13  ;;  %v1254_v16 = vpop.f32.mrf.mxu2 }
 0x13d   : > { %v1255_v19 = vadd.f32 %v1254_v16, %v5176_v5 }
 0x13e   : > { %v1670_v22 = vsel %vm1414_vm9, %v1086_v13, %v1542_v14 }
 0x13f   : > { %vm1415_vm11 = vcmp.gt.f32.partialorder %v1255_v19, 0.0  ;;  %v1543_v23 = vmul.f32 0.2, %v1255_v19  ;;  %v1796_v24 = vpack.c.bf16 %v1670_v22, %v1668_v20 }
 0x141   : > { %v1088_v25 = vpop.f32.mrf.mxu1  ;;  %1296 = vmatmul.bf16.gmra.mxu2 %v5000_v28  ;;  %2000 = vmatmul.bf16.vlgmr.msrb.gmra.mxu3 %v1796_v24  ;;  %v1671_v27 = vsel %vm1415_vm11, %v1255_v19, %v1543_v23 }
 0x142   : > { %v1797_v29 = vpack.c.bf16 %v1671_v27, %v1669_v26  ;;  %v1089_v32 = vadd.f32 %v1088_v25, %v5174_v3 }
 0x144   : > { %1127 = vmatmul.bf16.gmra.mxu1 %v5000_v28  ;;  %v1257_v37 = vpop.f32.mrf.mxu2  ;;  %2169 = vmatmul.bf16.vlgmr.msrb.gmra.mxu0 %v1797_v29  ;;  %v1544_v38 = vmul.f32 0.2, %v1089_v32  ;;  %vm1416_vm1 = vcmp.gt.f32.partialorder %v1089_v32, 0.0  ;;  %v5188_v28 = vpop.f32.mrf.mxu3 }
 0x145   : > { %v1258_v34 = vadd.f32 %v1257_v37, %v5176_v5 }
 0x146   : > { %v1672_v46 = vsel %vm1416_vm1, %v1089_v32, %v1544_v38 }
 0x147   : > { %v1545_v43 = vmul.f32 0.2, %v1258_v34  ;;  %vm1417_vm13 = vcmp.gt.f32.partialorder %v1258_v34, 0.0 }
 0x149   : > { %v1090_v36 = vpop.f32.mrf.mxu1  ;;  %v1673_v52 = vsel %vm1417_vm13, %v1258_v34, %v1545_v43 }
 0x14a   : > { %v1091_v40 = vadd.f32 %v1090_v36, %v5174_v3 }
 0x14c   : > { %v1546_v41 = vmul.f32 0.2, %v1091_v40  ;;  %v1259_v21 = vpop.f32.mrf.mxu2  ;;  %vm1418_vm12 = vcmp.gt.f32.partialorder %v1091_v40, 0.0  ;;  %v5193_v60 = vpop.f32.mrf.mxu3 }
 0x14d   : > { %v1260_v44 = vadd.f32 %v1259_v21, %v5176_v5 }
 0x14e   : > { %v1674_v47 = vsel %vm1418_vm12, %v1091_v40, %v1546_v41 }
 0x14f   : > { %v1547_v49 = vmul.f32 0.2, %v1260_v44  ;;  %v1798_v50 = vpack.c.bf16 %v1674_v47, %v1672_v46  ;;  %vm1419_vm14 = vcmp.gt.f32.partialorder %v1260_v44, 0.0 }
 0x151   : > { %v1093_v51 = vpop.f32.mrf.mxu1  ;;  %1301 = vmatmul.bf16.gmra.mxu2 %v5019_v59  ;;  %2005 = vmatmul.bf16.gmra.mxu3 %v1798_v50  ;;  %v1675_v53 = vsel %vm1419_vm14, %v1260_v44, %v1547_v49 }
 0x152   : > { %v1799_v57 = vpack.c.bf16 %v1675_v53, %v1673_v52  ;;  %v1094_v58 = vadd.f32 %v1093_v51, %v5174_v3 }
 0x154   : > { %1132 = vmatmul.bf16.gmra.mxu1 %v5019_v59  ;;  %v1262_v54 = vpop.f32.mrf.mxu2  ;;  %2174 = vmatmul.bf16.gmra.mxu0 %v1799_v57  ;;  %v1548_v62 = vmul.f32 0.2, %v1094_v58  ;;  %vm1420_vm15 = vcmp.gt.f32.partialorder %v1094_v58, 0.0  ;;  %v5199_v19 = vpop.f32.mrf.mxu3 }
 0x155   : > { %v1263_v31 = vadd.f32 %v1262_v54, %v5176_v5 }
 0x156   : > { %v1676_v59 = vsel %vm1420_vm15, %v1094_v58, %v1548_v62 }
 0x157   : > { %v1549_v4 = vmul.f32 0.2, %v1263_v31  ;;  %vm1421_vm2 = vcmp.gt.f32.partialorder %v1263_v31, 0.0 }
 0x159   : > { %v1095_v61 = vpop.f32.mrf.mxu1  ;;  %v1677_v14 = vsel %vm1421_vm2, %v1263_v31, %v1549_v4 }
 0x15a   : > { %v1096_v63 = vadd.f32 %v1095_v61, %v5174_v3 }
 0x15c   : > { %v1550_v0 = vmul.f32 0.2, %v1096_v63  ;;  %v1264_v6 = vpop.f32.mrf.mxu2  ;;  %vm1422_vm0 = vcmp.gt.f32.partialorder %v1096_v63, 0.0  ;;  %v5205_v37 = vpop.f32.mrf.mxu3 }
 0x15d   : > { %v1265_v8 = vadd.f32 %v1264_v6, %v5176_v5 }
 0x15e   : > { %v1678_v2 = vsel %vm1422_vm0, %v1096_v63, %v1550_v0 }
 0x15f   : > { %v1551_v11 = vmul.f32 0.2, %v1265_v8  ;;  %v1800_v12 = vpack.c.bf16 %v1678_v2, %v1676_v59  ;;  %vm1423_vm3 = vcmp.gt.f32.partialorder %v1265_v8, 0.0 }
 0x161   : > { %v1098_v13 = vpop.f32.mrf.mxu1  ;;  %1306 = vmatmul.bf16.gmra.mxu2 %v5044_v30  ;;  %2010 = vmatmul.bf16.gmra.mxu3 %v1800_v12  ;;  %v1679_v16 = vsel %vm1423_vm3, %v1265_v8, %v1551_v11 }
 0x162   : > { %v1801_v18 = vpack.c.bf16 %v1679_v16, %v1677_v14  ;;  %v1099_v22 = vadd.f32 %v1098_v13, %v5174_v3 }
 0x164   : > { %1137 = vmatmul.bf16.gmra.mxu1 %v5044_v30  ;;  %v1267_v20 = vpop.f32.mrf.mxu2  ;;  %2179 = vmatmul.bf16.gmra.mxu0 %v1801_v18  ;;  %v1552_v25 = vmul.f32 0.2, %v1099_v22  ;;  %vm1424_vm4 = vcmp.gt.f32.partialorder %v1099_v22, 0.0  ;;  %v5211_v49 = vpop.f32.mrf.mxu3 }
 0x165   : > { %v1268_v23 = vadd.f32 %v1267_v20, %v5176_v5 }
 0x166   : > { %v1680_v30 = vsel %vm1424_vm4, %v1099_v22, %v1552_v25 }
 0x167   : > { %v1553_v32 = vmul.f32 0.2, %v1268_v23  ;;  %vm1425_vm6 = vcmp.gt.f32.partialorder %v1268_v23, 0.0 }
 0x169   : > { %v1100_v24 = vpop.f32.mrf.mxu1  ;;  %v1681_v21 = vsel %vm1425_vm6, %v1268_v23, %v1553_v32 }
 0x16a   : > { %v1101_v26 = vadd.f32 %v1100_v24, %v5174_v3 }
 0x16c   : > { %v1554_v27 = vmul.f32 0.2, %v1101_v26  ;;  %v1269_v29 = vpop.f32.mrf.mxu2  ;;  %vm1426_vm5 = vcmp.gt.f32.partialorder %v1101_v26, 0.0  ;;  %v5216_v0 = vpop.f32.mrf.mxu3 }
 0x16d   : > { %v1270_v34 = vadd.f32 %v1269_v29, %v5176_v5 }
 0x16e   : > { %v1682_v36 = vsel %vm1426_vm5, %v1101_v26, %v1554_v27 }
 0x16f   : > { %vm1427_vm7 = vcmp.gt.f32.partialorder %v1270_v34, 0.0  ;;  %v1555_v38 = vmul.f32 0.2, %v1270_v34  ;;  %v1802_v40 = vpack.c.bf16 %v1682_v36, %v1680_v30 }
 0x171   : > { %v1103_v41 = vpop.f32.mrf.mxu1  ;;  %1311 = vmatmul.bf16.gmra.mxu2 %v5066_v1  ;;  %2015 = vmatmul.bf16.gmra.mxu3 %v1802_v40  ;;  %v1683_v43 = vsel %vm1427_vm7, %v1270_v34, %v1555_v38 }
 0x172   : > { %v1803_v44 = vpack.c.bf16 %v1683_v43, %v1681_v21  ;;  %v1104_v47 = vadd.f32 %v1103_v41, %v5174_v3 }
 0x174   : > { %1142 = vmatmul.bf16.gmra.mxu1 %v5066_v1  ;;  %v1272_v46 = vpop.f32.mrf.mxu2  ;;  %2184 = vmatmul.bf16.gmra.mxu0 %v1803_v44  ;;  %v1556_v52 = vmul.f32 0.2, %v1104_v47  ;;  %vm1428_vm8 = vcmp.gt.f32.partialorder %v1104_v47, 0.0  ;;  %v5223_v18 = vpop.f32.mrf.mxu3 }
 0x175   : > { %v1273_v50 = vadd.f32 %v1272_v46, %v5176_v5 }
 0x176   : > { %v1684_v1 = vsel %vm1428_vm8, %v1104_v47, %v1556_v52 }
 0x177   : > { %v1557_v58 = vmul.f32 0.2, %v1273_v50  ;;  %vm1429_vm10 = vcmp.gt.f32.partialorder %v1273_v50, 0.0 }
 0x179   : > { %v1105_v51 = vpop.f32.mrf.mxu1  ;;  %v1685_v4 = vsel %vm1429_vm10, %v1273_v50, %v1557_v58 }
 0x17a   : > { %v1106_v53 = vadd.f32 %v1105_v51, %v5174_v3 }
 0x17c   : > { %v1558_v57 = vmul.f32 0.2, %v1106_v53  ;;  %v1274_v54 = vpop.f32.mrf.mxu2  ;;  %vm1430_vm9 = vcmp.gt.f32.partialorder %v1106_v53, 0.0  ;;  %v5227_v36 = vpop.f32.mrf.mxu3 }
 0x17d   : > { %v1275_v31 = vadd.f32 %v1274_v54, %v5176_v5 }
 0x17e   : > { %v1686_v61 = vsel %vm1430_vm9, %v1106_v53, %v1558_v57 }
 0x17f   : > { %vm1431_vm11 = vcmp.gt.f32.partialorder %v1275_v31, 0.0  ;;  %v1559_v62 = vmul.f32 0.2, %v1275_v31  ;;  %v1804_v63 = vpack.c.bf16 %v1686_v61, %v1684_v1 }
 0x181   : > { %v1108_v6 = vpop.f32.mrf.mxu1  ;;  %1316 = vmatmul.bf16.gmra.mxu2 %v5088_v39  ;;  %2020 = vmatmul.bf16.gmra.mxu3 %v1804_v63  ;;  %v1687_v8 = vsel %vm1431_vm11, %v1275_v31, %v1559_v62 }
 0x182   : > { %v1805_v59 = vpack.c.bf16 %v1687_v8, %v1685_v4  ;;  %v1109_v11 = vadd.f32 %v1108_v6, %v5174_v3 }
 0x184   : > { %1147 = vmatmul.bf16.gmra.mxu1 %v5088_v39  ;;  %v1277_v2 = vpop.f32.mrf.mxu2  ;;  %2189 = vmatmul.bf16.gmra.mxu0 %v1805_v59  ;;  %v1560_v14 = vmul.f32 0.2, %v1109_v11  ;;  %vm1432_vm1 = vcmp.gt.f32.partialorder %v1109_v11, 0.0  ;;  %v5234_v52 = vpop.f32.mrf.mxu3 }
 0x185   : > { %v1278_v12 = vadd.f32 %v1277_v2, %v5176_v5 }
 0x186   : > { %v1688_v39 = vsel %vm1432_vm1, %v1109_v11, %v1560_v14 }
 0x187   : > { %v1561_v23 = vmul.f32 0.2, %v1278_v12  ;;  %vm1433_vm13 = vcmp.gt.f32.partialorder %v1278_v12, 0.0 }
 0x189   : > { %v1110_v13 = vpop.f32.mrf.mxu1  ;;  %v1689_v32 = vsel %vm1433_vm13, %v1278_v12, %v1561_v23 }
 0x18a   : > { %v1111_v16 = vadd.f32 %v1110_v13, %v5174_v3 }
 0x18c   : > { %v1562_v20 = vmul.f32 0.2, %v1111_v16  ;;  %v1279_v22 = vpop.f32.mrf.mxu2  ;;  %vm1434_vm12 = vcmp.gt.f32.partialorder %v1111_v16, 0.0  ;;  %v5239_v6 = vpop.f32.mrf.mxu3 }
 0x18d   : > { %v1280_v24 = vadd.f32 %v1279_v22, %v5176_v5 }
 0x18e   : > { %v1690_v25 = vsel %vm1434_vm12, %v1111_v16, %v1562_v20 }
 0x18f   : > { %vm1435_vm14 = vcmp.gt.f32.partialorder %v1280_v24, 0.0  ;;  %v1563_v26 = vmul.f32 0.2, %v1280_v24  ;;  %v1806_v27 = vpack.c.bf16 %v1690_v25, %v1688_v39 }
 0x191   : > { %v1113_v29 = vpop.f32.mrf.mxu1  ;;  %1321 = vmatmul.bf16.gmra.mxu2 %v5113_v15  ;;  %2025 = vmatmul.bf16.gmra.mxu3 %v1806_v27  ;;  %v1691_v34 = vsel %vm1435_vm14, %v1280_v24, %v1563_v26 }
 0x192   : > { %v1807_v30 = vpack.c.bf16 %v1691_v34, %v1689_v32  ;;  %v1114_v40 = vadd.f32 %v1113_v29, %v5174_v3 }
 0x194   : > { %1152 = vmatmul.bf16.gmra.mxu1 %v5113_v15  ;;  %v1282_v38 = vpop.f32.mrf.mxu2  ;;  %2194 = vmatmul.bf16.gmra.mxu0 %v1807_v30  ;;  %v1564_v43 = vmul.f32 0.2, %v1114_v40  ;;  %vm1436_vm15 = vcmp.gt.f32.partialorder %v1114_v40, 0.0  ;;  %v5245_v25 = vpop.f32.mrf.mxu3 }
 0x195   : > { %v1283_v41 = vadd.f32 %v1282_v38, %v5176_v5 }
 0x196   : > { %v1692_v15 = vsel %vm1436_vm15, %v1114_v40, %v1564_v43 }
 0x197   : > { %v1565_v50 = vmul.f32 0.2, %v1283_v41  ;;  %vm1437_vm2 = vcmp.gt.f32.partialorder %v1283_v41, 0.0 }
 0x199   : > { %v1115_v21 = vpop.f32.mrf.mxu1  ;;  %v1693_v31 = vsel %vm1437_vm2, %v1283_v41, %v1565_v50 }
 0x19a   : > { %v1116_v44 = vadd.f32 %v1115_v21, %v5174_v3 }
 0x19c   : > { %vm1438_vm0 = vcmp.gt.f32.partialorder %v1116_v44, 0.0  ;;  %v1566_v46 = vmul.f32 0.2, %v1116_v44  ;;  %v1284_v47 = vpop.f32.mrf.mxu2  ;;  %v5251_v40 = vpop.f32.mrf.mxu3 }
 0x19d   : > { %v1285_v51 = vadd.f32 %v1284_v47, %v5176_v5 }
 0x19e   : > { %v1694_v53 = vsel %vm1438_vm0, %v1116_v44, %v1566_v46 }
 0x19f   : > { %vm1439_vm3 = vcmp.gt.f32.partialorder %v1285_v51, 0.0  ;;  %v1567_v57 = vmul.f32 0.2, %v1285_v51  ;;  %v1808_v54 = vpack.c.bf16 %v1694_v53, %v1692_v15  ;;  %v5258_v53 = vld [vmem:[%s6426_s6] ss:$0 sm:$0xff] }
 0x1a1   : > { %v1118_v58 = vpop.f32.mrf.mxu1  ;;  %1326 = vmatmul.bf16.gmra.mxu2 %v5129_v56  ;;  %2030 = vmatmul.bf16.gmra.mxu3 %v1808_v54  ;;  %v1695_v1 = vsel %vm1439_vm3, %v1285_v51, %v1567_v57 }
 0x1a2   : > { %v1809_v61 = vpack.c.bf16 %v1695_v1, %v1693_v31  ;;  %v1119_v63 = vadd.f32 %v1118_v58, %v5174_v3 }
 0x1a4   : > { %1157 = vmatmul.bf16.gmra.mxu1 %v5129_v56  ;;  %v1287_v62 = vpop.f32.mrf.mxu2  ;;  %2199 = vmatmul.bf16.gmra.mxu0 %v1809_v61  ;;  %v1568_v59 = vmul.f32 0.2, %v1119_v63  ;;  %vm1440_vm4 = vcmp.gt.f32.partialorder %v1119_v63, 0.0 }
 0x1a5   : > { %v1288_v4 = vadd.f32 %v1287_v62, %v5176_v5 }
 0x1a6   : > { %v1696_v56 = vsel %vm1440_vm4, %v1119_v63, %v1568_v59 }
 0x1a7   : > { %v1569_v13 = vmul.f32 0.2, %v1288_v4  ;;  %vm1441_vm6 = vcmp.gt.f32.partialorder %v1288_v4, 0.0 }
 0x1a9   : > { %v1120_v8 = vpop.f32.mrf.mxu1  ;;  %v1697_v24 = vsel %vm1441_vm6, %v1288_v4, %v1569_v13  ;;  %v5266_v4 = vld [vmem:[%s6427_s7] ss:$0 sm:$0xff] }
 0x1aa   : > { %v1121_v2 = vadd.f32 %v1120_v8, %v5174_v3 }
 0x1ac   : > { %vm1442_vm5 = vcmp.gt.f32.partialorder %v1121_v2, 0.0  ;;  %v1570_v11 = vmul.f32 0.2, %v1121_v2  ;;  %v1289_v12 = vpop.f32.mrf.mxu2 }
 0x1ad   : > { %v1290_v14 = vadd.f32 %v1289_v12, %v5176_v5 }
 0x1ae   : > { %v1698_v16 = vsel %vm1442_vm5, %v1121_v2, %v1570_v11 }
 0x1af   : > { %vm1443_vm7 = vcmp.gt.f32.partialorder %v1290_v14, 0.0  ;;  %v1571_v20 = vmul.f32 0.2, %v1290_v14  ;;  %v1810_v22 = vpack.c.bf16 %v1698_v16, %v1696_v56 }
 0x1b1   : > { %v1123_v23 = vpop.f32.mrf.mxu1  ;;  %1331 = vmatmul.bf16.gmra.mxu2 %v5156_v35  ;;  %2035 = vmatmul.bf16.gmra.mxu3 %v1810_v22  ;;  %v1699_v39 = vsel %vm1443_vm7, %v1290_v14, %v1571_v20 }
 0x1b2   : > { %v1811_v26 = vpack.c.bf16 %v1699_v39, %v1697_v24  ;;  %v1124_v29 = vadd.f32 %v1123_v23, %v5174_v3 }
 0x1b4   : > { %1162 = vmatmul.bf16.gmra.mxu1 %v5156_v35  ;;  %v1292_v27 = vpop.f32.mrf.mxu2  ;;  %2204 = vmatmul.bf16.gmra.mxu0 %v1811_v26  ;;  %v1572_v30 = vmul.f32 0.2, %v1124_v29  ;;  %vm1444_vm8 = vcmp.gt.f32.partialorder %v1124_v29, 0.0 }
 0x1b5   : > { %v1293_v32 = vadd.f32 %v1292_v27, %v5176_v5 }
 0x1b6   : > { %v1700_v35 = vsel %vm1444_vm8, %v1124_v29, %v1572_v30 }
 0x1b7   : > { %v1573_v43 = vmul.f32 0.2, %v1293_v32  ;;  %vm1445_vm10 = vcmp.gt.f32.partialorder %v1293_v32, 0.0 }
 0x1b9   : > { %v1125_v34 = vpop.f32.mrf.mxu1  ;;  %v1701_v57 = vsel %vm1445_vm10, %v1293_v32, %v1573_v43 }
 0x1ba   : > { %v1126_v38 = vadd.f32 %v1125_v34, %v5174_v3 }
 0x1bc   : > { %vm1446_vm9 = vcmp.gt.f32.partialorder %v1126_v38, 0.0  ;;  %v1574_v41 = vmul.f32 0.2, %v1126_v38  ;;  %v1294_v21 = vpop.f32.mrf.mxu2 }
 0x1bd   : > { %v1295_v44 = vadd.f32 %v1294_v21, %v5176_v5 }
 0x1be   : > { %v1702_v46 = vsel %vm1446_vm9, %v1126_v38, %v1574_v41 }
 0x1bf   : > { %vm1447_vm11 = vcmp.gt.f32.partialorder %v1295_v44, 0.0  ;;  %v1575_v47 = vmul.f32 0.2, %v1295_v44  ;;  %v1812_v50 = vpack.c.bf16 %v1702_v46, %v1700_v35 }
 0x1c1   : > { %v1128_v51 = vpop.f32.mrf.mxu1  ;;  %1336 = vmatmul.bf16.gmra.mxu2 %v5172_v9  ;;  %2040 = vmatmul.bf16.gmra.mxu3 %v1812_v50  ;;  %v2170_v15 = vpop.f32.mrf.mxu0  ;;  %v1703_v54 = vsel %vm1447_vm11, %v1295_v44, %v1575_v47 }
 0x1c2   : > { %v1813_v58 = vpack.c.bf16 %v1703_v54, %v1701_v57  ;;  %v1129_v62 = vadd.f32 %v1128_v51, %v5174_v3 }
 0x1c4   : > { %1167 = vmatmul.bf16.gmra.mxu1 %v5172_v9  ;;  %v1297_v31 = vpop.f32.mrf.mxu2  ;;  %v2001_v1 = vpop.f32.mrf.mxu3  ;;  %2209 = vmatmul.bf16.gmra.mxu0 %v1813_v58  ;;  %v1576_v9 = vmul.f32 0.2, %v1129_v62  ;;  %vm1448_vm12 = vcmp.gt.f32.partialorder %v1129_v62, 0.0 }
 0x1c5   : > { %v2002_v61 = vadd.f32 %v5258_v53, %v2001_v1  ;;  %v1298_v8 = vadd.f32 %v1297_v31, %v5176_v5 }
 0x1c6   : > { %v1704_v39 = vsel %vm1448_vm12, %v1129_v62, %v1576_v9 }
 0x1c7   : > { %v2171_v63 = vadd.f32 %v2170_v15, %v2002_v61  ;;  %v1577_v22 = vmul.f32 0.2, %v1298_v8  ;;  %vm1449_vm14 = vcmp.gt.f32.partialorder %v1298_v8, 0.0 }
 0x1c9   : > { %v1130_v59 = vpop.f32.mrf.mxu1  ;;  %v2172_v2 = vpop.f32.mrf.mxu0  ;;  %vm2330_vm1 = vcmp.gt.f32.partialorder %v2171_v63, 0.0  ;;  %v2394_v11 = vmul.f32 0.2, %v2171_v63  ;;  %v1705_v38 = vsel %vm1449_vm14, %v1298_v8, %v1577_v22 }
 0x1ca   : > { %v1131_v12 = vadd.f32 %v1130_v59, %v5174_v3 }
 0x1cb   : > { %v2458_v13 = vsel %vm2330_vm1, %v2171_v63, %v2394_v11 }
 0x1cc   : > { %vm1450_vm13 = vcmp.gt.f32.partialorder %v1131_v12, 0.0  ;;  %v1578_v14 = vmul.f32 0.2, %v1131_v12  ;;  %v1299_v56 = vpop.f32.mrf.mxu2  ;;  %v2003_v16 = vpop.f32.mrf.mxu3  ;;  %v2526_v20 = vmul.f32 %v5266_v4, %v2458_v13 }
 0x1cd   : > { %v1300_v23 = vadd.f32 %v1299_v56, %v5176_v5  ;;  %v2004_v24 = vadd.f32 %v5258_v53, %v2003_v16 }
 0x1ce   : > { %2590 = vadd.xlane.f32.xlu0 %v2526_v20  ;;  %v1706_v26 = vsel %vm1450_vm13, %v1131_v12, %v1578_v14 }
 0x1cf   : > { %vm1451_vm15 = vcmp.gt.f32.partialorder %v1300_v23, 0.0  ;;  %v1579_v27 = vmul.f32 0.2, %v1300_v23  ;;  %v2173_v29 = vadd.f32 %v2172_v2, %v2004_v24  ;;  %v1814_v32 = vpack.c.bf16 %v1706_v26, %v1704_v39 }
 0x1d1   : > { %v1133_v34 = vpop.f32.mrf.mxu1  ;;  %1341 = vmatmul.bf16.gmra.mxu2 %v5012_v42  ;;  %2045 = vmatmul.bf16.gmra.mxu3 %v1814_v32  ;;  %v2175_v30 = vpop.f32.mrf.mxu0  ;;  %v1707_v41 = vsel %vm1451_vm15, %v1300_v23, %v1579_v27  ;;  %vm2331_vm0 = vcmp.gt.f32.partialorder %v2173_v29, 0.0  ;;  %v2395_v21 = vmul.f32 0.2, %v2173_v29 }
 0x1d2   : > { %v1815_v43 = vpack.c.bf16 %v1707_v41, %v1705_v38  ;;  %v1134_v51 = vadd.f32 %v1133_v34, %v5174_v3 }
 0x1d3   : > { %v2459_v44 = vsel %vm2331_vm0, %v2173_v29, %v2395_v21 }
 0x1d4   : > { %1172 = vmatmul.bf16.gmra.mxu1 %v5012_v42  ;;  %v1302_v35 = vpop.f32.mrf.mxu2  ;;  %v2006_v46 = vpop.f32.mrf.mxu3  ;;  %2214 = vmatmul.bf16.gmra.mxu0 %v1815_v43  ;;  %v2527_v47 = vmul.f32 %v5266_v4, %v2459_v44  ;;  %v1580_v1 = vmul.f32 0.2, %v1134_v51  ;;  %vm1452_vm3 = vcmp.gt.f32.partialorder %v1134_v51, 0.0 }
 0x1d5   : > { %v2007_v50 = vadd.f32 %v5258_v53, %v2006_v46  ;;  %v1303_v57 = vadd.f32 %v1302_v35, %v5176_v5 }
 0x1d6   : > { %2592 = vadd.xlane.f32.xlu0 %v2527_v47  ;;  %v1708_v12 = vsel %vm1452_vm3, %v1134_v51, %v1580_v1 }
 0x1d7   : > { %v2176_v15 = vadd.f32 %v2175_v30, %v2007_v50  ;;  %v1581_v2 = vmul.f32 0.2, %v1303_v57  ;;  %vm1453_vm5 = vcmp.gt.f32.partialorder %v1303_v57, 0.0 }
 0x1d9   : > { %v1135_v54 = vpop.f32.mrf.mxu1  ;;  %v2177_v58 = vpop.f32.mrf.mxu0  ;;  %vm2332_vm2 = vcmp.gt.f32.partialorder %v2176_v15, 0.0  ;;  %v2396_v31 = vmul.f32 0.2, %v2176_v15  ;;  %v1709_v23 = vsel %vm1453_vm5, %v1303_v57, %v1581_v2 }
 0x1da   : > { %v1136_v42 = vadd.f32 %v1135_v54, %v5174_v3 }
 0x1db   : > { %v2460_v61 = vsel %vm2332_vm2, %v2176_v15, %v2396_v31 }
 0x1dc   : > { %vm1454_vm4 = vcmp.gt.f32.partialorder %v1136_v42, 0.0  ;;  %v1582_v62 = vmul.f32 0.2, %v1136_v42  ;;  %v1304_v63 = vpop.f32.mrf.mxu2  ;;  %v2008_v8 = vpop.f32.mrf.mxu3  ;;  %v2528_v59 = vmul.f32 %v5266_v4, %v2460_v61 }
 0x1dd   : > { %v1305_v11 = vadd.f32 %v1304_v63, %v5176_v5  ;;  %v2009_v9 = vadd.f32 %v5258_v53, %v2008_v8 }
 0x1de   : > { %2594 = vadd.xlane.f32.xlu1 %v2528_v59  ;;  %v1710_v13 = vsel %vm1454_vm4, %v1136_v42, %v1582_v62 }
 0x1df   : > { %vm1455_vm6 = vcmp.gt.f32.partialorder %v1305_v11, 0.0  ;;  %v1583_v14 = vmul.f32 0.2, %v1305_v11  ;;  %v2178_v56 = vadd.f32 %v2177_v58, %v2009_v9  ;;  %v1816_v16 = vpack.c.bf16 %v1710_v13, %v1708_v12 }
 0x1e1   : > { %v1138_v20 = vpop.f32.mrf.mxu1  ;;  %1346 = vmatmul.bf16.gmra.mxu2 %v5029_v10  ;;  %2050 = vmatmul.bf16.gmra.mxu3 %v1816_v16  ;;  %v2180_v22 = vpop.f32.mrf.mxu0  ;;  %v1711_v24 = vsel %vm1455_vm6, %v1305_v11, %v1583_v14  ;;  %vm2333_vm7 = vcmp.gt.f32.partialorder %v2178_v56, 0.0  ;;  %v2397_v39 = vmul.f32 0.2, %v2178_v56 }
 0x1e2   : > { %v1817_v26 = vpack.c.bf16 %v1711_v24, %v1709_v23  ;;  %v1139_v38 = vadd.f32 %v1138_v20, %v5174_v3 }
 0x1e3   : > { %v2461_v27 = vsel %vm2333_vm7, %v2178_v56, %v2397_v39 }
 0x1e4   : > { %1177 = vmatmul.bf16.gmra.mxu1 %v5029_v10  ;;  %v1307_v29 = vpop.f32.mrf.mxu2  ;;  %v2011_v32 = vpop.f32.mrf.mxu3  ;;  %2219 = vmatmul.bf16.gmra.mxu0 %v1817_v26  ;;  %v2529_v34 = vmul.f32 %v5266_v4, %v2461_v27  ;;  %v1584_v46 = vmul.f32 0.2, %v1139_v38  ;;  %vm1456_vm9 = vcmp.gt.f32.partialorder %v1139_v38, 0.0 }
 0x1e5   : > { %v2012_v30 = vadd.f32 %v5258_v53, %v2011_v32  ;;  %v1308_v21 = vadd.f32 %v1307_v29, %v5176_v5 }
 0x1e6   : > { %2596 = vadd.xlane.f32.xlu1 %v2529_v34  ;;  %v1712_v1 = vsel %vm1456_vm9, %v1139_v38, %v1584_v46 }
 0x1e7   : > { %v2181_v41 = vadd.f32 %v2180_v22, %v2012_v30  ;;  %v1585_v54 = vmul.f32 0.2, %v1308_v21  ;;  %vm1457_vm11 = vcmp.gt.f32.partialorder %v1308_v21, 0.0 }
 0x1e9   : > { %v1140_v43 = vpop.f32.mrf.mxu1  ;;  %v2182_v44 = vpop.f32.mrf.mxu0  ;;  %vm2334_vm8 = vcmp.gt.f32.partialorder %v2181_v41, 0.0  ;;  %v2398_v35 = vmul.f32 0.2, %v2181_v41  ;;  %v1713_v2 = vsel %vm1457_vm11, %v1308_v21, %v1585_v54 }
 0x1ea   : > { %v1141_v10 = vadd.f32 %v1140_v43, %v5174_v3 }
 0x1eb   : > { %v2462_v47 = vsel %vm2334_vm8, %v2181_v41, %v2398_v35 }
 0x1ec   : > { %vm1458_vm10 = vcmp.gt.f32.partialorder %v1141_v10, 0.0  ;;  %v1586_v50 = vmul.f32 0.2, %v1141_v10  ;;  %v1309_v51 = vpop.f32.mrf.mxu2  ;;  %v2013_v15 = vpop.f32.mrf.mxu3  ;;  %v2530_v57 = vmul.f32 %v5266_v4, %v2462_v47 }
 0x1ed   : > { %v1310_v58 = vadd.f32 %v1309_v51, %v5176_v5  ;;  %v2014_v31 = vadd.f32 %v5258_v53, %v2013_v15 }
 0x1ee   : > { %2598 = vadd.xlane.f32.xlu2 %v2530_v57  ;;  %v1714_v42 = vsel %vm1458_vm10, %v1141_v10, %v1586_v50 }
 0x1ef   : > { %vm1459_vm1 = vcmp.gt.f32.partialorder %v1310_v58, 0.0  ;;  %v1587_v61 = vmul.f32 0.2, %v1310_v58  ;;  %v2183_v62 = vadd.f32 %v2182_v44, %v2014_v31  ;;  %v1818_v63 = vpack.c.bf16 %v1714_v42, %v1712_v1 }
 0x1f1   : > { %v1143_v8 = vpop.f32.mrf.mxu1  ;;  %1351 = vmatmul.bf16.gmra.mxu2 %v5051_v45  ;;  %2055 = vmatmul.bf16.gmra.mxu3 %v1818_v63  ;;  %v2185_v59 = vpop.f32.mrf.mxu0  ;;  %v1715_v11 = vsel %vm1459_vm1, %v1310_v58, %v1587_v61  ;;  %vm2335_vm12 = vcmp.gt.f32.partialorder %v2183_v62, 0.0  ;;  %v2399_v9 = vmul.f32 0.2, %v2183_v62 }
 0x1f2   : > { %v1819_v12 = vpack.c.bf16 %v1715_v11, %v1713_v2  ;;  %v1144_v22 = vadd.f32 %v1143_v8, %v5174_v3 }
 0x1f3   : > { %v2463_v13 = vsel %vm2335_vm12, %v2183_v62, %v2399_v9 }
 0x1f4   : > { %1182 = vmatmul.bf16.gmra.mxu1 %v5051_v45  ;;  %v1312_v14 = vpop.f32.mrf.mxu2  ;;  %v2016_v56 = vpop.f32.mrf.mxu3  ;;  %2224 = vmatmul.bf16.gmra.mxu0 %v1819_v12  ;;  %v2531_v16 = vmul.f32 %v5266_v4, %v2463_v13  ;;  %v1588_v29 = vmul.f32 0.2, %v1144_v22  ;;  %vm1460_vm14 = vcmp.gt.f32.partialorder %v1144_v22, 0.0 }
 0x1f5   : > { %v2017_v20 = vadd.f32 %v5258_v53, %v2016_v56  ;;  %v1313_v24 = vadd.f32 %v1312_v14, %v5176_v5 }
 0x1f6   : > { %2600 = vadd.xlane.f32.xlu2 %v2531_v16  ;;  %v1716_v35 = vsel %vm1460_vm14, %v1144_v22, %v1588_v29 }
 0x1f7   : > { %v2186_v23 = vadd.f32 %v2185_v59, %v2017_v20  ;;  %v1589_v21 = vmul.f32 0.2, %v1313_v24  ;;  %vm1461_vm0 = vcmp.gt.f32.partialorder %v1313_v24, 0.0 }
 0x1f9   : > { %v1145_v39 = vpop.f32.mrf.mxu1  ;;  %v2187_v26 = vpop.f32.mrf.mxu0  ;;  %vm2336_vm13 = vcmp.gt.f32.partialorder %v2186_v23, 0.0  ;;  %v2400_v27 = vmul.f32 0.2, %v2186_v23  ;;  %v1717_v57 = vsel %vm1461_vm0, %v1313_v24, %v1589_v21 }
 0x1fa   : > { %v1146_v45 = vadd.f32 %v1145_v39, %v5174_v3 }
 0x1fb   : > { %v2464_v32 = vsel %vm2336_vm13, %v2186_v23, %v2400_v27 }
 0x1fc   : > { %vm1462_vm15 = vcmp.gt.f32.partialorder %v1146_v45, 0.0  ;;  %v1590_v34 = vmul.f32 0.2, %v1146_v45  ;;  %v1314_v30 = vpop.f32.mrf.mxu2  ;;  %v2018_v38 = vpop.f32.mrf.mxu3  ;;  %v2532_v41 = vmul.f32 %v5266_v4, %v2464_v32 }
 0x1fd   : > { %v1315_v43 = vadd.f32 %v1314_v30, %v5176_v5  ;;  %v2019_v44 = vadd.f32 %v5258_v53, %v2018_v38 }
 0x1fe   : > { %2602 = vadd.xlane.f32.xlu0 %v2532_v41  ;;  %v1718_v46 = vsel %vm1462_vm15, %v1146_v45, %v1590_v34 }
 0x1ff   : > { %vm1463_vm2 = vcmp.gt.f32.partialorder %v1315_v43, 0.0  ;;  %v1591_v10 = vmul.f32 0.2, %v1315_v43  ;;  %v2188_v47 = vadd.f32 %v2187_v26, %v2019_v44  ;;  %v1820_v50 = vpack.c.bf16 %v1718_v46, %v1716_v35 }
 0x201   : > { %v1148_v51 = vpop.f32.mrf.mxu1  ;;  %1356 = vmatmul.bf16.gmra.mxu2 %v5076_v17  ;;  %2060 = vmatmul.bf16.gmra.mxu3 %v1820_v50  ;;  %v2190_v15 = vpop.f32.mrf.mxu0  ;;  %v1719_v54 = vsel %vm1463_vm2, %v1315_v43, %v1591_v10  ;;  %vm2337_vm3 = vcmp.gt.f32.partialorder %v2188_v47, 0.0  ;;  %v2401_v58 = vmul.f32 0.2, %v2188_v47 }
 0x202   : > { %v1821_v31 = vpack.c.bf16 %v1719_v54, %v1717_v57  ;;  %v1149_v8 = vadd.f32 %v1148_v51, %v5174_v3 }
 0x203   : > { %v2465_v1 = vsel %vm2337_vm3, %v2188_v47, %v2401_v58 }
 0x204   : > { %1187 = vmatmul.bf16.gmra.mxu1 %v5076_v17  ;;  %v1317_v42 = vpop.f32.mrf.mxu2  ;;  %v2021_v61 = vpop.f32.mrf.mxu3  ;;  %2229 = vmatmul.bf16.gmra.mxu0 %v1821_v31  ;;  %v2533_v62 = vmul.f32 %v5266_v4, %v2465_v1  ;;  %v1592_v13 = vmul.f32 0.2, %v1149_v8  ;;  %vm1464_vm5 = vcmp.gt.f32.partialorder %v1149_v8, 0.0 }
 0x205   : > { %v2022_v63 = vadd.f32 %v5258_v53, %v2021_v61  ;;  %v1318_v2 = vadd.f32 %v1317_v42, %v5176_v5 }
 0x206   : > { %2604 = vadd.xlane.f32.xlu1 %v2533_v62  ;;  %v1720_v26 = vsel %vm1464_vm5, %v1149_v8, %v1592_v13 }
 0x207   : > { %v2191_v59 = vadd.f32 %v2190_v15, %v2022_v63  ;;  %v1593_v23 = vmul.f32 0.2, %v1318_v2  ;;  %vm1465_vm7 = vcmp.gt.f32.partialorder %v1318_v2, 0.0 }
 0x209   : > { %v1150_v11 = vpop.f32.mrf.mxu1  ;;  %v2192_v9 = vpop.f32.mrf.mxu0  ;;  %vm2338_vm4 = vcmp.gt.f32.partialorder %v2191_v59, 0.0  ;;  %v2402_v12 = vmul.f32 0.2, %v2191_v59  ;;  %v1721_v38 = vsel %vm1465_vm7, %v1318_v2, %v1593_v23 }
 0x20a   : > { %v1151_v17 = vadd.f32 %v1150_v11, %v5174_v3 }
 0x20b   : > { %v2466_v14 = vsel %vm2338_vm4, %v2191_v59, %v2402_v12 }
 0x20c   : > { %vm1466_vm6 = vcmp.gt.f32.partialorder %v1151_v17, 0.0  ;;  %v1594_v56 = vmul.f32 0.2, %v1151_v17  ;;  %v1319_v16 = vpop.f32.mrf.mxu2  ;;  %v2023_v20 = vpop.f32.mrf.mxu3  ;;  %v2534_v22 = vmul.f32 %v5266_v4, %v2466_v14 }
 0x20d   : > { %v1320_v24 = vadd.f32 %v1319_v16, %v5176_v5  ;;  %v2024_v39 = vadd.f32 %v5258_v53, %v2023_v20 }
 0x20e   : > { %2606 = vadd.xlane.f32.xlu2 %v2534_v22  ;;  %v1722_v27 = vsel %vm1466_vm6, %v1151_v17, %v1594_v56 }
 0x20f   : > { %vm1467_vm8 = vcmp.gt.f32.partialorder %v1320_v24, 0.0  ;;  %v1595_v29 = vmul.f32 0.2, %v1320_v24  ;;  %v2193_v45 = vadd.f32 %v2192_v9, %v2024_v39  ;;  %v1822_v32 = vpack.c.bf16 %v1722_v27, %v1720_v26 }
 0x211   : > { %v1153_v34 = vpop.f32.mrf.mxu1  ;;  %1361 = vmatmul.bf16.gmra.mxu2 %v5098_v55  ;;  %2065 = vmatmul.bf16.gmra.mxu3 %v1822_v32  ;;  %v2195_v30 = vpop.f32.mrf.mxu0  ;;  %v1723_v41 = vsel %vm1467_vm8, %v1320_v24, %v1595_v29  ;;  %vm2339_vm9 = vcmp.gt.f32.partialorder %v2193_v45, 0.0  ;;  %v2403_v21 = vmul.f32 0.2, %v2193_v45 }
 0x212   : > { %v1823_v43 = vpack.c.bf16 %v1723_v41, %v1721_v38  ;;  %v1154_v50 = vadd.f32 %v1153_v34, %v5174_v3 }
 0x213   : > { %v2467_v44 = vsel %vm2339_vm9, %v2193_v45, %v2403_v21 }
 0x214   : > { %1192 = vmatmul.bf16.gmra.mxu1 %v5098_v55  ;;  %v1322_v35 = vpop.f32.mrf.mxu2  ;;  %v2026_v46 = vpop.f32.mrf.mxu3  ;;  %2234 = vmatmul.bf16.gmra.mxu0 %v1823_v43  ;;  %v2535_v10 = vmul.f32 %v5266_v4, %v2467_v44  ;;  %v1596_v31 = vmul.f32 0.2, %v1154_v50  ;;  %vm1468_vm11 = vcmp.gt.f32.partialorder %v1154_v50, 0.0 }
 0x215   : > { %v2027_v47 = vadd.f32 %v5258_v53, %v2026_v46  ;;  %v1323_v15 = vadd.f32 %v1322_v35, %v5176_v5 }
 0x216   : > { %2608 = vadd.xlane.f32.xlu0 %v2535_v10  ;;  %v1724_v11 = vsel %vm1468_vm11, %v1154_v50, %v1596_v31 }
 0x217   : > { %v2196_v51 = vadd.f32 %v2195_v30, %v2027_v47  ;;  %v1597_v8 = vmul.f32 0.2, %v1323_v15  ;;  %vm1469_vm12 = vcmp.gt.f32.partialorder %v1323_v15, 0.0 }
 0x219   : > { %v1155_v57 = vpop.f32.mrf.mxu1  ;;  %v2197_v54 = vpop.f32.mrf.mxu0  ;;  %vm2340_vm10 = vcmp.gt.f32.partialorder %v2196_v51, 0.0  ;;  %v2404_v58 = vmul.f32 0.2, %v2196_v51  ;;  %v1725_v16 = vsel %vm1469_vm12, %v1323_v15, %v1597_v8  ;;  %v5337_v8 = vld [vmem:[%s6422_s2] ss:$0 sm:$0xff] }
 0x21a   : > { %v1156_v55 = vadd.f32 %v1155_v57, %v5174_v3 }
 0x21b   : > { %v2468_v1 = vsel %vm2340_vm10, %v2196_v51, %v2404_v58 }
 0x21c   : > { %vm1470_vm1 = vcmp.gt.f32.partialorder %v1156_v55, 0.0  ;;  %v1598_v42 = vmul.f32 0.2, %v1156_v55  ;;  %v1324_v61 = vpop.f32.mrf.mxu2  ;;  %v2028_v62 = vpop.f32.mrf.mxu3  ;;  %v2536_v63 = vmul.f32 %v5266_v4, %v2468_v1 }
 0x21d   : > { %v1325_v59 = vadd.f32 %v1324_v61, %v5176_v5  ;;  %v2029_v2 = vadd.f32 %v5258_v53, %v2028_v62 }
 0x21e   : > { %2610 = vadd.xlane.f32.xlu1 %v2536_v63  ;;  %v1726_v9 = vsel %vm1470_vm1, %v1156_v55, %v1598_v42 }
 0x21f   : > { %vm1471_vm13 = vcmp.gt.f32.partialorder %v1325_v59, 0.0  ;;  %v1599_v12 = vmul.f32 0.2, %v1325_v59  ;;  %v2198_v13 = vadd.f32 %v2197_v54, %v2029_v2  ;;  %v1824_v17 = vpack.c.bf16 %v1726_v9, %v1724_v11 }
 0x220   : > { %v721_v2 = vadd.f32 %v5337_v8, %v5193_v60 }
 0x221   : > { %v1158_v14 = vpop.f32.mrf.mxu1  ;;  %1366 = vmatmul.bf16.gmra.mxu2 %v5120_v33  ;;  %2070 = vmatmul.bf16.gmra.mxu3 %v1824_v17  ;;  %v2200_v56 = vpop.f32.mrf.mxu0  ;;  %v1727_v20 = vsel %vm1471_vm13, %v1325_v59, %v1599_v12  ;;  %vm2341_vm14 = vcmp.gt.f32.partialorder %v2198_v13, 0.0  ;;  %v2405_v22 = vmul.f32 0.2, %v2198_v13  ;;  %v719_v59 = vadd.f32 %v5337_v8, %v5188_v28 }
 0x222   : > { %v1825_v23 = vpack.c.bf16 %v1727_v20, %v1725_v16  ;;  %v1159_v45 = vadd.f32 %v1158_v14, %v5174_v3  ;;  %v865_v16 = vmul.f32 0.2, %v721_v2  ;;  %vm801_vm7 = vcmp.gt.f32.partialorder %v721_v2, 0.0 }
 0x223   : > { %v2469_v24 = vsel %vm2341_vm14, %v2198_v13, %v2405_v22  ;;  %vm800_vm6 = vcmp.gt.f32.partialorder %v719_v59, 0.0 }
 0x224   : > { %1197 = vmatmul.bf16.gmra.mxu1 %v5120_v33  ;;  %v1327_v39 = vpop.f32.mrf.mxu2  ;;  %v2031_v26 = vpop.f32.mrf.mxu3  ;;  %2239 = vmatmul.bf16.gmra.mxu0 %v1825_v23  ;;  %v2537_v27 = vmul.f32 %v5266_v4, %v2469_v24  ;;  %v1600_v21 = vmul.f32 0.2, %v1159_v45  ;;  %vm1472_vm0 = vcmp.gt.f32.partialorder %v1159_v45, 0.0 }
 0x225   : > { %v2032_v29 = vadd.f32 %v5258_v53, %v2031_v26  ;;  %v1328_v34 = vadd.f32 %v1327_v39, %v5176_v5 }
 0x226   : > { %2612 = vadd.xlane.f32.xlu2 %v2537_v27  ;;  %v1728_v15 = vsel %vm1472_vm0, %v1159_v45, %v1600_v21  ;;  %v929_v27 = vsel %vm801_vm7, %v721_v2, %v865_v16 }
 0x227   : > { %v2201_v32 = vadd.f32 %v2200_v56, %v2032_v29  ;;  %v1601_v47 = vmul.f32 0.2, %v1328_v34  ;;  %vm1473_vm3 = vcmp.gt.f32.partialorder %v1328_v34, 0.0  ;;  %v864_v56 = vmul.f32 0.2, %v719_v59 }
 0x228   : > { %v724_v29 = vadd.f32 %v5337_v8, %v5199_v19 }
 0x229   : > { %v1160_v30 = vpop.f32.mrf.mxu1  ;;  %v2202_v38 = vpop.f32.mrf.mxu0  ;;  %vm2342_vm15 = vcmp.gt.f32.partialorder %v2201_v32, 0.0  ;;  %v2406_v41 = vmul.f32 0.2, %v2201_v32  ;;  %v1729_v42 = vsel %vm1473_vm3, %v1328_v34, %v1601_v47  ;;  %v928_v26 = vsel %vm800_vm6, %v719_v59, %v864_v56  ;;  %v5359_v47 = vld [vmem:[#allocation2] ss:$0 sm:$0xff] }
 0x22a   : > { %v1161_v33 = vadd.f32 %v1160_v30, %v5174_v3  ;;  %vm802_vm12 = vcmp.gt.f32.partialorder %v724_v29, 0.0  ;;  %v5374_v59 = vadd.f32 %v5337_v8, %v5227_v36  ;;  %v5388_v36 = vadd.f32 %v5337_v8, %v5239_v6 }
 0x22b   : > { %v2470_v43 = vsel %vm2342_vm15, %v2201_v32, %v2406_v41 }
 0x22c   : > { %vm1474_vm2 = vcmp.gt.f32.partialorder %v1161_v33, 0.0  ;;  %v1602_v44 = vmul.f32 0.2, %v1161_v33  ;;  %v1329_v35 = vpop.f32.mrf.mxu2  ;;  %v2033_v46 = vpop.f32.mrf.mxu3  ;;  %v2538_v10 = vmul.f32 %v5266_v4, %v2470_v43  ;;  %v729_v43 = vadd.f32 %v5337_v8, %v5211_v49 }
 0x22d   : > { %v1330_v50 = vadd.f32 %v1329_v35, %v5176_v5  ;;  %v2034_v51 = vadd.f32 %v5258_v53, %v2033_v46  ;;  %vm807_vm3 = vcmp.gt.f32.partialorder %v5374_v59, 0.0  ;;  %v871_v6 = vmul.f32 0.2, %v5374_v59 }
 0x22e   : > { %2614 = vadd.xlane.f32.xlu0 %v2538_v10  ;;  %v1730_v57 = vsel %vm1474_vm2, %v1161_v33, %v1602_v44  ;;  %vm804_vm15 = vcmp.gt.f32.partialorder %v729_v43, 0.0  ;;  %vm809_vm6 = vcmp.gt.f32.partialorder %v5388_v36, 0.0 }
 0x22f   : > { %vm1475_vm4 = vcmp.gt.f32.partialorder %v1330_v50, 0.0  ;;  %v1603_v54 = vmul.f32 0.2, %v1330_v50  ;;  %v2203_v58 = vadd.f32 %v2202_v38, %v2034_v51  ;;  %v1826_v31 = vpack.c.bf16 %v1730_v57, %v1728_v15 }
 0x230   : > { %v726_v38 = vadd.f32 %v5337_v8, %v5205_v37  ;;  %v731_v37 = vadd.f32 %v5337_v8, %v5216_v0 }
 0x231   : > { %v1163_v55 = vpop.f32.mrf.mxu1  ;;  %1371 = vmatmul.bf16.gmra.mxu2 %v5139_v7  ;;  %2075 = vmatmul.bf16.gmra.mxu3 %v1826_v31  ;;  %v2205_v1 = vpop.f32.mrf.mxu0  ;;  %v1731_v61 = vsel %vm1475_vm4, %v1330_v50, %v1603_v54  ;;  %vm2343_vm5 = vcmp.gt.f32.partialorder %v2203_v58, 0.0  ;;  %v2407_v62 = vmul.f32 0.2, %v2203_v58  ;;  %v5363_v50 = vpack.c.bf16 %v929_v27, %v928_v26 }
 0x232   : > { %v1827_v63 = vpack.c.bf16 %v1731_v61, %v1729_v42  ;;  %v1164_v14 = vadd.f32 %v1163_v55, %v5174_v3  ;;  %v867_v31 = vmul.f32 0.2, %v726_v38  ;;  %v5369_v55 = vadd.f32 %v5337_v8, %v5223_v18 }
 0x233   : > { %v2471_v11 = vsel %vm2343_vm5, %v2203_v58, %v2407_v62  ;;  %v866_v58 = vmul.f32 0.2, %v724_v29  ;;  %vm803_vm14 = vcmp.gt.f32.partialorder %v726_v38, 0.0  ;;  %v868_v42 = vmul.f32 0.2, %v729_v43 }
 0x234   : > { %1202 = vmatmul.bf16.gmra.mxu1 %v5139_v7  ;;  %v1332_v9 = vpop.f32.mrf.mxu2  ;;  %v2036_v12 = vpop.f32.mrf.mxu3  ;;  %2244 = vmatmul.bf16.gmra.mxu0 %v1827_v63  ;;  %v2539_v13 = vmul.f32 %v5266_v4, %v2471_v11  ;;  %v1604_v23 = vmul.f32 0.2, %v1164_v14  ;;  %vm1476_vm9 = vcmp.gt.f32.partialorder %v1164_v14, 0.0  ;;  %v869_v63 = vmul.f32 0.2, %v731_v37 }
 0x235   : > { %v2037_v17 = vadd.f32 %v5258_v53, %v2036_v12  ;;  %v1333_v28 = vadd.f32 %v1332_v9, %v5176_v5  ;;  %vm805_vm0 = vcmp.gt.f32.partialorder %v731_v37, 0.0  ;;  %v5380_v9 = vadd.f32 %v5337_v8, %v5234_v52 }
 0x236   : > { %2616 = vadd.xlane.f32.xlu1 %v2539_v13  ;;  %v1732_v19 = vsel %vm1476_vm9, %v1164_v14, %v1604_v23  ;;  %v5394_v14 = vsel %vm803_vm14, %v726_v38, %v867_v31  ;;  %vm806_vm2 = vcmp.gt.f32.partialorder %v5369_v55, 0.0  ;;  %v5399_v16 = vsel %vm804_vm15, %v729_v43, %v868_v42 }
 0x237   : > { %v2206_v20 = vadd.f32 %v2205_v1, %v2037_v17  ;;  %v1605_v41 = vmul.f32 0.2, %v1333_v28  ;;  %vm1477_vm11 = vcmp.gt.f32.partialorder %v1333_v28, 0.0  ;;  %v5384_v17 = vmul.f32 0.2, %v5369_v55 }
 0x238   : > { %vm808_vm4 = vcmp.gt.f32.partialorder %v5380_v9, 0.0  ;;  %v873_v43 = vmul.f32 0.2, %v5388_v36 }
 0x239   : > { %v1165_v60 = vpop.f32.mrf.mxu1  ;;  %v2207_v22 = vpop.f32.mrf.mxu0  ;;  %vm2344_vm8 = vcmp.gt.f32.partialorder %v2206_v20, 0.0  ;;  %v2408_v7 = vmul.f32 0.2, %v2206_v20  ;;  %v1733_v15 = vsel %vm1477_vm11, %v1333_v28, %v1605_v41  ;;  %v5405_v28 = vsel %vm805_vm0, %v731_v37, %v869_v63 }
 0x23a   : > { %v1166_v24 = vadd.f32 %v1165_v60, %v5174_v3  ;;  %v872_v60 = vmul.f32 0.2, %v5380_v9  ;;  %v934_v42 = vsel %vm806_vm2, %v5369_v55, %v5384_v17  ;;  %v935_v63 = vsel %vm807_vm3, %v5374_v59, %v871_v6 }
 0x23b   : > { %v2472_v39 = vsel %vm2344_vm8, %v2206_v20, %v2408_v7 }
 0x23c   : > { %vm1478_vm10 = vcmp.gt.f32.partialorder %v1166_v24, 0.0  ;;  %v1606_v45 = vmul.f32 0.2, %v1166_v24  ;;  %v1334_v32 = vpop.f32.mrf.mxu2  ;;  %v2038_v34 = vpop.f32.mrf.mxu3  ;;  %v2540_v30 = vmul.f32 %v5266_v4, %v2472_v39  ;;  %v746_v39 = vadd.f32 %v5337_v8, %v5251_v40 }
 0x23d   : > { %v1335_v21 = vadd.f32 %v1334_v32, %v5176_v5  ;;  %v2039_v33 = vadd.f32 %v5258_v53, %v2038_v34 }
 0x23e   : > { %2618 = vadd.xlane.f32.xlu2 %v2540_v30  ;;  %v1734_v44 = vsel %vm1478_vm10, %v1166_v24, %v1606_v45  ;;  %v744_v24 = vadd.f32 %v5337_v8, %v5245_v25  ;;  %v875_v37 = vmul.f32 0.2, %v746_v39 }
 0x23f   : > { %vm1479_vm1 = vcmp.gt.f32.partialorder %v1335_v21, 0.0  ;;  %v1607_v35 = vmul.f32 0.2, %v1335_v21  ;;  %v2208_v46 = vadd.f32 %v2207_v22, %v2039_v33  ;;  %v1828_v10 = vpack.c.bf16 %v1734_v44, %v1732_v19 }
 0x240   : > { %v874_v19 = vmul.f32 0.2, %v744_v24 }
 0x241   : > { %v1168_v51 = vpop.f32.mrf.mxu1  ;;  %1376 = vmatmul.bf16.gmra.mxu2 %v5163_v48  ;;  %2080 = vmatmul.bf16.gmra.mxu3 %v1828_v10  ;;  %v2210_v49 = vpop.f32.mrf.mxu0  ;;  %v1735_v57 = vsel %vm1479_vm1, %v1335_v21, %v1607_v35  ;;  %vm2345_vm13 = vcmp.gt.f32.partialorder %v2208_v46, 0.0  ;;  %v2409_v54 = vmul.f32 0.2, %v2208_v46  ;;  %vm810_vm1 = vcmp.gt.f32.partialorder %v744_v24, 0.0 }
 0x242   : > { %v2591_v1 = vpop.xlane.xlu0 %2590  ;;  %v1829_v0 = vpack.c.bf16 %v1735_v57, %v1733_v15  ;;  %v1169_v52 = vadd.f32 %v1168_v51, %v5174_v3 }
 0x243   : > { %v2722_v61 = vadd.f32 %v5359_v47, %v2591_v1  ;;  %v2473_v62 = vsel %vm2345_vm13, %v2208_v46, %v2409_v54  ;;  %vm4002_vm13 = vcmask 7168  }
 0x244   : > { %1207 = vmatmul.bf16.gmra.mxu1 %v5163_v48  ;;  %v1337_v2 = vpop.f32.mrf.mxu2  ;;  %v2041_v11 = vpop.f32.mrf.mxu3  ;;  %2249 = vmatmul.bf16.gmra.mxu0 %v1829_v0  ;;  %v2541_v18 = vmul.f32 %v5266_v4, %v2473_v62  ;;  %v5391_v48 = vsel %vm802_vm12, %v724_v29, %v866_v58  ;;  %vm1480_vm7 = vcmp.gt.f32.partialorder %v1169_v52, 0.0  ;;  %v1608_v29 = vmul.f32 0.2, %v1169_v52 }
 0x245   : > { %v4312_v12 = vmul.f32 -1.442695, %v2722_v61  ;;  %v2042_v13 = vadd.f32 %v5258_v53, %v2041_v11  ;;  %v1338_v20 = vadd.f32 %v1337_v2, %v5176_v5  ;;  %vm811_vm12 = vcmp.gt.f32.partialorder %v746_v39, 0.0 }
 0x246   : > { %2620 = vadd.xlane.f32.xlu0 %v2541_v18  ;;  %v1736_v51 = vsel %vm1480_vm7, %v1169_v52, %v1608_v29  ;;  %v936_v2 = vsel %vm808_vm4, %v5380_v9, %v872_v60  ;;  %v939_v9 = vsel %vm811_vm12, %v746_v39, %v875_v37  ;;  %v5493_v37 = vld [vmem:[%s6426_s6] ss:$0 sm:$0xff] }
 0x247   : > { %4450 = vpow2.f32 %v4312_v12  ;;  %v2211_v56 = vadd.f32 %v2210_v49, %v2042_v13  ;;  %v1609_v34 = vmul.f32 0.2, %v1338_v20  ;;  %vm1481_vm9 = vcmp.gt.f32.partialorder %v1338_v20, 0.0 }
 0x248   : > { %v937_v13 = vsel %vm809_vm6, %v5388_v36, %v873_v43 }
 0x249   : > { %v1170_v22 = vpop.f32.mrf.mxu1  ;;  %v2212_v7 = vpop.f32.mrf.mxu0  ;;  %vm2346_vm5 = vcmp.gt.f32.partialorder %v2211_v56, 0.0  ;;  %v2410_v23 = vmul.f32 0.2, %v2211_v56  ;;  %v1737_v49 = vsel %vm1481_vm9, %v1338_v20, %v1609_v34 }
 0x24a   : > { %v1171_v26 = vadd.f32 %v1170_v22, %v5174_v3  ;;  %v2593_v27 = vpop.xlane.xlu0 %2592  ;;  %v5459_v22 = vpack.c.bf16 %v935_v63, %v934_v42  ;;  %v5513_v63 = vld [vmem:[%s6427_s7] ss:$0 sm:$0xff] }
 0x24b   : > { %v2723_v45 = vadd.f32 %v5359_v47, %v2593_v27  ;;  %v2474_v32 = vsel %vm2346_vm5, %v2211_v56, %v2410_v23  ;;  %v938_v56 = vsel %vm810_vm1, %v744_v24, %v874_v19  ;;  %v5462_v23 = vpack.c.bf16 %v937_v13, %v936_v2 }
 0x24c   : > { %vm1482_vm8 = vcmp.gt.f32.partialorder %v1171_v26, 0.0  ;;  %v1610_v30 = vmul.f32 0.2, %v1171_v26  ;;  %v1339_v38 = vpop.f32.mrf.mxu2  ;;  %v2043_v41 = vpop.f32.mrf.mxu3  ;;  %v2542_v21 = vmul.f32 %v5266_v4, %v2474_v32  ;;  %v5464_v24 = vpack.c.bf16 %v939_v9, %v938_v56 }
 0x24d   : > { %v4451_v33 = vpop.eup %4450  ;;  %v4313_v25 = vmul.f32 -1.442695, %v2723_v45  ;;  %v1340_v40 = vadd.f32 %v1339_v38, %v5176_v5  ;;  %v2044_v8 = vadd.f32 %v5258_v53, %v2043_v41 }
 0x24e   : > { %v5420_v44 = vadd.f32 1.0, %v4451_v33  ;;  %2622 = vadd.xlane.f32.xlu1 %v2542_v21  ;;  %v1738_v35 = vsel %vm1482_vm8, %v1171_v26, %v1610_v30 }
 0x24f   : > { %4452 = vpow2.f32 %v4313_v25  ;;  %vm1483_vm10 = vcmp.gt.f32.partialorder %v1340_v40, 0.0  ;;  %v1611_v46 = vmul.f32 0.2, %v1340_v40  ;;  %v2213_v10 = vadd.f32 %v2212_v7, %v2044_v8 }
 0x250   : > { %4454 = vrcp.f32 %v5420_v44  ;;  %v1830_v57 = vpack.c.bf16 %v1738_v35, %v1736_v51  ;;  %v3053_v20 = vand.u32 2147483648, %v5420_v44  ;;  %vm3047_vm15 = vweird.f32 %v5420_v44 }
 0x251   : > { %v1173_v15 = vpop.f32.mrf.mxu1  ;;  %1381 = vmatmul.bf16.gmra.mxu2 %v5363_v50  ;;  %v2215_v54 = vpop.f32.mrf.mxu0  ;;  %v1739_v58 = vsel %vm1483_vm10, %v1340_v40, %v1611_v46  ;;  %vm2347_vm11 = vcmp.gt.f32.partialorder %v2213_v10, 0.0  ;;  %v2411_v31 = vmul.f32 0.2, %v2213_v10 }
 0x252   : > { %v2595_v1 = vpop.xlane.xlu1 %2594  ;;  %v1831_v0 = vpack.c.bf16 %v1739_v58, %v1737_v49  ;;  %2085 = vmatmul.bf16.gmra.mxu3 %v1830_v57  ;;  %v1174_v11 = vadd.f32 %v1173_v15, %v5174_v3 }
 0x253   : > { %v2724_v61 = vadd.f32 %v5359_v47, %v2595_v1  ;;  %v2475_v62 = vsel %vm2347_vm11, %v2213_v10, %v2411_v31 }
 0x254   : > { %1212 = vmatmul.bf16.gmra.mxu1 %v5363_v50  ;;  %v1342_v18 = vpop.f32.mrf.mxu2  ;;  %v2046_v12 = vpop.f32.mrf.mxu3  ;;  %2254 = vmatmul.bf16.gmra.mxu0 %v1831_v0  ;;  %v2543_v55 = vmul.f32 %v5266_v4, %v2475_v62  ;;  %v3051_v50 = vand.u32 2147483647, %v5420_v44  ;;  %v5452_v4 = vpack.c.bf16 %v5394_v14, %v5391_v48  ;;  %v1612_v7 = vmul.f32 0.2, %v1174_v11 }
 0x255   : > { %v4453_v17 = vpop.eup %4452  ;;  %v4314_v52 = vmul.f32 -1.442695, %v2724_v61  ;;  %v2047_v59 = vadd.f32 %v5258_v53, %v2046_v12  ;;  %v5457_v53 = vpack.c.bf16 %v5405_v28, %v5399_v16  ;;  %vm1484_vm14 = vcmp.gt.f32.partialorder %v1174_v11, 0.0 }
 0x256   : > { %v4455_v6 = vpop.eup %4454  ;;  %v5448_v60 = vadd.f32 1.0, %v4453_v17  ;;  %2624 = vadd.xlane.f32.xlu2 %v2543_v55  ;;  %vm5467_vm0 = vcmp.eq.f32.partialorder %v3051_v50, 8.507059e+37  ;;  %v3054_v28 = vor.u32 1.1754944e-38, %v3053_v20  ;;  %v1343_v30 = vadd.f32 %v1342_v18, %v5176_v5 }
 0x257   : > { %v3043_v36 = vmul.f32 %v4455_v6, %v5420_v44  ;;  %4456 = vpow2.f32 %v4314_v52  ;;  %v2216_v48 = vadd.f32 %v2215_v54, %v2047_v59  ;;  %vm3048_vm2 = vweird.f32 %v4455_v6 }
 0x258   : > { %4458 = vrcp.f32 %v5448_v60  ;;  %v1740_v33 = vsel %vm1484_vm14, %v1174_v11, %v1612_v7  ;;  %vm3049_vm5 = vmor %vm3047_vm15, %vm3048_vm2  ;;  %v3066_v35 = vand.u32 2147483647, %v5448_v60  ;;  %v3068_v46 = vand.u32 2147483648, %v5448_v60 }
 0x259   : > { %v3044_v39 = vsub.f32 1.0, %v3043_v36  ;;  %v1175_v14 = vpop.f32.mrf.mxu1  ;;  %v2217_v26 = vpop.f32.mrf.mxu0  ;;  %v2412_v34 = vmul.f32 0.2, %v2216_v48  ;;  %vm2348_vm3 = vcmp.gt.f32.partialorder %v2216_v48, 0.0  ;;  %v1613_v54 = vmul.f32 0.2, %v1343_v30 }
 0x25a   : > { %v1176_v27 = vadd.f32 %v1175_v14, %v5174_v3  ;;  %v2597_v29 = vpop.xlane.xlu1 %2596  ;;  %vm1485_vm6 = vcmp.gt.f32.partialorder %v1343_v30, 0.0  ;;  %vm3062_vm8 = vweird.f32 %v5448_v60  ;;  %vm5506_vm9 = vcmp.eq.f32.partialorder %v3066_v35, 8.507059e+37 }
 0x25b   : > { %v3045_v45 = vmul.f32 %v4455_v6, %v3044_v39  ;;  %v2725_v32 = vadd.f32 %v5359_v47, %v2597_v29  ;;  %v2476_v44 = vsel %vm2348_vm3, %v2216_v48, %v2412_v34  ;;  %v3069_v13 = vor.u32 1.1754944e-38, %v3068_v46 }
 0x25c   : > { %v1614_v38 = vmul.f32 0.2, %v1176_v27  ;;  %v1344_v41 = vpop.f32.mrf.mxu2  ;;  %v2048_v21 = vpop.f32.mrf.mxu3  ;;  %vm1486_vm4 = vcmp.gt.f32.partialorder %v1176_v27, 0.0  ;;  %v2544_v2 = vmul.f32 %v5513_v63, %v2476_v44  ;;  %v1741_v56 = vsel %vm1485_vm6, %v1343_v30, %v1613_v54 }
 0x25d   : > { %v4457_v25 = vpop.eup %4456  ;;  %v3046_v40 = vadd.f32 %v4455_v6, %v3045_v45  ;;  %v4315_v8 = vmul.f32 -1.442695, %v2725_v32  ;;  %v1345_v43 = vadd.f32 %v1344_v41, %v5176_v5  ;;  %v2049_v51 = vadd.f32 %v5493_v37, %v2048_v21 }
 0x25e   : > { %v4459_v19 = vpop.eup %4458  ;;  %v5488_v10 = vadd.f32 1.0, %v4457_v25  ;;  %v1742_v58 = vsel %vm1486_vm4, %v1176_v27, %v1614_v38  ;;  %2626 = vadd.xlane.f32.xlu0 %v2544_v2 }
 0x25f   : > { %v3050_v49 = vsel %vm3049_vm5, %v4455_v6, %v3046_v40  ;;  %v3058_v15 = vmul.f32 %v4459_v19, %v5448_v60  ;;  %4460 = vpow2.f32 %v4315_v8  ;;  %vm1487_vm7 = vcmp.gt.f32.partialorder %v1345_v43, 0.0 }
 0x260   : > { %v3055_v57 = vsel %vm5467_vm0, %v3054_v28, %v3050_v49  ;;  %4462 = vrcp.f32 %v5488_v10  ;;  %v1615_v1 = vmul.f32 0.2, %v1345_v43  ;;  %v2218_v62 = vadd.f32 %v2217_v26, %v2049_v51 }
 0x261   : > { %4003 = vst.msk [vmem:[%s5481_s27] sm:$0xff] %vm4002_vm13, %v3055_v57  ;;  %v3059_v31 = vsub.f32 1.0, %v3058_v15  ;;  %v1178_v0 = vpop.f32.mrf.mxu1  ;;  %1386 = vmatmul.bf16.gmra.mxu2 %v5452_v4  ;;  %v2220_v42 = vpop.f32.mrf.mxu0  ;;  %vm3063_vm10 = vweird.f32 %v4459_v19  ;;  %v1832_v12 = vpack.c.bf16 %v1742_v58, %v1740_v33  ;;  %v3081_v20 = vand.u32 2147483647, %v5488_v10 }
 0x262   : > { %v2599_v11 = vpop.xlane.xlu2 %2598  ;;  %v1179_v17 = vadd.f32 %v1178_v0, %v5174_v3  ;;  %v1743_v9 = vsel %vm1487_vm7, %v1345_v43, %v1615_v1  ;;  %v3083_v36 = vand.u32 2147483648, %v5488_v10  ;;  %vm3064_vm11 = vmor %vm3062_vm8, %vm3063_vm10  ;;  %v2413_v26 = vmul.f32 0.2, %v2218_v62 }
 0x263   : > { %v3060_v18 = vmul.f32 %v4459_v19, %v3059_v31  ;;  %v2726_v55 = vadd.f32 %v5359_v47, %v2599_v11  ;;  %2090 = vmatmul.bf16.gmra.mxu3 %v1832_v12  ;;  %v1833_v14 = vpack.c.bf16 %v1743_v9, %v1741_v56  ;;  %vm2349_vm1 = vcmp.gt.f32.partialorder %v2218_v62, 0.0 }
 0x264   : > { %1217 = vmatmul.bf16.gmra.mxu1 %v5452_v4  ;;  %v1347_v52 = vpop.f32.mrf.mxu2  ;;  %v2051_v59 = vpop.f32.mrf.mxu3  ;;  %vm3077_vm12 = vweird.f32 %v5488_v10  ;;  %v1616_v60 = vmul.f32 0.2, %v1179_v17  ;;  %vm5536_vm14 = vcmp.eq.f32.partialorder %v3081_v20, 8.507059e+37  ;;  %v3084_v32 = vor.u32 1.1754944e-38, %v3083_v36 }
 0x265   : > { %v4461_v6 = vpop.eup %4460  ;;  %v3061_v50 = vadd.f32 %v4459_v19, %v3060_v18  ;;  %v4316_v7 = vmul.f32 -1.442695, %v2726_v55  ;;  %v2052_v48 = vadd.f32 %v5493_v37, %v2051_v59  ;;  %2259 = vmatmul.bf16.gmra.mxu0 %v1833_v14  ;;  %vm1488_vm15 = vcmp.gt.f32.partialorder %v1179_v17, 0.0 }
 0x266   : > { %v4463_v39 = vpop.eup %4462  ;;  %v5526_v4 = vadd.f32 1.0, %v4461_v6  ;;  %v1348_v38 = vadd.f32 %v1347_v52, %v5176_v5  ;;  %v2477_v21 = vsel %vm2349_vm1, %v2218_v62, %v2413_v26  ;;  %v1744_v49 = vsel %vm1488_vm15, %v1179_v17, %v1616_v60 }
 0x267   : > { %v3065_v16 = vsel %vm3064_vm11, %v4459_v19, %v3061_v50  ;;  %v3073_v28 = vmul.f32 %v4463_v39, %v5488_v10  ;;  %4464 = vpow2.f32 %v4316_v7  ;;  %v2221_v41 = vadd.f32 %v2220_v42, %v2052_v48 }
 0x268   : > { %v3070_v27 = vsel %vm5506_vm9, %v3069_v13, %v3065_v16  ;;  %4466 = vrcp.f32 %v5526_v4  ;;  %vm3078_vm0 = vweird.f32 %v4463_v39  ;;  %v2545_v8 = vmul.f32 %v5513_v63, %v2477_v21 }
 0x269   : > { %4004 = vst.msk [vmem:[%s5481_s27 + $0x8] sm:$0xff] %vm4002_vm13, %v3070_v27  ;;  %v3074_v29 = vsub.f32 1.0, %v3073_v28  ;;  %v1180_v34 = vpop.f32.mrf.mxu1  ;;  %v2222_v30 = vpop.f32.mrf.mxu0  ;;  %vm2350_vm2 = vcmp.gt.f32.partialorder %v2221_v41, 0.0  ;;  %v2414_v51 = vmul.f32 0.2, %v2221_v41  ;;  %vm3079_vm4 = vmor %vm3077_vm12, %vm3078_vm0  ;;  %v3098_v1 = vand.u32 2147483648, %v5526_v4 }
 0x26a   : > { %v1181_v33 = vadd.f32 %v1180_v34, %v5174_v3  ;;  %v2601_v25 = vpop.xlane.xlu2 %2600  ;;  %2628 = vadd.xlane.f32.xlu1 %v2545_v8  ;;  %v3096_v31 = vand.u32 2147483647, %v5526_v4  ;;  %v1617_v10 = vmul.f32 0.2, %v1348_v38  ;;  %vm1489_vm5 = vcmp.gt.f32.partialorder %v1348_v38, 0.0 }
 0x26b   : > { %v3075_v40 = vmul.f32 %v4463_v39, %v3074_v29  ;;  %v2727_v43 = vadd.f32 %v5359_v47, %v2601_v25  ;;  %v2478_v2 = vsel %vm2350_vm2, %v2221_v41, %v2414_v51  ;;  %vm3092_vm7 = vweird.f32 %v5526_v4 }
 0x26c   : > { %v1618_v19 = vmul.f32 0.2, %v1181_v33  ;;  %v1349_v35 = vpop.f32.mrf.mxu2  ;;  %v2053_v46 = vpop.f32.mrf.mxu3  ;;  %vm1490_vm3 = vcmp.gt.f32.partialorder %v1181_v33, 0.0  ;;  %vm5564_vm8 = vcmp.eq.f32.partialorder %v3096_v31, 8.507059e+37  ;;  %v2546_v56 = vmul.f32 %v5513_v63, %v2478_v2 }
 0x26d   : > { %v4465_v15 = vpop.eup %4464  ;;  %v3076_v44 = vadd.f32 %v4463_v39, %v3075_v40  ;;  %v4317_v57 = vmul.f32 -1.442695, %v2727_v43  ;;  %v1350_v54 = vadd.f32 %v1349_v35, %v5176_v5  ;;  %v2054_v42 = vadd.f32 %v5493_v37, %v2053_v46 }
 0x26e   : > { %v4467_v58 = vpop.eup %4466  ;;  %v5551_v0 = vadd.f32 1.0, %v4465_v15  ;;  %v1746_v18 = vsel %vm1490_vm3, %v1181_v33, %v1618_v19  ;;  %v3099_v36 = vor.u32 1.1754944e-38, %v3098_v1  ;;  %2630 = vadd.xlane.f32.xlu2 %v2546_v56  ;;  %v1745_v14 = vsel %vm1489_vm5, %v1348_v38, %v1617_v10 }
 0x26f   : > { %v3080_v61 = vsel %vm3079_vm4, %v4463_v39, %v3076_v44  ;;  %v3088_v62 = vmul.f32 %v4467_v58, %v5526_v4  ;;  %4468 = vpow2.f32 %v4317_v57  ;;  %vm1491_vm6 = vcmp.gt.f32.partialorder %v1350_v54, 0.0 }
 0x270   : > { %v3085_v11 = vsel %vm5536_vm14, %v3084_v32, %v3080_v61  ;;  %4470 = vrcp.f32 %v5551_v0  ;;  %v1619_v55 = vmul.f32 0.2, %v1350_v54  ;;  %v2223_v59 = vadd.f32 %v2222_v30, %v2054_v42 }
 0x271   : > { %4005 = vst.msk [vmem:[%s5481_s27 + $0x10] sm:$0xff] %vm4002_vm13, %v3085_v11  ;;  %v3089_v12 = vsub.f32 1.0, %v3088_v62  ;;  %v1183_v13 = vpop.f32.mrf.mxu1  ;;  %1391 = vmatmul.bf16.gmra.mxu2 %v5457_v53  ;;  %v2225_v17 = vpop.f32.mrf.mxu0  ;;  %vm3093_vm9 = vweird.f32 %v4467_v58  ;;  %v1834_v50 = vpack.c.bf16 %v1746_v18, %v1744_v49  ;;  %v3111_v27 = vand.u32 2147483647, %v5551_v0 }
 0x272   : > { %v2603_v9 = vpop.xlane.xlu0 %2602  ;;  %v1184_v7 = vadd.f32 %v1183_v13, %v5174_v3  ;;  %v1747_v26 = vsel %vm1491_vm6, %v1350_v54, %v1619_v55  ;;  %v3113_v60 = vand.u32 2147483648, %v5551_v0  ;;  %vm3094_vm10 = vmor %vm3092_vm7, %vm3093_vm9  ;;  %v2415_v30 = vmul.f32 0.2, %v2223_v59 }
 0x273   : > { %v3090_v6 = vmul.f32 %v4467_v58, %v3089_v12  ;;  %v2728_v20 = vadd.f32 %v5359_v47, %v2603_v9  ;;  %2095 = vmatmul.bf16.gmra.mxu3 %v1834_v50  ;;  %v1835_v34 = vpack.c.bf16 %v1747_v26, %v1745_v14  ;;  %vm2351_vm11 = vcmp.gt.f32.partialorder %v2223_v59, 0.0 }
 0x274   : > { %1222 = vmatmul.bf16.gmra.mxu1 %v5457_v53  ;;  %v1352_v39 = vpop.f32.mrf.mxu2  ;;  %v2056_v48 = vpop.f32.mrf.mxu3  ;;  %vm3107_vm1 = vweird.f32 %v5551_v0  ;;  %v1620_v4 = vmul.f32 0.2, %v1184_v7  ;;  %vm5589_vm12 = vcmp.eq.f32.partialorder %v3111_v27, 8.507059e+37  ;;  %v3114_v40 = vor.u32 1.1754944e-38, %v3113_v60 }
 0x275   : > { %v4469_v16 = vpop.eup %4468  ;;  %v3091_v28 = vadd.f32 %v4467_v58, %v3090_v6  ;;  %v4318_v29 = vmul.f32 -1.442695, %v2728_v20  ;;  %v2057_v32 = vadd.f32 %v5493_v37, %v2056_v48  ;;  %2264 = vmatmul.bf16.gmra.mxu0 %v1835_v34  ;;  %vm1492_vm14 = vcmp.gt.f32.partialorder %v1184_v7, 0.0 }
 0x276   : > { %v4471_v45 = vpop.eup %4470  ;;  %v5579_v53 = vadd.f32 1.0, %v4469_v16  ;;  %v1353_v19 = vadd.f32 %v1352_v39, %v5176_v5  ;;  %v2479_v46 = vsel %vm2351_vm11, %v2223_v59, %v2415_v30  ;;  %v1748_v42 = vsel %vm1492_vm14, %v1184_v7, %v1620_v4 }
 0x277   : > { %v3095_v38 = vsel %vm3094_vm10, %v4467_v58, %v3091_v28  ;;  %v3103_v41 = vmul.f32 %v4471_v45, %v5551_v0  ;;  %4472 = vpow2.f32 %v4318_v29  ;;  %v2226_v35 = vadd.f32 %v2225_v17, %v2057_v32 }
 0x278   : > { %v3100_v21 = vsel %vm5564_vm8, %v3099_v36, %v3095_v38  ;;  %4474 = vrcp.f32 %v5579_v53  ;;  %vm3108_vm15 = vweird.f32 %v4471_v45  ;;  %v2547_v44 = vmul.f32 %v5513_v63, %v2479_v46 }
 0x279   : > { %4006 = vst.msk [vmem:[%s5481_s27 + $0x18] sm:$0xff] %vm4002_vm13, %v3100_v21  ;;  %v3104_v33 = vsub.f32 1.0, %v3103_v41  ;;  %v1185_v8 = vpop.f32.mrf.mxu1  ;;  %v2227_v43 = vpop.f32.mrf.mxu0  ;;  %vm2352_vm0 = vcmp.gt.f32.partialorder %v2226_v35, 0.0  ;;  %v2416_v1 = vmul.f32 0.2, %v2226_v35  ;;  %vm3109_vm3 = vmor %vm3107_vm1, %vm3108_vm15  ;;  %v3128_v12 = vand.u32 2147483648, %v5579_v53 }
 0x27a   : > { %v1186_v51 = vadd.f32 %v1185_v8, %v5174_v3  ;;  %v2605_v49 = vpop.xlane.xlu1 %2604  ;;  %2632 = vadd.xlane.f32.xlu0 %v2547_v44  ;;  %v3126_v18 = vand.u32 2147483647, %v5579_v53  ;;  %v1621_v0 = vmul.f32 0.2, %v1353_v19  ;;  %vm1493_vm4 = vcmp.gt.f32.partialorder %v1353_v19, 0.0 }
 0x27b   : > { %v3105_v15 = vmul.f32 %v4471_v45, %v3104_v33  ;;  %v2729_v57 = vadd.f32 %v5359_v47, %v2605_v49  ;;  %v2480_v59 = vsel %vm2352_vm0, %v2226_v35, %v2416_v1  ;;  %vm3122_vm6 = vweird.f32 %v5579_v53 }
 0x27c   : > { %v1622_v54 = vmul.f32 0.2, %v1186_v51  ;;  %v1354_v58 = vpop.f32.mrf.mxu2  ;;  %v2058_v31 = vpop.f32.mrf.mxu3  ;;  %vm1494_vm2 = vcmp.gt.f32.partialorder %v1186_v51, 0.0  ;;  %vm5617_vm7 = vcmp.eq.f32.partialorder %v3126_v18, 8.507059e+37  ;;  %v2548_v48 = vmul.f32 %v5513_v63, %v2480_v59 }
 0x27d   : > { %v4473_v61 = vpop.eup %4472  ;;  %v3106_v62 = vadd.f32 %v4471_v45, %v3105_v15  ;;  %v4319_v2 = vmul.f32 -1.442695, %v2729_v57  ;;  %v1355_v11 = vadd.f32 %v1354_v58, %v5176_v5  ;;  %v2059_v13 = vadd.f32 %v5493_v37, %v2058_v31 }
 0x27e   : > { %v4475_v10 = vpop.eup %4474  ;;  %v5604_v55 = vadd.f32 1.0, %v4473_v61  ;;  %v1750_v9 = vsel %vm1494_vm2, %v1186_v51, %v1622_v54  ;;  %v3129_v27 = vor.u32 1.1754944e-38, %v3128_v12  ;;  %2634 = vadd.xlane.f32.xlu1 %v2548_v48  ;;  %v1749_v32 = vsel %vm1493_vm4, %v1353_v19, %v1621_v0 }
 0x27f   : > { %v3110_v17 = vsel %vm3109_vm3, %v4471_v45, %v3106_v62  ;;  %v3118_v52 = vmul.f32 %v4475_v10, %v5579_v53  ;;  %4476 = vpow2.f32 %v4319_v2  ;;  %vm1495_vm5 = vcmp.gt.f32.partialorder %v1355_v11, 0.0 }
 0x280   : > { %v3115_v56 = vsel %vm5589_vm12, %v3114_v40, %v3110_v17  ;;  %4478 = vrcp.f32 %v5604_v55  ;;  %v1623_v50 = vmul.f32 0.2, %v1355_v11  ;;  %v2228_v39 = vadd.f32 %v2227_v43, %v2059_v13 }
 0x281   : > { %4007 = vst.msk [vmem:[%s5481_s27 + $0x20] sm:$0xff] %vm4002_vm13, %v3115_v56  ;;  %v3119_v6 = vsub.f32 1.0, %v3118_v52  ;;  %v1188_v20 = vpop.f32.mrf.mxu1  ;;  %1396 = vmatmul.bf16.gmra.mxu2 %v5459_v22  ;;  %v2230_v36 = vpop.f32.mrf.mxu0  ;;  %vm3123_vm8 = vweird.f32 %v4475_v10  ;;  %v1836_v16 = vpack.c.bf16 %v1750_v9, %v1748_v42  ;;  %v3141_v41 = vand.u32 2147483647, %v5604_v55 }
 0x282   : > { %v2607_v14 = vpop.xlane.xlu2 %2606  ;;  %v1189_v60 = vadd.f32 %v1188_v20, %v5174_v3  ;;  %v1751_v34 = vsel %vm1495_vm5, %v1355_v11, %v1623_v50  ;;  %v3143_v21 = vand.u32 2147483648, %v5604_v55  ;;  %vm3124_vm9 = vmor %vm3122_vm6, %vm3123_vm8  ;;  %v2417_v8 = vmul.f32 0.2, %v2228_v39 }
 0x283   : > { %v3120_v26 = vmul.f32 %v4475_v10, %v3119_v6  ;;  %v2730_v28 = vadd.f32 %v5359_v47, %v2607_v14  ;;  %2100 = vmatmul.bf16.gmra.mxu3 %v1836_v16  ;;  %v1837_v40 = vpack.c.bf16 %v1751_v34, %v1749_v32  ;;  %vm2353_vm10 = vcmp.gt.f32.partialorder %v2228_v39, 0.0 }
 0x284   : > { %1227 = vmatmul.bf16.gmra.mxu1 %v5459_v22  ;;  %v1357_v29 = vpop.f32.mrf.mxu2  ;;  %v2061_v45 = vpop.f32.mrf.mxu3  ;;  %vm3137_vm11 = vweird.f32 %v5604_v55  ;;  %v1624_v53 = vmul.f32 0.2, %v1189_v60  ;;  %vm5642_vm1 = vcmp.eq.f32.partialorder %v3141_v41, 8.507059e+37  ;;  %v3144_v49 = vor.u32 1.1754944e-38, %v3143_v21 }
 0x285   : > { %v4477_v30 = vpop.eup %4476  ;;  %v3121_v38 = vadd.f32 %v4475_v10, %v3120_v26  ;;  %v4320_v4 = vmul.f32 -1.442695, %v2730_v28  ;;  %v2062_v25 = vadd.f32 %v5493_v37, %v2061_v45  ;;  %2269 = vmatmul.bf16.gmra.mxu0 %v1837_v40  ;;  %vm1496_vm12 = vcmp.gt.f32.partialorder %v1189_v60, 0.0 }
 0x286   : > { %v4479_v33 = vpop.eup %4478  ;;  %v5632_v22 = vadd.f32 1.0, %v4477_v30  ;;  %v1358_v57 = vadd.f32 %v1357_v29, %v5176_v5  ;;  %v2481_v58 = vsel %vm2353_vm10, %v2228_v39, %v2417_v8  ;;  %v1752_v12 = vsel %vm1496_vm12, %v1189_v60, %v1624_v53 }
 0x287   : > { %v3125_v43 = vsel %vm3124_vm9, %v4475_v10, %v3121_v38  ;;  %v3133_v19 = vmul.f32 %v4479_v33, %v5604_v55  ;;  %4480 = vpow2.f32 %v4320_v4  ;;  %v2231_v54 = vadd.f32 %v2230_v36, %v2062_v25 }
 0x288   : > { %v3130_v35 = vsel %vm5617_vm7, %v3129_v27, %v3125_v43  ;;  %4482 = vrcp.f32 %v5632_v22  ;;  %vm3138_vm14 = vweird.f32 %v4479_v33  ;;  %v2549_v61 = vmul.f32 %v5513_v63, %v2481_v58 }
 0x289   : > { %4008 = vst.msk [vmem:[%s5481_s27 + $0x28] sm:$0xff] %vm4002_vm13, %v3130_v35  ;;  %v3134_v46 = vsub.f32 1.0, %v3133_v19  ;;  %v1190_v15 = vpop.f32.mrf.mxu1  ;;  %v2232_v44 = vpop.f32.mrf.mxu0  ;;  %vm2354_vm15 = vcmp.gt.f32.partialorder %v2231_v54, 0.0  ;;  %v2418_v18 = vmul.f32 0.2, %v2231_v54  ;;  %vm3139_vm2 = vmor %vm3137_vm11, %vm3138_vm14  ;;  %v3158_v9 = vand.u32 2147483648, %v5632_v22 }
 0x28a   : > { %v1191_v31 = vadd.f32 %v1190_v15, %v5174_v3  ;;  %v2609_v1 = vpop.xlane.xlu0 %2608  ;;  %2636 = vadd.xlane.f32.xlu2 %v2549_v61  ;;  %v3156_v0 = vand.u32 2147483647, %v5632_v22  ;;  %v1625_v55 = vmul.f32 0.2, %v1358_v57  ;;  %vm1497_vm3 = vcmp.gt.f32.partialorder %v1358_v57, 0.0 }
 0x28b   : > { %v3135_v42 = vmul.f32 %v4479_v33, %v3134_v46  ;;  %v2731_v62 = vadd.f32 %v5359_v47, %v2609_v1  ;;  %v2482_v7 = vsel %vm2354_vm15, %v2231_v54, %v2418_v18  ;;  %vm3152_vm5 = vweird.f32 %v5632_v22 }
 0x28c   : > { %v1626_v2 = vmul.f32 0.2, %v1191_v31  ;;  %v1359_v11 = vpop.f32.mrf.mxu2  ;;  %v2063_v10 = vpop.f32.mrf.mxu3  ;;  %vm1498_vm0 = vcmp.gt.f32.partialorder %v1191_v31, 0.0  ;;  %vm5670_vm6 = vcmp.eq.f32.partialorder %v3156_v0, 8.507059e+37  ;;  %v2550_v29 = vmul.f32 %v5513_v63, %v2482_v7 }
 0x28d   : > { %v4481_v13 = vpop.eup %4480  ;;  %v3136_v17 = vadd.f32 %v4479_v33, %v3135_v42  ;;  %v4321_v52 = vmul.f32 -1.442695, %v2731_v62  ;;  %v1360_v59 = vadd.f32 %v1359_v11, %v5176_v5  ;;  %v2064_v50 = vadd.f32 %v5493_v37, %v2063_v10 }
 0x28e   : > { %v4483_v56 = vpop.eup %4482  ;;  %v5657_v6 = vadd.f32 1.0, %v4481_v13  ;;  %v1754_v48 = vsel %vm1498_vm0, %v1191_v31, %v1626_v2  ;;  %v3159_v38 = vor.u32 1.1754944e-38, %v3158_v9  ;;  %2638 = vadd.xlane.f32.xlu0 %v2550_v29 }
 0x28f   : > { %v3140_v20 = vsel %vm3139_vm2, %v4479_v33, %v3136_v17  ;;  %v3148_v36 = vmul.f32 %v4483_v56, %v5632_v22  ;;  %4484 = vpow2.f32 %v4321_v52  ;;  %vm1499_vm4 = vcmp.gt.f32.partialorder %v1360_v59, 0.0 }
 0x290   : > { %v3145_v39 = vsel %vm5642_vm1, %v3144_v49, %v3140_v20  ;;  %4486 = vrcp.f32 %v5657_v6  ;;  %v1627_v26 = vmul.f32 0.2, %v1360_v59  ;;  %v2233_v60 = vadd.f32 %v2232_v44, %v2064_v50 }
 0x291   : > { %4009 = vst.msk [vmem:[%s5481_s27 + $0x30] sm:$0xff] %vm4002_vm13, %v3145_v39  ;;  %v3149_v14 = vsub.f32 1.0, %v3148_v36  ;;  %v1193_v16 = vpop.f32.mrf.mxu1  ;;  %1401 = vmatmul.bf16.gmra.mxu2 %v5462_v23  ;;  %v2235_v28 = vpop.f32.mrf.mxu0  ;;  %vm3153_vm7 = vweird.f32 %v4483_v56  ;;  %v1838_v34 = vpack.c.bf16 %v1754_v48, %v1752_v12  ;;  %v1753_v33 = vsel %vm1497_vm3, %v1358_v57, %v1625_v55 }
 0x292   : > { %v2611_v45 = vpop.xlane.xlu1 %2610  ;;  %v1194_v41 = vadd.f32 %v1193_v16, %v5174_v3  ;;  %v1755_v25 = vsel %vm1499_vm4, %v1360_v59, %v1627_v26  ;;  %v3171_v43 = vand.u32 2147483647, %v5657_v6  ;;  %v3173_v19 = vand.u32 2147483648, %v5657_v6  ;;  %vm3154_vm8 = vmor %vm3152_vm5, %vm3153_vm7 }
 0x293   : > { %v3150_v32 = vmul.f32 %v4483_v56, %v3149_v14  ;;  %v2732_v30 = vadd.f32 %v5359_v47, %v2611_v45  ;;  %2105 = vmatmul.bf16.gmra.mxu3 %v1838_v34  ;;  %v1839_v51 = vpack.c.bf16 %v1755_v25, %v1753_v33  ;;  %v2419_v49 = vmul.f32 0.2, %v2233_v60  ;;  %v5728_v33 = vld [vmem:[#allocation2] ss:$0 sm:$0xff] }
 0x294   : > { %1232 = vmatmul.bf16.gmra.mxu1 %v5462_v23  ;;  %v1362_v21 = vpop.f32.mrf.mxu2  ;;  %v2066_v4 = vpop.f32.mrf.mxu3  ;;  %vm2355_vm9 = vcmp.gt.f32.partialorder %v2233_v60, 0.0  ;;  %vm3167_vm10 = vweird.f32 %v5657_v6  ;;  %v1628_v22 = vmul.f32 0.2, %v1194_v41  ;;  %vm5695_vm11 = vcmp.eq.f32.partialorder %v3171_v43, 8.507059e+37 }
 0x295   : > { %v4485_v40 = vpop.eup %4484  ;;  %v3151_v8 = vadd.f32 %v4483_v56, %v3150_v32  ;;  %v4322_v35 = vmul.f32 -1.442695, %v2732_v30  ;;  %v2067_v46 = vadd.f32 %v5493_v37, %v2066_v4  ;;  %2274 = vmatmul.bf16.gmra.mxu0 %v1839_v51  ;;  %v3174_v31 = vor.u32 1.1754944e-38, %v3173_v19 }
 0x296   : > { %v4487_v53 = vpop.eup %4486  ;;  %v5685_v23 = vadd.f32 1.0, %v4485_v40  ;;  %vm1500_vm1 = vcmp.gt.f32.partialorder %v1194_v41, 0.0  ;;  %v1363_v61 = vadd.f32 %v1362_v21, %v5176_v5  ;;  %v2483_v2 = vsel %vm2355_vm9, %v2233_v60, %v2419_v49 }
 0x297   : > { %v3155_v15 = vsel %vm3154_vm8, %v4483_v56, %v3151_v8  ;;  %v3163_v44 = vmul.f32 %v4487_v53, %v5657_v6  ;;  %4488 = vpow2.f32 %v4322_v35  ;;  %v2236_v62 = vadd.f32 %v2235_v28, %v2067_v46 }
 0x298   : > { %v3160_v57 = vsel %vm5670_vm6, %v3159_v38, %v3155_v15  ;;  %4490 = vrcp.f32 %v5685_v23  ;;  %vm3168_vm12 = vweird.f32 %v4487_v53  ;;  %v2551_v12 = vmul.f32 %v5513_v63, %v2483_v2 }
 0x299   : > { %4010 = vst.msk [vmem:[%s5481_s27 + $0x38] sm:$0xff] %vm4002_vm13, %v3160_v57  ;;  %v3164_v54 = vsub.f32 1.0, %v3163_v44  ;;  %v1195_v1 = vpop.f32.mrf.mxu1  ;;  %v2237_v42 = vpop.f32.mrf.mxu0  ;;  %vm2356_vm14 = vcmp.gt.f32.partialorder %v2236_v62, 0.0  ;;  %v2420_v56 = vmul.f32 0.2, %v2236_v62  ;;  %v1756_v0 = vsel %vm1500_vm1, %v1194_v41, %v1628_v22  ;;  %vm3169_vm0 = vmor %vm3167_vm10, %vm3168_vm12 }
 0x29a   : > { %v1196_v11 = vadd.f32 %v1195_v1, %v5174_v3  ;;  %v2613_v10 = vpop.xlane.xlu2 %2612  ;;  %2640 = vadd.xlane.f32.xlu1 %v2551_v12  ;;  %v3188_v39 = vand.u32 2147483648, %v5685_v23  ;;  %v1629_v6 = vmul.f32 0.2, %v1363_v61  ;;  %vm1501_vm2 = vcmp.gt.f32.partialorder %v1363_v61, 0.0 }
 0x29b   : > { %v3165_v18 = vmul.f32 %v4487_v53, %v3164_v54  ;;  %v2733_v13 = vadd.f32 %v5359_v47, %v2613_v10  ;;  %v3186_v47 = vand.u32 2147483647, %v5685_v23  ;;  %v2484_v16 = vsel %vm2356_vm14, %v2236_v62, %v2420_v56 }
 0x29c   : > { %v1630_v17 = vmul.f32 0.2, %v1196_v11  ;;  %v1364_v52 = vpop.f32.mrf.mxu2  ;;  %v2068_v59 = vpop.f32.mrf.mxu3  ;;  %vm1502_vm15 = vcmp.gt.f32.partialorder %v1196_v11, 0.0  ;;  %vm3182_vm4 = vweird.f32 %v5685_v23  ;;  %v2552_v38 = vmul.f32 %v5513_v63, %v2484_v16 }
 0x29d   : > { %v4489_v9 = vpop.eup %4488  ;;  %v3166_v50 = vadd.f32 %v4487_v53, %v3165_v18  ;;  %v4323_v20 = vmul.f32 -1.442695, %v2733_v13  ;;  %v1365_v36 = vadd.f32 %v1364_v52, %v5176_v5  ;;  %v2069_v48 = vadd.f32 %v5493_v37, %v2068_v59 }
 0x29e   : > { %v4491_v7 = vpop.eup %4490  ;;  %v5710_v55 = vadd.f32 1.0, %v4489_v9  ;;  %v1758_v27 = vsel %vm1502_vm15, %v1196_v11, %v1630_v17  ;;  %vm5723_vm5 = vcmp.eq.f32.partialorder %v3186_v47, 8.507059e+37  ;;  %v3189_v40 = vor.u32 1.1754944e-38, %v3188_v39  ;;  %2642 = vadd.xlane.f32.xlu2 %v2552_v38 }
 0x29f   : > { %v3170_v14 = vsel %vm3169_vm0, %v4487_v53, %v3166_v50  ;;  %v3178_v26 = vmul.f32 %v4491_v7, %v5685_v23  ;;  %4492 = vpow2.f32 %v4323_v20  ;;  %vm1503_vm3 = vcmp.gt.f32.partialorder %v1365_v36, 0.0 }
 0x2a0   : > { %v3175_v28 = vsel %vm5695_vm11, %v3174_v31, %v3170_v14  ;;  %4494 = vrcp.f32 %v5710_v55  ;;  %v1631_v29 = vmul.f32 0.2, %v1365_v36  ;;  %v2238_v30 = vadd.f32 %v2237_v42, %v2069_v48 }
 0x2a1   : > { %4011 = vst.msk [vmem:[%s5481_s27 + $0x40] sm:$0xff] %vm4002_vm13, %v3175_v28  ;;  %v3179_v60 = vsub.f32 1.0, %v3178_v26  ;;  %v1198_v45 = vpop.f32.mrf.mxu1  ;;  %1406 = vmatmul.bf16.gmra.mxu2 %v5464_v24  ;;  %v2240_v32 = vpop.f32.mrf.mxu0  ;;  %vm3183_vm6 = vweird.f32 %v4491_v7  ;;  %v1840_v4 = vpack.c.bf16 %v1758_v27, %v1756_v0  ;;  %v1757_v35 = vsel %vm1501_vm2, %v1363_v61, %v1629_v6 }
 0x2a2   : > { %v2615_v41 = vpop.xlane.xlu0 %2614  ;;  %v1199_v8 = vadd.f32 %v1198_v45, %v5174_v3  ;;  %v1759_v53 = vsel %vm1503_vm3, %v1365_v36, %v1631_v29  ;;  %v3201_v49 = vand.u32 2147483647, %v5710_v55  ;;  %v3203_v15 = vand.u32 2147483648, %v5710_v55  ;;  %vm3184_vm7 = vmor %vm3182_vm4, %vm3183_vm6 }
 0x2a3   : > { %v3180_v21 = vmul.f32 %v4491_v7, %v3179_v60  ;;  %v2734_v25 = vadd.f32 %v5728_v33, %v2615_v41  ;;  %2110 = vmatmul.bf16.gmra.mxu3 %v1840_v4  ;;  %v1841_v54 = vpack.c.bf16 %v1759_v53, %v1757_v35  ;;  %v2421_v58 = vmul.f32 0.2, %v2238_v30 }
 0x2a4   : > { %1237 = vmatmul.bf16.gmra.mxu1 %v5464_v24  ;;  %v1367_v43 = vpop.f32.mrf.mxu2  ;;  %v2071_v19 = vpop.f32.mrf.mxu3  ;;  %vm2357_vm8 = vcmp.gt.f32.partialorder %v2238_v30, 0.0  ;;  %vm3197_vm9 = vweird.f32 %v5710_v55  ;;  %v1632_v23 = vmul.f32 0.2, %v1199_v8  ;;  %vm5750_vm10 = vcmp.eq.f32.partialorder %v3201_v49, 8.507059e+37 }
 0x2a5   : > { %v4493_v46 = vpop.eup %4492  ;;  %v3181_v51 = vadd.f32 %v4491_v7, %v3180_v21  ;;  %v4324_v44 = vmul.f32 -1.442695, %v2734_v25  ;;  %v2072_v22 = vadd.f32 %v5493_v37, %v2071_v19  ;;  %2279 = vmatmul.bf16.gmra.mxu0 %v1841_v54  ;;  %v3204_v2 = vor.u32 1.1754944e-38, %v3203_v15 }
 0x2a6   : > { %v4495_v57 = vpop.eup %4494  ;;  %v5740_v24 = vadd.f32 1.0, %v4493_v46  ;;  %vm1504_vm11 = vcmp.gt.f32.partialorder %v1199_v8, 0.0  ;;  %v1368_v18 = vadd.f32 %v1367_v43, %v5176_v5  ;;  %v2485_v13 = vsel %vm2357_vm8, %v2238_v30, %v2421_v58 }
 0x2a7   : > { %v3185_v31 = vsel %vm3184_vm7, %v4491_v7, %v3181_v51  ;;  %v3193_v1 = vmul.f32 %v4495_v57, %v5710_v55  ;;  %4496 = vpow2.f32 %v4324_v44  ;;  %v2241_v12 = vadd.f32 %v2240_v32, %v2072_v22 }
 0x2a8   : > { %v3190_v42 = vsel %vm5723_vm5, %v3189_v40, %v3185_v31  ;;  %4498 = vrcp.f32 %v5740_v24  ;;  %vm3198_vm1 = vweird.f32 %v4495_v57  ;;  %v2553_v56 = vmul.f32 %v5513_v63, %v2485_v13 }
 0x2a9   : > { %4012 = vst.msk [vmem:[%s5481_s27 + $0x48] sm:$0xff] %vm4002_vm13, %v3190_v42  ;;  %v3194_v61 = vsub.f32 1.0, %v3193_v1  ;;  %v1200_v11 = vpop.f32.mrf.mxu1  ;;  %v2242_v10 = vpop.f32.mrf.mxu0  ;;  %vm2358_vm12 = vcmp.gt.f32.partialorder %v2241_v12, 0.0  ;;  %v2422_v36 = vmul.f32 0.2, %v2241_v12  ;;  %v1760_v7 = vsel %vm1504_vm11, %v1199_v8, %v1632_v23  ;;  %vm3199_vm15 = vmor %vm3197_vm9, %vm3198_vm1 }
 0x2aa   : > { %v1201_v17 = vadd.f32 %v1200_v11, %v5174_v3  ;;  %v2617_v52 = vpop.xlane.xlu1 %2616  ;;  %2644 = vadd.xlane.f32.xlu0 %v2553_v56  ;;  %v3216_v16 = vand.u32 2147483647, %v5740_v24  ;;  %v3218_v28 = vand.u32 2147483648, %v5740_v24  ;;  %v1633_v55 = vmul.f32 0.2, %v1368_v18 }
 0x2ab   : > { %v3195_v59 = vmul.f32 %v4495_v57, %v3194_v61  ;;  %v2735_v0 = vadd.f32 %v5728_v33, %v2617_v52  ;;  %v2486_v45 = vsel %vm2358_vm12, %v2241_v12, %v2422_v36  ;;  %vm1505_vm0 = vcmp.gt.f32.partialorder %v1368_v18, 0.0 }
 0x2ac   : > { %v1634_v9 = vmul.f32 0.2, %v1201_v17  ;;  %v1369_v50 = vpop.f32.mrf.mxu2  ;;  %v2073_v20 = vpop.f32.mrf.mxu3  ;;  %vm1506_vm14 = vcmp.gt.f32.partialorder %v1201_v17, 0.0  ;;  %vm3212_vm3 = vweird.f32 %v5740_v24  ;;  %vm5777_vm4 = vcmp.eq.f32.partialorder %v3216_v16, 8.507059e+37 }
 0x2ad   : > { %v4497_v47 = vpop.eup %4496  ;;  %v3196_v39 = vadd.f32 %v4495_v57, %v3195_v59  ;;  %v4325_v48 = vmul.f32 -1.442695, %v2735_v0  ;;  %v1370_v14 = vadd.f32 %v1369_v50, %v5176_v5  ;;  %v2074_v27 = vadd.f32 %v5493_v37, %v2073_v20 }
 0x2ae   : > { %v4499_v26 = vpop.eup %4498  ;;  %v5765_v6 = vadd.f32 1.0, %v4497_v47  ;;  %v1762_v34 = vsel %vm1506_vm14, %v1201_v17, %v1634_v9  ;;  %v2554_v40 = vmul.f32 %v5513_v63, %v2486_v45  ;;  %v3219_v53 = vor.u32 1.1754944e-38, %v3218_v28 }
 0x2af   : > { %v3200_v60 = vsel %vm3199_vm15, %v4495_v57, %v3196_v39  ;;  %v3208_v29 = vmul.f32 %v4499_v26, %v5740_v24  ;;  %4500 = vpow2.f32 %v4325_v48  ;;  %vm1507_vm2 = vcmp.gt.f32.partialorder %v1370_v14, 0.0 }
 0x2b0   : > { %v3205_v32 = vsel %vm5750_vm10, %v3204_v2, %v3200_v60  ;;  %4502 = vrcp.f32 %v5765_v6  ;;  %v1635_v38 = vmul.f32 0.2, %v1370_v14  ;;  %v2243_v25 = vadd.f32 %v2242_v10, %v2074_v27  ;;  %2646 = vadd.xlane.f32.xlu1 %v2554_v40 }
 0x2b1   : > { %4013 = vst.msk [vmem:[%s5481_s27 + $0x50] sm:$0xff] %vm4002_vm13, %v3205_v32  ;;  %v3209_v30 = vsub.f32 1.0, %v3208_v29  ;;  %v1203_v41 = vpop.f32.mrf.mxu1  ;;  %v2245_v21 = vpop.f32.mrf.mxu0  ;;  %vm3213_vm5 = vweird.f32 %v4499_v26  ;;  %v1842_v19 = vpack.c.bf16 %v1762_v34, %v1760_v7  ;;  %v1761_v15 = vsel %vm1505_vm0, %v1368_v18, %v1633_v55  ;;  %v5821_v32 = vld [vmem:[%s6426_s6] ss:$0 sm:$0xff] }
 0x2b2   : > { %v2619_v8 = vpop.xlane.xlu2 %2618  ;;  %v1204_v46 = vadd.f32 %v1203_v41, %v5174_v3  ;;  %v1763_v44 = vsel %vm1507_vm2, %v1370_v14, %v1635_v38  ;;  %v3231_v54 = vand.u32 2147483647, %v5765_v6  ;;  %v3233_v58 = vand.u32 2147483648, %v5765_v6  ;;  %vm3214_vm6 = vmor %vm3212_vm3, %vm3213_vm5 }
 0x2b3   : > { %v3210_v43 = vmul.f32 %v4499_v26, %v3209_v30  ;;  %v2736_v35 = vadd.f32 %v5728_v33, %v2619_v8  ;;  %2115 = vmatmul.bf16.gmra.mxu3 %v1842_v19  ;;  %v1843_v61 = vpack.c.bf16 %v1763_v44, %v1761_v15  ;;  %v2423_v62 = vmul.f32 0.2, %v2243_v25 }
 0x2b4   : > { %v1372_v51 = vpop.f32.mrf.mxu2  ;;  %v2076_v49 = vpop.f32.mrf.mxu3  ;;  %vm2359_vm7 = vcmp.gt.f32.partialorder %v2243_v25, 0.0  ;;  %vm3227_vm8 = vweird.f32 %v5765_v6  ;;  %v1636_v24 = vmul.f32 0.2, %v1204_v46  ;;  %vm5801_vm9 = vcmp.eq.f32.partialorder %v3231_v54, 8.507059e+37 }
 0x2b5   : > { %v4501_v57 = vpop.eup %4500  ;;  %v3211_v22 = vadd.f32 %v4499_v26, %v3210_v43  ;;  %v4326_v31 = vmul.f32 -1.442695, %v2736_v35  ;;  %v2077_v23 = vadd.f32 %v5493_v37, %v2076_v49  ;;  %2284 = vmatmul.bf16.gmra.mxu0 %v1843_v61  ;;  %v3234_v12 = vor.u32 1.1754944e-38, %v3233_v58  ;;  %v5840_v35 = vld [vmem:[%s6427_s7] ss:$0 sm:$0xff] }
 0x2b6   : > { %v4503_v1 = vpop.eup %4502  ;;  %v5791_v42 = vadd.f32 1.0, %v4501_v57  ;;  %vm1508_vm10 = vcmp.gt.f32.partialorder %v1204_v46, 0.0  ;;  %v1373_v52 = vadd.f32 %v1372_v51, %v5176_v5  ;;  %v2487_v56 = vsel %vm2359_vm7, %v2243_v25, %v2423_v62 }
 0x2b7   : > { %v3215_v2 = vsel %vm3214_vm6, %v4499_v26, %v3211_v22  ;;  %v3223_v11 = vmul.f32 %v4503_v1, %v5765_v6  ;;  %4504 = vpow2.f32 %v4326_v31  ;;  %v2246_v59 = vadd.f32 %v2245_v21, %v2077_v23 }
 0x2b8   : > { %v3220_v10 = vsel %vm5777_vm4, %v3219_v53, %v3215_v2  ;;  %4506 = vrcp.f32 %v5791_v42  ;;  %vm3228_vm11 = vweird.f32 %v4503_v1  ;;  %v2555_v20 = vmul.f32 %v5513_v63, %v2487_v56 }
 0x2b9   : > { %4014 = vst.msk [vmem:[%s5481_s27 + $0x58] sm:$0xff] %vm4002_vm13, %v3220_v10  ;;  %v3224_v18 = vsub.f32 1.0, %v3223_v11  ;;  %v1205_v13 = vpop.f32.mrf.mxu1  ;;  %v2247_v17 = vpop.f32.mrf.mxu0  ;;  %vm2360_vm1 = vcmp.gt.f32.partialorder %v2246_v59, 0.0  ;;  %v2424_v48 = vmul.f32 0.2, %v2246_v59  ;;  %v1764_v14 = vsel %vm1508_vm10, %v1204_v46, %v1636_v24  ;;  %vm3229_vm14 = vmor %vm3227_vm8, %vm3228_vm11 }
 0x2ba   : > { %v1206_v0 = vadd.f32 %v1205_v13, %v5174_v3  ;;  %v2621_v9 = vpop.xlane.xlu0 %2620  ;;  %2648 = vadd.xlane.f32.xlu2 %v2555_v20  ;;  %v3246_v63 = vand.u32 2147483647, %v5791_v42  ;;  %v3248_v29 = vand.u32 2147483648, %v5791_v42  ;;  %v1637_v41 = vmul.f32 0.2, %v1373_v52 }
 0x2bb   : > { %v3225_v50 = vmul.f32 %v4503_v1, %v3224_v18  ;;  %v2737_v36 = vadd.f32 %v5728_v33, %v2621_v9  ;;  %v2488_v6 = vsel %vm2360_vm1, %v2246_v59, %v2424_v48  ;;  %vm1509_vm15 = vcmp.gt.f32.partialorder %v1373_v52, 0.0 }
 0x2bc   : > { %v1638_v7 = vmul.f32 0.2, %v1206_v0  ;;  %v1374_v47 = vpop.f32.mrf.mxu2  ;;  %v2078_v39 = vpop.f32.mrf.mxu3  ;;  %vm1510_vm12 = vcmp.gt.f32.partialorder %v1206_v0, 0.0  ;;  %vm3242_vm2 = vweird.f32 %v5791_v42  ;;  %vm5833_vm3 = vcmp.eq.f32.partialorder %v3246_v63, 8.507059e+37 }
 0x2bd   : > { %v4505_v26 = vpop.eup %4504  ;;  %v3226_v16 = vadd.f32 %v4503_v1, %v3225_v50  ;;  %v4327_v28 = vmul.f32 -1.442695, %v2737_v36  ;;  %v1375_v27 = vadd.f32 %v1374_v47, %v5176_v5  ;;  %v2079_v55 = vadd.f32 %v5821_v32, %v2078_v39 }
 0x2be   : > { %v4507_v60 = vpop.eup %4506  ;;  %v5816_v45 = vadd.f32 1.0, %v4505_v26  ;;  %v1766_v21 = vsel %vm1510_vm12, %v1206_v0, %v1638_v7  ;;  %v2556_v53 = vmul.f32 %v5840_v35, %v2488_v6  ;;  %v3249_v44 = vor.u32 1.1754944e-38, %v3248_v29 }
 0x2bf   : > { %v3230_v34 = vsel %vm3229_vm14, %v4503_v1, %v3226_v16  ;;  %v3238_v30 = vmul.f32 %v4507_v60, %v5791_v42  ;;  %4508 = vpow2.f32 %v4327_v28  ;;  %vm1511_vm0 = vcmp.gt.f32.partialorder %v1375_v27, 0.0 }
 0x2c0   : > { %v3235_v38 = vsel %vm5801_vm9, %v3234_v12, %v3230_v34  ;;  %4510 = vrcp.f32 %v5816_v45  ;;  %v1639_v25 = vmul.f32 0.2, %v1375_v27  ;;  %v2248_v19 = vadd.f32 %v2247_v17, %v2079_v55  ;;  %2650 = vadd.xlane.f32.xlu0 %v2556_v53 }
 0x2c1   : > { %4015 = vst.msk [vmem:[%s5481_s27 + $0x60] sm:$0xff] %vm4002_vm13, %v3235_v38  ;;  %v3239_v4 = vsub.f32 1.0, %v3238_v30  ;;  %v1208_v40 = vpop.f32.mrf.mxu1  ;;  %v2250_v8 = vpop.f32.mrf.mxu0  ;;  %vm3243_vm4 = vweird.f32 %v4507_v60  ;;  %v1844_v49 = vpack.c.bf16 %v1766_v21, %v1764_v14  ;;  %v3261_v57 = vand.u32 2147483647, %v5816_v45 }
 0x2c2   : > { %v2623_v46 = vpop.xlane.xlu1 %2622  ;;  %v1765_v58 = vsel %vm1509_vm15, %v1373_v52, %v1637_v41  ;;  %v1767_v31 = vsel %vm1511_vm0, %v1375_v27, %v1639_v25  ;;  %v3263_v61 = vand.u32 2147483648, %v5816_v45  ;;  %v5849_v62 = vadd.f32 %v1208_v40, %v5174_v3  ;;  %vm3244_vm5 = vmor %vm3242_vm2, %vm3243_vm4 }
 0x2c3   : > { %v3240_v51 = vmul.f32 %v4507_v60, %v3239_v4  ;;  %v2738_v15 = vadd.f32 %v5728_v33, %v2623_v46  ;;  %2120 = vmatmul.bf16.gmra.mxu3 %v1844_v49  ;;  %v1845_v18 = vpack.c.bf16 %v1767_v31, %v1765_v58  ;;  %v2425_v37 = vmul.f32 0.2, %v2248_v19 }
 0x2c4   : > { %v1377_v22 = vpop.f32.mrf.mxu2  ;;  %v2081_v54 = vpop.f32.mrf.mxu3  ;;  %vm2361_vm6 = vcmp.gt.f32.partialorder %v2248_v19, 0.0  ;;  %vm3257_vm7 = vweird.f32 %v5816_v45  ;;  %vm5864_vm8 = vcmp.eq.f32.partialorder %v3261_v57, 8.507059e+37  ;;  %v3264_v59 = vor.u32 1.1754944e-38, %v3263_v61 }
 0x2c5   : > { %v4509_v1 = vpop.eup %4508  ;;  %v3241_v23 = vadd.f32 %v4507_v60, %v3240_v51  ;;  %v4328_v2 = vmul.f32 -1.442695, %v2738_v15  ;;  %v2082_v24 = vadd.f32 %v5821_v32, %v2081_v54  ;;  %2289 = vmatmul.bf16.gmra.mxu0 %v1845_v18  ;;  %v1640_v56 = vmul.f32 0.2, %v5849_v62 }
 0x2c6   : > { %v4511_v11 = vpop.eup %4510  ;;  %v5854_v10 = vadd.f32 1.0, %v4509_v1  ;;  %v1378_v50 = vadd.f32 %v1377_v22, %v5176_v5  ;;  %v2489_v36 = vsel %vm2361_vm6, %v2248_v19, %v2425_v37  ;;  %vm1512_vm10 = vcmp.gt.f32.partialorder %v5849_v62, 0.0 }
 0x2c7   : > { %v3245_v12 = vsel %vm3244_vm5, %v4507_v60, %v3241_v23  ;;  %v3253_v13 = vmul.f32 %v4511_v11, %v5816_v45  ;;  %4512 = vpow2.f32 %v4328_v2  ;;  %v2251_v20 = vadd.f32 %v2250_v8, %v2082_v24 }
 0x2c8   : > { %v3250_v17 = vsel %vm5833_vm3, %v3249_v44, %v3245_v12  ;;  %4514 = vrcp.f32 %v5854_v10  ;;  %vm3258_vm9 = vweird.f32 %v4511_v11  ;;  %v2557_v48 = vmul.f32 %v5840_v35, %v2489_v36 }
 0x2c9   : > { %4016 = vst.msk [vmem:[%s5481_s27 + $0x68] sm:$0xff] %vm4002_vm13, %v3250_v17  ;;  %v3254_v42 = vsub.f32 1.0, %v3253_v13  ;;  %v1210_v0 = vpop.f32.mrf.mxu1  ;;  %v2252_v9 = vpop.f32.mrf.mxu0  ;;  %vm2362_vm11 = vcmp.gt.f32.partialorder %v2251_v20, 0.0  ;;  %v2426_v27 = vmul.f32 0.2, %v2251_v20  ;;  %vm3259_vm12 = vmor %vm3257_vm7, %vm3258_vm9  ;;  %vm1513_vm14 = vcmp.gt.f32.partialorder %v1378_v50, 0.0 }
 0x2ca   : > { %v1211_v7 = vadd.f32 %v1210_v0, %v5174_v3  ;;  %v2625_v47 = vpop.xlane.xlu2 %2624  ;;  %2652 = vadd.xlane.f32.xlu1 %v2557_v48  ;;  %v1641_v6 = vmul.f32 0.2, %v1378_v50  ;;  %v3276_v40 = vand.u32 2147483647, %v5854_v10  ;;  %v1768_v53 = vsel %vm1512_vm10, %v5849_v62, %v1640_v56 }
 0x2cb   : > { %v3255_v39 = vmul.f32 %v4511_v11, %v3254_v42  ;;  %v2739_v14 = vadd.f32 %v5728_v33, %v2625_v47  ;;  %v2490_v4 = vsel %vm2362_vm11, %v2251_v20, %v2426_v27  ;;  %v3278_v51 = vand.u32 2147483648, %v5854_v10 }
 0x2cc   : > { %v1642_v26 = vmul.f32 0.2, %v1211_v7  ;;  %v1379_v16 = vpop.f32.mrf.mxu2  ;;  %v2083_v28 = vpop.f32.mrf.mxu3  ;;  %vm1514_vm1 = vcmp.gt.f32.partialorder %v1211_v7, 0.0  ;;  %v2558_v15 = vmul.f32 %v5840_v35, %v2490_v4  ;;  %v1769_v44 = vsel %vm1513_vm14, %v1378_v50, %v1641_v6 }
 0x2cd   : > { %v4513_v60 = vpop.eup %4512  ;;  %v3256_v63 = vadd.f32 %v4511_v11, %v3255_v39  ;;  %v4329_v29 = vmul.f32 -1.442695, %v2739_v14  ;;  %v1380_v55 = vadd.f32 %v1379_v16, %v5176_v5  ;;  %v2084_v38 = vadd.f32 %v5821_v32, %v2083_v28 }
 0x2ce   : > { %v4515_v34 = vpop.eup %4514  ;;  %v5878_v30 = vadd.f32 1.0, %v4513_v60  ;;  %v1770_v45 = vsel %vm1514_vm1, %v1211_v7, %v1642_v26  ;;  %2654 = vadd.xlane.f32.xlu2 %v2558_v15  ;;  %vm3272_vm2 = vweird.f32 %v5854_v10  ;;  %vm3277_vm4 = vcmp.eq.f32.partialorder %v3276_v40, 8.507059e+37 }
 0x2cf   : > { %v3260_v41 = vsel %vm3259_vm12, %v4511_v11, %v3256_v63  ;;  %v3268_v21 = vmul.f32 %v4515_v34, %v5854_v10  ;;  %4516 = vpow2.f32 %v4329_v29  ;;  %vm1515_vm15 = vcmp.gt.f32.partialorder %v1380_v55, 0.0 }
 0x2d0   : > { %v3265_v25 = vsel %vm5864_vm8, %v3264_v59, %v3260_v41  ;;  %4518 = vrcp.f32 %v5878_v30  ;;  %v1643_v43 = vmul.f32 0.2, %v1380_v55  ;;  %v2253_v49 = vadd.f32 %v2252_v9, %v2084_v38 }
 0x2d1   : > { %4017 = vst.msk [vmem:[%s5481_s27 + $0x70] sm:$0xff] %vm4002_vm13, %v3265_v25  ;;  %v3269_v8 = vsub.f32 1.0, %v3268_v21  ;;  %v1213_v19 = vpop.f32.mrf.mxu1  ;;  %v2255_v46 = vpop.f32.mrf.mxu0  ;;  %vm3273_vm0 = vweird.f32 %v4515_v34  ;;  %v1846_v22 = vpack.c.bf16 %v1770_v45, %v1768_v53  ;;  %v3291_v58 = vand.u32 2147483647, %v5878_v30 }
 0x2d2   : > { %v1771_v54 = vsel %vm1515_vm15, %v1380_v55, %v1643_v43  ;;  %v1214_v62 = vadd.f32 %v1213_v19, %v5174_v3  ;;  %vm3274_vm3 = vmor %vm3272_vm2, %vm3273_vm0  ;;  %v3279_v11 = vor.u32 1.1754944e-38, %v3278_v51  ;;  %v2427_v37 = vmul.f32 0.2, %v2253_v49  ;;  %v2627_v17 = vpop.xlane.xlu0 %2626 }
 0x2d3   : > { %v3270_v57 = vmul.f32 %v4515_v34, %v3269_v8  ;;  %v1847_v1 = vpack.c.bf16 %v1771_v54, %v1769_v44  ;;  %2125 = vmatmul.bf16.gmra.mxu3 %v1846_v22  ;;  %vm3287_vm5 = vweird.f32 %v5878_v30  ;;  %vm2363_vm6 = vcmp.gt.f32.partialorder %v2253_v49, 0.0 }
 0x2d4   : > { %v1382_v31 = vpop.f32.mrf.mxu2  ;;  %vm5903_vm7 = vcmp.eq.f32.partialorder %v3291_v58, 8.507059e+37  ;;  %v3293_v52 = vand.u32 2147483648, %v5878_v30  ;;  %vm1516_vm8 = vcmp.gt.f32.partialorder %v1214_v62, 0.0  ;;  %v1644_v56 = vmul.f32 0.2, %v1214_v62 }
 0x2d5   : > { %v4517_v23 = vpop.eup %4516  ;;  %v3271_v61 = vadd.f32 %v4515_v34, %v3270_v57  ;;  %v2086_v18 = vpop.f32.mrf.mxu3  ;;  %2294 = vmatmul.bf16.gmra.mxu0 %v1847_v1  ;;  %v2740_v0 = vadd.f32 %v5728_v33, %v2627_v17  ;;  %v1383_v50 = vadd.f32 %v1382_v31, %v5176_v5  ;;  %v2491_v36 = vsel %vm2363_vm6, %v2253_v49, %v2427_v37 }
 0x2d6   : > { %v4519_v2 = vpop.eup %4518  ;;  %v5899_v24 = vadd.f32 1.0, %v4517_v23  ;;  %v2087_v20 = vadd.f32 %v5821_v32, %v2086_v18  ;;  %v2559_v48 = vmul.f32 %v5840_v35, %v2491_v36  ;;  %v3294_v26 = vor.u32 1.1754944e-38, %v3293_v52 }
 0x2d7   : > { %v3275_v12 = vsel %vm3274_vm3, %v4515_v34, %v3271_v61  ;;  %v3283_v13 = vmul.f32 %v4519_v2, %v5878_v30  ;;  %vm3288_vm9 = vweird.f32 %v4519_v2  ;;  %v4330_v39 = vmul.f32 -1.442695, %v2740_v0 }
 0x2d8   : > { %v3280_v10 = vsel %vm3277_vm4, %v3279_v11, %v3275_v12  ;;  %4520 = vrcp.f32 %v5899_v24  ;;  %v2256_v16 = vadd.f32 %v2255_v46, %v2087_v20  ;;  %2656 = vadd.xlane.f32.xlu0 %v2559_v48  ;;  %v1772_v29 = vsel %vm1516_vm8, %v1214_v62, %v1644_v56  ;;  %vm3289_vm11 = vmor %vm3287_vm5, %vm3288_vm9 }
 0x2d9   : > { %4018 = vst.msk [vmem:[%s5481_s27 + $0x78] sm:$0xff] %vm4002_vm13, %v3280_v10  ;;  %v3284_v59 = vsub.f32 1.0, %v3283_v13  ;;  %v1215_v9 = vpop.f32.mrf.mxu1  ;;  %v2257_v14 = vpop.f32.mrf.mxu0  ;;  %4522 = vpow2.f32 %v4330_v39  ;;  %vm1517_vm1 = vcmp.gt.f32.partialorder %v1383_v50, 0.0  ;;  %v1645_v4 = vmul.f32 0.2, %v1383_v50 }
 0x2da   : > { %v1216_v7 = vadd.f32 %v1215_v9, %v5174_v3  ;;  %vm2364_vm12 = vcmp.gt.f32.partialorder %v2256_v16, 0.0  ;;  %v2428_v6 = vmul.f32 0.2, %v2256_v16  ;;  %v3306_v49 = vand.u32 2147483647, %v5899_v24 }
 0x2db   : > { %v3285_v47 = vmul.f32 %v4519_v2, %v3284_v59  ;;  %v3308_v15 = vand.u32 2147483648, %v5899_v24  ;;  %v1773_v31 = vsel %vm1517_vm1, %v1383_v50, %v1645_v4  ;;  %vm3302_vm2 = vweird.f32 %v5899_v24 }
 0x2dc   : > { %vm1518_vm10 = vcmp.gt.f32.partialorder %v1216_v7, 0.0  ;;  %v1646_v28 = vmul.f32 0.2, %v1216_v7  ;;  %v1384_v27 = vpop.f32.mrf.mxu2  ;;  %v2492_v30 = vsel %vm2364_vm12, %v2256_v16, %v2428_v6  ;;  %vm3307_vm4 = vcmp.eq.f32.partialorder %v3306_v49, 8.507059e+37 }
 0x2dd   : > { %v3286_v60 = vadd.f32 %v4519_v2, %v3285_v47  ;;  %v1385_v63 = vadd.f32 %v1384_v27, %v5176_v5  ;;  %v2088_v34 = vpop.f32.mrf.mxu3  ;;  %v2629_v40 = vpop.xlane.xlu1 %2628  ;;  %v2560_v53 = vmul.f32 %v5840_v35, %v2492_v30  ;;  %v3309_v18 = vor.u32 1.1754944e-38, %v3308_v15 }
 0x2de   : > { %v4521_v55 = vpop.eup %4520  ;;  %v1774_v38 = vsel %vm1518_vm10, %v1216_v7, %v1646_v28  ;;  %v2089_v8 = vadd.f32 %v5821_v32, %v2088_v34  ;;  %v2741_v19 = vadd.f32 %v5728_v33, %v2629_v40 }
 0x2df   : > { %v3290_v41 = vsel %vm3289_vm11, %v4519_v2, %v3286_v60  ;;  %v3298_v21 = vmul.f32 %v4521_v55, %v5899_v24  ;;  %vm1519_vm14 = vcmp.gt.f32.partialorder %v1385_v63, 0.0  ;;  %v1647_v45 = vmul.f32 0.2, %v1385_v63  ;;  %v4523_v22 = vpop.eup %4522  ;;  %2658 = vadd.xlane.f32.xlu1 %v2560_v53 }
 0x2e0   : > { %v3295_v25 = vsel %vm5903_vm7, %v3294_v26, %v3290_v41  ;;  %v1848_v51 = vpack.c.bf16 %v1774_v38, %v1772_v29  ;;  %v2258_v44 = vadd.f32 %v2257_v14, %v2089_v8  ;;  %vm3303_vm15 = vweird.f32 %v4521_v55 }
 0x2e1   : > { %4019 = vst.msk [vmem:[%s5481_s27 + $0x80] sm:$0xff] %vm4002_vm13, %v3295_v25  ;;  %v3299_v43 = vsub.f32 1.0, %v3298_v21  ;;  %v1218_v46 = vpop.f32.mrf.mxu1  ;;  %v1775_v57 = vsel %vm1519_vm14, %v1385_v63, %v1647_v45  ;;  %v4331_v58 = vmul.f32 -1.442695, %v2741_v19  ;;  %v5932_v1 = vadd.f32 1.0, %v4523_v22  ;;  %vm3304_vm3 = vmor %vm3302_vm2, %vm3303_vm15  ;;  %v2631_v13 = vpop.xlane.xlu2 %2630 }
 0x2e2   : > { %v1849_v61 = vpack.c.bf16 %v1775_v57, %v1773_v31  ;;  %vm2365_vm0 = vcmp.gt.f32.partialorder %v2258_v44, 0.0  ;;  %v2260_v2 = vpop.f32.mrf.mxu0  ;;  %v2429_v11 = vmul.f32 0.2, %v2258_v44  ;;  %v1219_v12 = vadd.f32 %v1218_v46, %v5174_v3 }
 0x2e3   : > { %v3300_v54 = vmul.f32 %v4521_v55, %v3299_v43  ;;  %4524 = vpow2.f32 %v4331_v58  ;;  %2130 = vmatmul.bf16.gmra.mxu3 %v1848_v51  ;;  %v2742_v42 = vadd.f32 %v5728_v33, %v2631_v13  ;;  %vm3317_vm6 = vweird.f32 %v5932_v1 }
 0x2e4   : > { %v1387_v23 = vpop.f32.mrf.mxu2  ;;  %4526 = vrcp.f32 %v5932_v1  ;;  %v2493_v17 = vsel %vm2365_vm0, %v2258_v44, %v2429_v11  ;;  %vm1520_vm5 = vcmp.gt.f32.partialorder %v1219_v12, 0.0  ;;  %v1648_v36 = vmul.f32 0.2, %v1219_v12 }
 0x2e5   : > { %v3301_v62 = vadd.f32 %v4521_v55, %v3300_v54  ;;  %2299 = vmatmul.bf16.gmra.mxu0 %v1849_v61  ;;  %v2561_v59 = vmul.f32 %v5840_v35, %v2493_v17  ;;  %v4332_v0 = vmul.f32 -1.442695, %v2742_v42  ;;  %v1388_v9 = vadd.f32 %v1387_v23, %v5176_v5 }
 0x2e6   : > { %v2091_v52 = vpop.f32.mrf.mxu3  ;;  %v3321_v16 = vand.u32 2147483647, %v5932_v1  ;;  %v3323_v34 = vand.u32 2147483648, %v5932_v1  ;;  %v1776_v41 = vsel %vm1520_vm5, %v1219_v12, %v1648_v36 }
 0x2e7   : > { %v3305_v37 = vsel %vm3304_vm3, %v4521_v55, %v3301_v62  ;;  %v2092_v24 = vadd.f32 %v5821_v32, %v2091_v52  ;;  %2660 = vadd.xlane.f32.xlu2 %v2561_v59  ;;  %4528 = vpow2.f32 %v4332_v0  ;;  %vm1521_vm8 = vcmp.gt.f32.partialorder %v1388_v9, 0.0 }
 0x2e8   : > { %v3310_v10 = vsel %vm3307_vm4, %v3309_v18, %v3305_v37  ;;  %v1649_v60 = vmul.f32 0.2, %v1388_v9  ;;  %vm3322_vm12 = vcmp.eq.f32.partialorder %v3321_v16, 8.507059e+37  ;;  %v3324_v22 = vor.u32 1.1754944e-38, %v3323_v34 }
 0x2e9   : > { %4020 = vst.msk [vmem:[%s5481_s27 + $0x88] sm:$0xff] %vm4002_vm13, %v3310_v10  ;;  %v1220_v56 = vpop.f32.mrf.mxu1  ;;  %v4525_v20 = vpop.eup %4524  ;;  %v2261_v7 = vadd.f32 %v2260_v2, %v2092_v24 }
 0x2ea   : > { %v1221_v50 = vadd.f32 %v1220_v56, %v5174_v3  ;;  %v4527_v47 = vpop.eup %4526  ;;  %v5945_v39 = vadd.f32 1.0, %v4525_v20  ;;  %v2262_v28 = vpop.f32.mrf.mxu0  ;;  %v1777_v53 = vsel %vm1521_vm8, %v1388_v9, %v1649_v60 }
 0x2eb   : > { %v3313_v26 = vmul.f32 %v4527_v47, %v5932_v1  ;;  %vm2366_vm9 = vcmp.gt.f32.partialorder %v2261_v7, 0.0  ;;  %v2430_v55 = vmul.f32 0.2, %v2261_v7  ;;  %vm3318_vm11 = vweird.f32 %v4527_v47 }
 0x2ec   : > { %v1650_v48 = vmul.f32 0.2, %v1221_v50  ;;  %v1389_v14 = vpop.f32.mrf.mxu2  ;;  %vm1522_vm7 = vcmp.gt.f32.partialorder %v1221_v50, 0.0  ;;  %4530 = vrcp.f32 %v5945_v39  ;;  %vm3319_vm1 = vmor %vm3317_vm6, %vm3318_vm11  ;;  %v3336_v54 = vand.u32 2147483647, %v5945_v39 }
 0x2ed   : > { %v1390_v27 = vadd.f32 %v1389_v14, %v5176_v5  ;;  %v3314_v63 = vsub.f32 1.0, %v3313_v26  ;;  %v2633_v6 = vpop.xlane.xlu0 %2632  ;;  %v2494_v45 = vsel %vm2366_vm9, %v2261_v7, %v2430_v55  ;;  %v4529_v30 = vpop.eup %4528  ;;  %v3338_v62 = vand.u32 2147483648, %v5945_v39 }
 0x2ee   : > { %v2093_v38 = vpop.f32.mrf.mxu3  ;;  %v1778_v21 = vsel %vm1522_vm7, %v1221_v50, %v1650_v48  ;;  %v2743_v25 = vadd.f32 %v5728_v33, %v2633_v6  ;;  %v2562_v43 = vmul.f32 %v5840_v35, %v2494_v45  ;;  %v5959_v49 = vadd.f32 1.0, %v4529_v30 }
 0x2ef   : > { %vm1523_vm10 = vcmp.gt.f32.partialorder %v1390_v27, 0.0  ;;  %v1651_v29 = vmul.f32 0.2, %v1390_v27  ;;  %v3315_v4 = vmul.f32 %v4527_v47, %v3314_v63  ;;  %v2094_v40 = vadd.f32 %v5821_v32, %v2093_v38 }
 0x2f0   : > { %v1850_v19 = vpack.c.bf16 %v1778_v21, %v1776_v41  ;;  %v4333_v15 = vmul.f32 -1.442695, %v2743_v25  ;;  %2662 = vadd.xlane.f32.xlu0 %v2562_v43  ;;  %4532 = vrcp.f32 %v5959_v49  ;;  %vm3332_vm15 = vweird.f32 %v5945_v39 }
 0x2f1   : > { %v1223_v8 = vpop.f32.mrf.mxu1  ;;  %v1779_v46 = vsel %vm1523_vm10, %v1390_v27, %v1651_v29  ;;  %v3316_v51 = vadd.f32 %v4527_v47, %v3315_v4  ;;  %v2263_v44 = vadd.f32 %v2262_v28, %v2094_v40  ;;  %v2635_v37 = vpop.xlane.xlu1 %2634  ;;  %vm5974_vm0 = vcmp.eq.f32.partialorder %v3336_v54, 8.507059e+37 }
 0x2f2   : > { %v4531_v57 = vpop.eup %4530  ;;  %v1851_v31 = vpack.c.bf16 %v1779_v46, %v1777_v53  ;;  %v2265_v2 = vpop.f32.mrf.mxu0  ;;  %v5969_v1 = vadd.f32 %v1223_v8, %v5174_v3  ;;  %4534 = vpow2.f32 %v4333_v15  ;;  %v2744_v13 = vadd.f32 %v5728_v33, %v2635_v37 }
 0x2f3   : > { %v3320_v23 = vsel %vm3319_vm1, %v4527_v47, %v3316_v51  ;;  %v3328_v61 = vmul.f32 %v4531_v57, %v5945_v39  ;;  %2135 = vmatmul.bf16.gmra.mxu3 %v1850_v19  ;;  %vm2367_vm14 = vcmp.gt.f32.partialorder %v2263_v44, 0.0  ;;  %v2431_v10 = vmul.f32 0.2, %v2263_v44 }
 0x2f4   : > { %v1392_v58 = vpop.f32.mrf.mxu2  ;;  %v3325_v11 = vsel %vm3322_vm12, %v3324_v22, %v3320_v23  ;;  %vm3333_vm2 = vweird.f32 %v4531_v57  ;;  %v3339_v52 = vor.u32 1.1754944e-38, %v3338_v62  ;;  %vm1524_vm3 = vcmp.gt.f32.partialorder %v5969_v1, 0.0 }
 0x2f5   : > { %4021 = vst.msk [vmem:[%s5481_s27 + $0x90] sm:$0xff] %vm4002_vm13, %v3325_v11  ;;  %v3329_v18 = vsub.f32 1.0, %v3328_v61  ;;  %2304 = vmatmul.bf16.gmra.mxu0 %v1851_v31  ;;  %v4334_v56 = vmul.f32 -1.442695, %v2744_v13  ;;  %v2495_v0 = vsel %vm2367_vm14, %v2263_v44, %v2431_v10  ;;  %v3353_v36 = vand.u32 2147483648, %v5959_v49  ;;  %vm3334_vm4 = vmor %vm3332_vm15, %vm3333_vm2 }
 0x2f6   : > { %v2096_v17 = vpop.f32.mrf.mxu3  ;;  %v4533_v50 = vpop.eup %4532  ;;  %v2563_v47 = vmul.f32 %v5840_v35, %v2495_v0  ;;  %v1393_v14 = vadd.f32 %v1392_v58, %v5176_v5  ;;  %vm3347_vm7 = vweird.f32 %v5959_v49  ;;  %v3351_v6 = vand.u32 2147483647, %v5959_v49  ;;  %v6028_v10 = vld [vmem:[#allocation2] ss:$0 sm:$0xff] }
 0x2f7   : > { %v3330_v42 = vmul.f32 %v4531_v57, %v3329_v18  ;;  %v2097_v24 = vadd.f32 %v5821_v32, %v2096_v17  ;;  %v3343_v48 = vmul.f32 %v4533_v50, %v5959_v49  ;;  %4536 = vpow2.f32 %v4334_v56 }
 0x2f8   : > { %v4535_v16 = vpop.eup %4534  ;;  %2664 = vadd.xlane.f32.xlu1 %v2563_v47  ;;  %v3354_v38 = vor.u32 1.1754944e-38, %v3353_v36  ;;  %v1652_v41 = vmul.f32 0.2, %v5969_v1  ;;  %vm3348_vm8 = vweird.f32 %v4533_v50  ;;  %v1653_v4 = vmul.f32 0.2, %v1393_v14 }
 0x2f9   : > { %v1225_v59 = vpop.f32.mrf.mxu1  ;;  %v3331_v20 = vadd.f32 %v4531_v57, %v3330_v42  ;;  %v2266_v7 = vadd.f32 %v2265_v2, %v2097_v24  ;;  %v3344_v29 = vsub.f32 1.0, %v3343_v48  ;;  %v5991_v55 = vadd.f32 1.0, %v4535_v16  ;;  %vm3349_vm10 = vmor %vm3347_vm7, %vm3348_vm8 }
 0x2fa   : > { %v1226_v9 = vadd.f32 %v1225_v59, %v5174_v3  ;;  %v2267_v60 = vpop.f32.mrf.mxu0  ;;  %vm1525_vm9 = vcmp.gt.f32.partialorder %v1393_v14, 0.0  ;;  %vm3352_vm1 = vcmp.eq.f32.partialorder %v3351_v6, 8.507059e+37 }
 0x2fb   : > { %v3335_v28 = vsel %vm3334_vm4, %v4531_v57, %v3331_v20  ;;  %vm2368_vm6 = vcmp.gt.f32.partialorder %v2266_v7, 0.0  ;;  %v2432_v34 = vmul.f32 0.2, %v2266_v7  ;;  %v3345_v21 = vmul.f32 %v4533_v50, %v3344_v29 }
 0x2fc   : > { %vm1526_vm5 = vcmp.gt.f32.partialorder %v1226_v9, 0.0  ;;  %v1394_v26 = vpop.f32.mrf.mxu2  ;;  %v1654_v27 = vmul.f32 0.2, %v1226_v9  ;;  %v3340_v39 = vsel %vm5974_vm0, %v3339_v52, %v3335_v28  ;;  %4538 = vrcp.f32 %v5991_v55 }
 0x2fd   : > { %v1395_v63 = vadd.f32 %v1394_v26, %v5176_v5  ;;  %4022 = vst.msk [vmem:[%s5481_s27 + $0x98] sm:$0xff] %vm4002_vm13, %v3340_v39  ;;  %v2637_v25 = vpop.xlane.xlu2 %2636  ;;  %v2496_v30 = vsel %vm2368_vm6, %v2266_v7, %v2432_v34  ;;  %v4537_v53 = vpop.eup %4536  ;;  %v3346_v46 = vadd.f32 %v4533_v50, %v3345_v21  ;;  %v1780_v57 = vsel %vm1524_vm3, %v5969_v1, %v1652_v41 }
 0x2fe   : > { %v2098_v40 = vpop.f32.mrf.mxu3  ;;  %v2745_v45 = vadd.f32 %v5728_v33, %v2637_v25  ;;  %v1782_v19 = vsel %vm1526_vm5, %v1226_v9, %v1654_v27  ;;  %v2564_v15 = vmul.f32 %v5840_v35, %v2496_v30  ;;  %v6007_v44 = vadd.f32 1.0, %v4537_v53 }
 0x2ff   : > { %v2099_v8 = vadd.f32 %v5821_v32, %v2098_v40  ;;  %v1655_v51 = vmul.f32 0.2, %v1395_v63  ;;  %vm1527_vm11 = vcmp.gt.f32.partialorder %v1395_v63, 0.0  ;;  %v3350_v22 = vsel %vm3349_vm10, %v4533_v50, %v3346_v46 }
 0x300   : > { %v4335_v33 = vmul.f32 -1.442695, %v2745_v45  ;;  %v3366_v54 = vand.u32 2147483647, %v5991_v55  ;;  %2666 = vadd.xlane.f32.xlu2 %v2564_v15  ;;  %v1852_v58 = vpack.c.bf16 %v1782_v19, %v1780_v57  ;;  %v3355_v23 = vsel %vm3352_vm1, %v3354_v38, %v3350_v22 }
 0x301   : > { %v1228_v43 = vpop.f32.mrf.mxu1  ;;  %4540 = vrcp.f32 %v6007_v44  ;;  %v2268_v49 = vadd.f32 %v2267_v60, %v2099_v8  ;;  %v1781_v62 = vsel %vm1525_vm9, %v1393_v14, %v1653_v4  ;;  %4023 = vst.msk [vmem:[%s5481_s27 + $0xa0] sm:$0xff] %vm4002_vm13, %v3355_v23  ;;  %v3368_v11 = vand.u32 2147483648, %v5991_v55  ;;  %v2639_v12 = vpop.xlane.xlu0 %2638 }
 0x302   : > { %v2270_v61 = vpop.f32.mrf.mxu0  ;;  %v4539_v2 = vpop.eup %4538  ;;  %4542 = vpow2.f32 %v4335_v33  ;;  %v6019_v1 = vadd.f32 %v1228_v43, %v5174_v3  ;;  %v1783_v18 = vsel %vm1527_vm11, %v1395_v63, %v1655_v51  ;;  %vm3362_vm12 = vweird.f32 %v5991_v55 }
 0x303   : > { %2140 = vmatmul.bf16.gmra.mxu3 %v1852_v58  ;;  %v3358_v37 = vmul.f32 %v4539_v2, %v5991_v55  ;;  %v1853_v13 = vpack.c.bf16 %v1783_v18, %v1781_v62  ;;  %vm6024_vm14 = vcmp.eq.f32.partialorder %v3366_v54, 8.507059e+37  ;;  %v2746_v42 = vadd.f32 %v6028_v10, %v2639_v12 }
 0x304   : > { %v1397_v31 = vpop.f32.mrf.mxu2  ;;  %vm2369_vm15 = vcmp.gt.f32.partialorder %v2268_v49, 0.0  ;;  %v2433_v56 = vmul.f32 0.2, %v2268_v49  ;;  %v3369_v9 = vor.u32 1.1754944e-38, %v3368_v11  ;;  %vm1528_vm0 = vcmp.gt.f32.partialorder %v6019_v1, 0.0 }
 0x305   : > { %v3359_v24 = vsub.f32 1.0, %v3358_v37  ;;  %2309 = vmatmul.bf16.gmra.mxu0 %v1853_v13  ;;  %v1656_v50 = vmul.f32 0.2, %v6019_v1  ;;  %v4336_v20 = vmul.f32 -1.442695, %v2746_v42  ;;  %vm3363_vm2 = vweird.f32 %v4539_v2 }
 0x306   : > { %v2101_v52 = vpop.f32.mrf.mxu3  ;;  %v2497_v48 = vsel %vm2369_vm15, %v2268_v49, %v2433_v56  ;;  %v3383_v63 = vand.u32 2147483648, %v6007_v44  ;;  %v1398_v29 = vadd.f32 %v1397_v31, %v5176_v5  ;;  %vm3364_vm3 = vmor %vm3362_vm12, %vm3363_vm2  ;;  %vm3377_vm4 = vweird.f32 %v6007_v44 }
 0x307   : > { %v2102_v59 = vadd.f32 %v5821_v32, %v2101_v52  ;;  %v4541_v36 = vpop.eup %4540  ;;  %v3360_v7 = vmul.f32 %v4539_v2, %v3359_v24  ;;  %4544 = vpow2.f32 %v4336_v20  ;;  %v2565_v16 = vmul.f32 %v5840_v35, %v2497_v48 }
 0x308   : > { %v4543_v14 = vpop.eup %4542  ;;  %v3373_v26 = vmul.f32 %v4541_v36, %v6007_v44  ;;  %v3381_v38 = vand.u32 2147483647, %v6007_v44  ;;  %vm3378_vm6 = vweird.f32 %v4541_v36  ;;  %v3384_v30 = vor.u32 1.1754944e-38, %v3383_v63 }
 0x309   : > { %v1230_v0 = vpop.f32.mrf.mxu1  ;;  %v2271_v47 = vadd.f32 %v2270_v61, %v2102_v59  ;;  %v3361_v60 = vadd.f32 %v4539_v2, %v3360_v7  ;;  %v6038_v39 = vadd.f32 1.0, %v4543_v14  ;;  %2668 = vadd.xlane.f32.xlu0 %v2565_v16  ;;  %v1657_v43 = vmul.f32 0.2, %v1398_v29  ;;  %vm3379_vm9 = vmor %vm3377_vm4, %vm3378_vm6 }
 0x30a   : > { %v1231_v28 = vadd.f32 %v1230_v0, %v5174_v3  ;;  %v2272_v34 = vpop.f32.mrf.mxu0  ;;  %v3374_v6 = vsub.f32 1.0, %v3373_v26  ;;  %vm1529_vm8 = vcmp.gt.f32.partialorder %v1398_v29, 0.0  ;;  %vm3382_vm10 = vcmp.eq.f32.partialorder %v3381_v38, 8.507059e+37 }
 0x30b   : > { %v2434_v41 = vmul.f32 0.2, %v2271_v47  ;;  %v3365_v21 = vsel %vm3364_vm3, %v4539_v2, %v3361_v60  ;;  %4546 = vrcp.f32 %v6038_v39  ;;  %vm2370_vm5 = vcmp.gt.f32.partialorder %v2271_v47, 0.0 }
 0x30c   : > { %v1399_v27 = vpop.f32.mrf.mxu2  ;;  %v3370_v25 = vsel %vm6024_vm14, %v3369_v9, %v3365_v21  ;;  %v3375_v40 = vmul.f32 %v4541_v36, %v3374_v6  ;;  %v1658_v55 = vmul.f32 0.2, %v1231_v28  ;;  %vm1530_vm7 = vcmp.gt.f32.partialorder %v1231_v28, 0.0 }
 0x30d   : > { %v1400_v4 = vadd.f32 %v1399_v27, %v5176_v5  ;;  %v2641_v45 = vpop.xlane.xlu1 %2640  ;;  %4024 = vst.msk [vmem:[%s5481_s27 + $0xa8] sm:$0xff] %vm4002_vm13, %v3370_v25  ;;  %v4545_v46 = vpop.eup %4544  ;;  %v2498_v33 = vsel %vm2370_vm5, %v2271_v47, %v2434_v41  ;;  %v1784_v44 = vsel %vm1528_vm0, %v6019_v1, %v1656_v50  ;;  %v1785_v11 = vsel %vm1529_vm8, %v1398_v29, %v1657_v43 }
 0x30e   : > { %v2103_v8 = vpop.f32.mrf.mxu3  ;;  %v2747_v19 = vadd.f32 %v6028_v10, %v2641_v45  ;;  %v3376_v51 = vadd.f32 %v4541_v36, %v3375_v40  ;;  %v6057_v57 = vadd.f32 1.0, %v4545_v46  ;;  %v2566_v58 = vmul.f32 %v5840_v35, %v2498_v33 }
 0x30f   : > { %v2104_v15 = vadd.f32 %v5821_v32, %v2103_v8  ;;  %v1659_v54 = vmul.f32 0.2, %v1400_v4  ;;  %vm1531_vm11 = vcmp.gt.f32.partialorder %v1400_v4, 0.0  ;;  %v1786_v23 = vsel %vm1530_vm7, %v1231_v28, %v1658_v55 }
 0x310   : > { %v4337_v22 = vmul.f32 -1.442695, %v2747_v19  ;;  %v3380_v31 = vsel %vm3379_vm9, %v4541_v36, %v3376_v51  ;;  %4548 = vrcp.f32 %v6057_v57  ;;  %2670 = vadd.xlane.f32.xlu1 %v2566_v58  ;;  %v3396_v37 = vand.u32 2147483647, %v6038_v39 }
 0x311   : > { %v1233_v53 = vpop.f32.mrf.mxu1  ;;  %v4547_v61 = vpop.eup %4546  ;;  %v3385_v62 = vsel %vm3382_vm10, %v3384_v30, %v3380_v31  ;;  %v2273_v12 = vadd.f32 %v2272_v34, %v2104_v15  ;;  %v3398_v13 = vand.u32 2147483648, %v6038_v39  ;;  %v1854_v42 = vpack.c.bf16 %v1786_v23, %v1784_v44 }
 0x312   : > { %v2275_v2 = vpop.f32.mrf.mxu0  ;;  %4025 = vst.msk [vmem:[%s5481_s27 + $0xb0] sm:$0xff] %vm4002_vm13, %v3385_v62  ;;  %v3388_v18 = vmul.f32 %v4547_v61, %v6038_v39  ;;  %4550 = vpow2.f32 %v4337_v22  ;;  %v6072_v17 = vadd.f32 %v1233_v53, %v5174_v3  ;;  %v2643_v52 = vpop.xlane.xlu2 %2642  ;;  %v1787_v1 = vsel %vm1531_vm11, %v1400_v4, %v1659_v54 }
 0x313   : > { %v2748_v59 = vadd.f32 %v6028_v10, %v2643_v52  ;;  %v1855_v0 = vpack.c.bf16 %v1787_v1, %v1785_v11  ;;  %vm3392_vm1 = vweird.f32 %v6038_v39  ;;  %vm3393_vm12 = vweird.f32 %v4547_v61  ;;  %2145 = vmatmul.bf16.gmra.mxu3 %v1854_v42 }
 0x314   : > { %v1402_v49 = vpop.f32.mrf.mxu2  ;;  %v3389_v24 = vsub.f32 1.0, %v3388_v18  ;;  %vm2371_vm14 = vcmp.gt.f32.partialorder %v2273_v12, 0.0  ;;  %v2435_v7 = vmul.f32 0.2, %v2273_v12  ;;  %vm6078_vm15 = vcmp.eq.f32.partialorder %v3396_v37, 8.507059e+37  ;;  %vm3394_vm2 = vmor %vm3392_vm1, %vm3393_vm12 }
 0x315   : > { %v4338_v36 = vmul.f32 -1.442695, %v2748_v59  ;;  %2314 = vmatmul.bf16.gmra.mxu0 %v1855_v0  ;;  %v3399_v14 = vor.u32 1.1754944e-38, %v3398_v13  ;;  %vm1532_vm0 = vcmp.gt.f32.partialorder %v6072_v17, 0.0  ;;  %v1660_v26 = vmul.f32 0.2, %v6072_v17 }
 0x316   : > { %v2106_v56 = vpop.f32.mrf.mxu3  ;;  %v3390_v20 = vmul.f32 %v4547_v61, %v3389_v24  ;;  %v4549_v47 = vpop.eup %4548  ;;  %v3411_v63 = vand.u32 2147483647, %v6057_v57  ;;  %v2499_v6 = vsel %vm2371_vm14, %v2273_v12, %v2435_v7  ;;  %v3413_v25 = vand.u32 2147483648, %v6057_v57 }
 0x317   : > { %v2107_v9 = vadd.f32 %v5821_v32, %v2106_v56  ;;  %v3403_v27 = vmul.f32 %v4549_v47, %v6057_v57  ;;  %4552 = vpow2.f32 %v4338_v36  ;;  %v2567_v40 = vmul.f32 %v5840_v35, %v2499_v6 }
 0x318   : > { %v4551_v16 = vpop.eup %4550  ;;  %v3391_v28 = vadd.f32 %v4547_v61, %v3390_v20  ;;  %vm3407_vm3 = vweird.f32 %v6057_v57  ;;  %v1403_v55 = vadd.f32 %v1402_v49, %v5176_v5  ;;  %vm3408_vm4 = vweird.f32 %v4549_v47 }
 0x319   : > { %v1235_v50 = vpop.f32.mrf.mxu1  ;;  %v6090_v29 = vadd.f32 1.0, %v4551_v16  ;;  %v2276_v34 = vadd.f32 %v2275_v2, %v2107_v9  ;;  %v3404_v4 = vsub.f32 1.0, %v3403_v27  ;;  %2672 = vadd.xlane.f32.xlu2 %v2567_v40  ;;  %vm6103_vm5 = vcmp.eq.f32.partialorder %v3411_v63, 8.507059e+37  ;;  %vm3409_vm8 = vmor %vm3407_vm3, %vm3408_vm4 }
 0x31a   : > { %v1236_v60 = vadd.f32 %v1235_v50, %v5174_v3  ;;  %v2277_v38 = vpop.f32.mrf.mxu0  ;;  %v3395_v21 = vsel %vm3394_vm2, %v4547_v61, %v3391_v28  ;;  %v3414_v22 = vor.u32 1.1754944e-38, %v3413_v25  ;;  %vm1533_vm9 = vcmp.gt.f32.partialorder %v1403_v55, 0.0  ;;  %v6147_v25 = vld [vmem:[%s6427_s7] ss:$0 sm:$0xff] }
 0x31b   : > { %v3400_v39 = vsel %vm6078_vm15, %v3399_v14, %v3395_v21  ;;  %4554 = vrcp.f32 %v6090_v29  ;;  %v3405_v45 = vmul.f32 %v4549_v47, %v3404_v4  ;;  %vm2372_vm7 = vcmp.gt.f32.partialorder %v2276_v34, 0.0 }
 0x31c   : > { %v1404_v41 = vpop.f32.mrf.mxu2  ;;  %4026 = vst.msk [vmem:[%s5481_s27 + $0xb8] sm:$0xff] %vm4002_vm13, %v3400_v39  ;;  %v1662_v8 = vmul.f32 0.2, %v1236_v60  ;;  %vm1534_vm6 = vcmp.gt.f32.partialorder %v1236_v60, 0.0  ;;  %v2436_v58 = vmul.f32 0.2, %v2276_v34  ;;  %v1788_v12 = vsel %vm1532_vm0, %v6072_v17, %v1660_v26 }
 0x31d   : > { %v2645_v30 = vpop.xlane.xlu0 %2644  ;;  %v1405_v43 = vadd.f32 %v1404_v41, %v5176_v5  ;;  %v4553_v15 = vpop.eup %4552  ;;  %v3406_v33 = vadd.f32 %v4549_v47, %v3405_v45  ;;  %v1661_v23 = vmul.f32 0.2, %v1403_v55  ;;  %v3426_v59 = vand.u32 2147483647, %v6090_v29 }
 0x31e   : > { %v2108_v19 = vpop.f32.mrf.mxu3  ;;  %v2749_v46 = vadd.f32 %v6028_v10, %v2645_v30  ;;  %v6112_v31 = vadd.f32 1.0, %v4553_v15  ;;  %v2500_v44 = vsel %vm2372_vm7, %v2276_v34, %v2436_v58  ;;  %v1790_v2 = vsel %vm1534_vm6, %v1236_v60, %v1662_v8 }
 0x31f   : > { %v2109_v54 = vadd.f32 %v5821_v32, %v2108_v19  ;;  %v3410_v61 = vsel %vm3409_vm8, %v4549_v47, %v3406_v33  ;;  %v1663_v62 = vmul.f32 0.2, %v1405_v43  ;;  %vm1535_vm10 = vcmp.gt.f32.partialorder %v1405_v43, 0.0 }
 0x320   : > { %v4339_v49 = vmul.f32 -1.442695, %v2749_v46  ;;  %v3415_v32 = vsel %vm6103_vm5, %v3414_v22, %v3410_v61  ;;  %4556 = vrcp.f32 %v6112_v31  ;;  %v2568_v13 = vmul.f32 %v5840_v35, %v2500_v44  ;;  %v6132_v35 = vld [vmem:[%s6426_s6] ss:$0 sm:$0xff] }
 0x321   : > { %v1238_v51 = vpop.f32.mrf.mxu1  ;;  %v4555_v11 = vpop.eup %4554  ;;  %4027 = vst.msk [vmem:[%s5481_s27 + $0xc0] sm:$0xff] %vm4002_vm13, %v3415_v32  ;;  %v2278_v37 = vadd.f32 %v2277_v38, %v2109_v54  ;;  %v1856_v42 = vpack.c.bf16 %v1790_v2, %v1788_v12  ;;  %v1789_v1 = vsel %vm1533_vm9, %v1403_v55, %v1661_v23  ;;  %v1791_v9 = vsel %vm1535_vm10, %v1405_v43, %v1663_v62 }
 0x322   : > { %v2280_v18 = vpop.f32.mrf.mxu0  ;;  %v3418_v57 = vmul.f32 %v4555_v11, %v6090_v29  ;;  %4558 = vpow2.f32 %v4339_v49  ;;  %vm3423_vm11 = vweird.f32 %v4555_v11  ;;  %v3428_v50 = vand.u32 2147483648, %v6090_v29  ;;  %2674 = vadd.xlane.f32.xlu0 %v2568_v13 }
 0x323   : > { %v2647_v52 = vpop.xlane.xlu1 %2646  ;;  %2150 = vmatmul.bf16.gmra.mxu3 %v1856_v42  ;;  %v1857_v20 = vpack.c.bf16 %v1791_v9, %v1789_v1  ;;  %vm2373_vm1 = vcmp.gt.f32.partialorder %v2278_v37, 0.0  ;;  %v2437_v48 = vmul.f32 0.2, %v2278_v37  ;;  %vm3422_vm12 = vweird.f32 %v6090_v29 }
 0x324   : > { %v3419_v24 = vsub.f32 1.0, %v3418_v57  ;;  %v2750_v56 = vadd.f32 %v6028_v10, %v2647_v52  ;;  %v1239_v26 = vadd.f32 %v1238_v51, %v5174_v3  ;;  %vm3424_vm14 = vmor %vm3422_vm12, %vm3423_vm11  ;;  %v3429_v63 = vor.u32 1.1754944e-38, %v3428_v50  ;;  %v6142_v4 = vpop.f32.mrf.mxu2 }
 0x325   : > { %2319 = vmatmul.bf16.gmra.mxu0 %v1857_v20  ;;  %v2501_v38 = vsel %vm2373_vm1, %v2278_v37, %v2437_v48  ;;  %vm3427_vm15 = vcmp.eq.f32.partialorder %v3426_v59, 8.507059e+37  ;;  %v3443_v39 = vand.u32 2147483648, %v6112_v31  ;;  %v3441_v45 = vand.u32 2147483647, %v6112_v31 }
 0x326   : > { %v2111_v0 = vpop.f32.mrf.mxu3  ;;  %v3420_v7 = vmul.f32 %v4555_v11, %v3419_v24  ;;  %v4340_v47 = vmul.f32 -1.442695, %v2750_v56  ;;  %v4557_v14 = vpop.eup %4556  ;;  %vm1536_vm0 = vcmp.gt.f32.partialorder %v1239_v26, 0.0  ;;  %vm3437_vm5 = vweird.f32 %v6112_v31 }
 0x327   : > { %v2112_v17 = vadd.f32 %v6132_v35, %v2111_v0  ;;  %v3433_v27 = vmul.f32 %v4557_v14, %v6112_v31  ;;  %vm3438_vm2 = vweird.f32 %v4557_v14  ;;  %v1664_v15 = vmul.f32 0.2, %v1239_v26 }
 0x328   : > { %v4559_v16 = vpop.eup %4558  ;;  %v3421_v28 = vadd.f32 %v4555_v11, %v3420_v7  ;;  %4560 = vpow2.f32 %v4340_v47  ;;  %vm3439_vm6 = vmor %vm3437_vm5, %vm3438_vm2  ;;  %v3444_v22 = vor.u32 1.1754944e-38, %v3443_v39  ;;  %vm3442_vm7 = vcmp.eq.f32.partialorder %v3441_v45, 8.507059e+37 }
 0x329   : > { %v1240_v36 = vpop.f32.mrf.mxu1  ;;  %v6140_v34 = vadd.f32 1.0, %v4559_v16  ;;  %v2281_v6 = vadd.f32 %v2280_v18, %v2112_v17  ;;  %v3434_v21 = vsub.f32 1.0, %v3433_v27  ;;  %v1792_v32 = vsel %vm1536_vm0, %v1239_v26, %v1664_v15 }
 0x32a   : > { %v1241_v60 = vadd.f32 %v1240_v36, %v5174_v3  ;;  %v2282_v41 = vpop.f32.mrf.mxu0  ;;  %v3425_v29 = vsel %vm3424_vm14, %v4555_v11, %v3421_v28  ;;  %v2569_v3 = vmul.f32 %v6147_v25, %v2501_v38 }
 0x32b   : > { %v3430_v40 = vsel %vm3427_vm15, %v3429_v63, %v3425_v29  ;;  %4562 = vrcp.f32 %v6140_v34  ;;  %v3435_v55 = vmul.f32 %v4557_v14, %v3434_v21  ;;  %vm2374_vm4 = vcmp.gt.f32.partialorder %v2281_v6, 0.0 }
 0x32c   : > { %4028 = vst.msk [vmem:[%s5481_s27 + $0xc8] sm:$0xff] %vm4002_vm13, %v3430_v40  ;;  %2676 = vadd.xlane.f32.xlu1 %v2569_v3  ;;  %v1666_v8 = vmul.f32 0.2, %v1241_v60  ;;  %vm1538_vm3 = vcmp.gt.f32.partialorder %v1241_v60, 0.0  ;;  %v2438_v33 = vmul.f32 0.2, %v2281_v6  ;;  %v1409_v13 = vpop.f32.mrf.mxu2  ;;  %vm3452_vm10 = vweird.f32 %v6140_v34 }
 0x32d   : > { %v2649_v30 = vpop.xlane.xlu2 %2648  ;;  %v3436_v51 = vadd.f32 %v4557_v14, %v3435_v55  ;;  %v3456_v24 = vand.u32 2147483647, %v6140_v34  ;;  %v3458_v59 = vand.u32 2147483648, %v6140_v34  ;;  %v1410_v20 = vadd.f32 %v1409_v13, %v5176_v5 }
 0x32e   : > { %v2113_v43 = vpop.f32.mrf.mxu3  ;;  %v2751_v19 = vadd.f32 %v6028_v10, %v2649_v30  ;;  %v4561_v46 = vpop.eup %4560  ;;  %v2502_v61 = vsel %vm2374_vm4, %v2281_v6, %v2438_v33  ;;  %v1794_v62 = vsel %vm1538_vm3, %v1241_v60, %v1666_v8  ;;  %v1408_v6 = vadd.f32 %v6142_v4, %v5176_v5 }
 0x32f   : > { %v2114_v53 = vadd.f32 %v6132_v35, %v2113_v43  ;;  %v6159_v54 = vadd.f32 1.0, %v4561_v46  ;;  %v3440_v49 = vsel %vm3439_vm6, %v4557_v14, %v3436_v51  ;;  %v2570_v18 = vmul.f32 %v6147_v25, %v2502_v61 }
 0x330   : > { %v4341_v58 = vmul.f32 -1.442695, %v2751_v19  ;;  %v3445_v2 = vsel %vm3442_vm7, %v3444_v22, %v3440_v49  ;;  %v1858_v57 = vpack.c.bf16 %v1794_v62, %v1792_v32  ;;  %v3459_v26 = vor.u32 1.1754944e-38, %v3458_v59 }
 0x331   : > { %v2283_v23 = vadd.f32 %v2282_v41, %v2114_v53  ;;  %v4563_v44 = vpop.eup %4562  ;;  %4564 = vrcp.f32 %v6159_v54  ;;  %4029 = vst.msk [vmem:[%s5481_s27 + $0xd0] sm:$0xff] %vm4002_vm13, %v3445_v2  ;;  %2678 = vadd.xlane.f32.xlu2 %v2570_v18  ;;  %vm3457_vm12 = vcmp.eq.f32.partialorder %v3456_v24, 8.507059e+37  ;;  %v1667_v41 = vmul.f32 0.2, %v1410_v20 }
 0x332   : > { %v2285_v31 = vpop.f32.mrf.mxu0  ;;  %v3448_v11 = vmul.f32 %v4563_v44, %v6140_v34  ;;  %4566 = vpow2.f32 %v4341_v58  ;;  %vm3453_vm9 = vweird.f32 %v4563_v44  ;;  %v3473_v34 = vand.u32 2147483648, %v6159_v54 }
 0x333   : > { %v2651_v37 = vpop.xlane.xlu0 %2650  ;;  %vm2375_vm8 = vcmp.gt.f32.partialorder %v2283_v23, 0.0  ;;  %v2439_v1 = vmul.f32 0.2, %v2283_v23  ;;  %2155 = vmatmul.bf16.gmra.mxu3 %v1858_v57  ;;  %vm3454_vm11 = vmor %vm3452_vm10, %vm3453_vm9  ;;  %v3471_v21 = vand.u32 2147483647, %v6159_v54  ;;  %vm1539_vm15 = vcmp.gt.f32.partialorder %v1410_v20, 0.0 }
 0x334   : > { %v3449_v12 = vsub.f32 1.0, %v3448_v11  ;;  %v2752_v42 = vadd.f32 %v6028_v10, %v2651_v37  ;;  %vm3467_vm0 = vweird.f32 %v6159_v54  ;;  %vm1537_vm2 = vcmp.gt.f32.partialorder %v1408_v6, 0.0 }
 0x335   : > { %v2503_v50 = vsel %vm2375_vm8, %v2283_v23, %v2439_v1  ;;  %v1665_v30 = vmul.f32 0.2, %v1408_v6  ;;  %v3474_v43 = vor.u32 1.1754944e-38, %v3473_v34  ;;  %vm3472_vm4 = vcmp.eq.f32.partialorder %v3471_v21, 8.507059e+37 }
 0x336   : > { %v2116_v52 = vpop.f32.mrf.mxu3  ;;  %v3450_v0 = vmul.f32 %v4563_v44, %v3449_v12  ;;  %v4342_v9 = vmul.f32 -1.442695, %v2752_v42  ;;  %v2571_v7 = vmul.f32 %v6147_v25, %v2503_v50  ;;  %v1795_v15 = vsel %vm1539_vm15, %v1410_v20, %v1667_v41 }
 0x337   : > { %v2117_v56 = vadd.f32 %v6132_v35, %v2116_v52  ;;  %v4565_v17 = vpop.eup %4564 }
 0x338   : > { %v4567_v47 = vpop.eup %4566  ;;  %v3451_v48 = vadd.f32 %v4563_v44, %v3450_v0  ;;  %v3463_v14 = vmul.f32 %v4565_v17, %v6159_v54  ;;  %4568 = vpow2.f32 %v4342_v9  ;;  %2680 = vadd.xlane.f32.xlu0 %v2571_v7  ;;  %vm3468_vm14 = vweird.f32 %v4565_v17 }
 0x339   : > { %v2286_v36 = vadd.f32 %v2285_v31, %v2117_v56  ;;  %v6176_v16 = vadd.f32 1.0, %v4567_v47  ;;  %vm3469_vm3 = vmor %vm3467_vm0, %vm3468_vm14  ;;  %v1793_v54 = vsel %vm1537_vm2, %v1408_v6, %v1665_v30 }
 0x33a   : > { %v2287_v28 = vpop.f32.mrf.mxu0  ;;  %v3455_v60 = vsel %vm3454_vm11, %v4563_v44, %v3451_v48  ;;  %v3464_v63 = vsub.f32 1.0, %v3463_v14  ;;  %v1859_v49 = vpack.c.bf16 %v1795_v15, %v1793_v54 }
 0x33b   : > { %vm2376_vm1 = vcmp.gt.f32.partialorder %v2286_v36, 0.0  ;;  %v2440_v27 = vmul.f32 0.2, %v2286_v36  ;;  %v3460_v38 = vsel %vm3457_vm12, %v3459_v26, %v3455_v60  ;;  %4570 = vrcp.f32 %v6176_v16 }
 0x33c   : > { %4030 = vst.msk [vmem:[%s5481_s27 + $0xd8] sm:$0xff] %vm4002_vm13, %v3460_v38  ;;  %v3465_v29 = vmul.f32 %v4565_v17, %v3464_v63  ;;  %v3486_v11 = vand.u32 2147483647, %v6176_v16  ;;  %v3488_v32 = vand.u32 2147483648, %v6176_v16  ;;  %vm3482_vm7 = vweird.f32 %v6176_v16 }
 0x33d   : > { %v2653_v3 = vpop.xlane.xlu1 %2652  ;;  %v2504_v39 = vsel %vm2376_vm1, %v2286_v36, %v2440_v27 }
 0x33e   : > { %v2118_v40 = vpop.f32.mrf.mxu3  ;;  %v2753_v55 = vadd.f32 %v6028_v10, %v2653_v3  ;;  %v2572_v4 = vmul.f32 %v6147_v25, %v2504_v39  ;;  %v4569_v45 = vpop.eup %4568  ;;  %v3466_v8 = vadd.f32 %v4565_v17, %v3465_v29  ;;  %v3489_v56 = vor.u32 1.1754944e-38, %v3488_v32 }
 0x33f   : > { %v2119_v5 = vadd.f32 %v6132_v35, %v2118_v40  ;;  %v6190_v19 = vadd.f32 1.0, %v4569_v45  ;;  %vm3487_vm10 = vcmp.eq.f32.partialorder %v3486_v11, 8.507059e+37 }
 0x340   : > { %v4343_v53 = vmul.f32 -1.442695, %v2753_v55  ;;  %2682 = vadd.xlane.f32.xlu1 %v2572_v4  ;;  %v3470_v51 = vsel %vm3469_vm3, %v4565_v17, %v3466_v8 }
 0x341   : > { %v2288_v46 = vadd.f32 %v2287_v28, %v2119_v5  ;;  %v4571_v33 = vpop.eup %4570  ;;  %v3475_v22 = vsel %vm3472_vm4, %v3474_v43, %v3470_v51  ;;  %4572 = vrcp.f32 %v6190_v19  ;;  %v2655_v61 = vpop.xlane.xlu2 %2654  ;;  %v3503_v7 = vand.u32 2147483648, %v6190_v19 }
 0x342   : > { %v2290_v58 = vpop.f32.mrf.mxu0  ;;  %4031 = vst.msk [vmem:[%s5481_s27 + $0xe0] sm:$0xff] %vm4002_vm13, %v3475_v22  ;;  %v3478_v23 = vmul.f32 %v4571_v33, %v6176_v16  ;;  %4574 = vpow2.f32 %v4343_v53  ;;  %v2754_v2 = vadd.f32 %v6028_v10, %v2655_v61  ;;  %vm3483_vm6 = vweird.f32 %v4571_v33 }
 0x343   : > { %vm2377_vm5 = vcmp.gt.f32.partialorder %v2288_v46, 0.0  ;;  %v2441_v62 = vmul.f32 0.2, %v2288_v46  ;;  %2324 = vmatmul.bf16.vlgmr.msra.gmra.mxu3 %v1859_v49  ;;  %vm3484_vm8 = vmor %vm3482_vm7, %vm3483_vm6  ;;  %v3501_v48 = vand.u32 2147483647, %v6190_v19  ;;  %vm3497_vm1 = vweird.f32 %v6190_v19 }
 0x344   : > { %v3479_v44 = vsub.f32 1.0, %v3478_v23  ;;  %v4344_v12 = vmul.f32 -1.442695, %v2754_v2  ;;  %v3504_v38 = vor.u32 1.1754944e-38, %v3503_v7 }
 0x345   : > { %v2505_v57 = vsel %vm2377_vm5, %v2288_v46, %v2441_v62  ;;  %vm3502_vm14 = vcmp.eq.f32.partialorder %v3501_v48, 8.507059e+37 }
 0x346   : > { %v2121_v31 = vpop.f32.mrf.mxu3  ;;  %v3480_v37 = vmul.f32 %v4571_v33, %v3479_v44  ;;  %v2573_v13 = vmul.f32 %v6147_v25, %v2505_v57  ;;  %4576 = vpow2.f32 %v4344_v12 }
 0x347   : > { %v2122_v18 = vadd.f32 %v6132_v35, %v2121_v31  ;;  %v4573_v42 = vpop.eup %4572 }
 0x348   : > { %v4575_v1 = vpop.eup %4574  ;;  %v3481_v24 = vadd.f32 %v4571_v33, %v3480_v37  ;;  %v3493_v59 = vmul.f32 %v4573_v42, %v6190_v19  ;;  %2684 = vadd.xlane.f32.xlu2 %v2573_v13  ;;  %vm3498_vm11 = vweird.f32 %v4573_v42 }
 0x349   : > { %v2291_v52 = vadd.f32 %v2290_v58, %v2122_v18  ;;  %v6205_v0 = vadd.f32 1.0, %v4575_v1  ;;  %vm3499_vm12 = vmor %vm3497_vm1, %vm3498_vm11 }
 0x34a   : > { %v2292_v9 = vpop.f32.mrf.mxu0  ;;  %v3485_v17 = vsel %vm3484_vm8, %v4571_v33, %v3481_v24  ;;  %v3494_v20 = vsub.f32 1.0, %v3493_v59 }
 0x34b   : > { %vm2378_vm9 = vcmp.gt.f32.partialorder %v2291_v52, 0.0  ;;  %v2442_v50 = vmul.f32 0.2, %v2291_v52  ;;  %v3490_v36 = vsel %vm3487_vm10, %v3489_v56, %v3485_v17  ;;  %4578 = vrcp.f32 %v6205_v0  ;;  %v2657_v14 = vpop.xlane.xlu0 %2656 }
 0x34c   : > { %4032 = vst.msk [vmem:[%s5481_s27 + $0xe8] sm:$0xff] %vm4002_vm13, %v3490_v36  ;;  %v3495_v47 = vmul.f32 %v4573_v42, %v3494_v20  ;;  %v2755_v28 = vadd.f32 %v6028_v10, %v2657_v14  ;;  %v4577_v63 = vpop.eup %4576  ;;  %v3518_v43 = vand.u32 2147483648, %v6205_v0  ;;  %v3516_v15 = vand.u32 2147483647, %v6205_v0 }
 0x34d   : > { %v2506_v16 = vsel %vm2378_vm9, %v2291_v52, %v2442_v50  ;;  %v6216_v34 = vadd.f32 1.0, %v4577_v63  ;;  %vm3512_vm2 = vweird.f32 %v6205_v0 }
 0x34e   : > { %v2123_v26 = vpop.f32.mrf.mxu3  ;;  %v2574_v60 = vmul.f32 %v6147_v25, %v2506_v16  ;;  %v3496_v6 = vadd.f32 %v4573_v42, %v3495_v47  ;;  %v4345_v41 = vmul.f32 -1.442695, %v2755_v28  ;;  %v3519_v61 = vor.u32 1.1754944e-38, %v3518_v43 }
 0x34f   : > { %v2124_v27 = vadd.f32 %v6132_v35, %v2123_v26  ;;  %4580 = vrcp.f32 %v6216_v34  ;;  %vm3517_vm5 = vcmp.eq.f32.partialorder %v3516_v15, 8.507059e+37  ;;  %v3531_v57 = vand.u32 2147483647, %v6216_v34 }
 0x350   : > { %2686 = vadd.xlane.f32.xlu0 %v2574_v60  ;;  %v3500_v21 = vsel %vm3499_vm12, %v4573_v42, %v3496_v6  ;;  %4582 = vpow2.f32 %v4345_v41  ;;  %v3533_v37 = vand.u32 2147483648, %v6216_v34  ;;  %vm3527_vm7 = vweird.f32 %v6216_v34 }
 0x351   : > { %v2293_v29 = vadd.f32 %v2292_v9, %v2124_v27  ;;  %v4579_v3 = vpop.eup %4578  ;;  %v3505_v40 = vsel %vm3502_vm14, %v3504_v38, %v3500_v21  ;;  %vm3532_vm9 = vcmp.eq.f32.partialorder %v3531_v57, 8.507059e+37 }
 0x352   : > { %v2295_v39 = vpop.f32.mrf.mxu0  ;;  %4033 = vst.msk [vmem:[%s5481_s27 + $0xf0] sm:$0xff] %vm4002_vm13, %v3505_v40  ;;  %v3508_v55 = vmul.f32 %v4579_v3, %v6205_v0  ;;  %v2659_v5 = vpop.xlane.xlu1 %2658  ;;  %vm3513_vm0 = vweird.f32 %v4579_v3  ;;  %v3534_v50 = vor.u32 1.1754944e-38, %v3533_v37 }
 0x353   : > { %v2756_v4 = vadd.f32 %v6028_v10, %v2659_v5  ;;  %vm2379_vm15 = vcmp.gt.f32.partialorder %v2293_v29, 0.0  ;;  %v2443_v45 = vmul.f32 0.2, %v2293_v29  ;;  %vm3514_vm3 = vmor %vm3512_vm2, %vm3513_vm0 }
 0x354   : > { %v3509_v8 = vsub.f32 1.0, %v3508_v55 }
 0x355   : > { %v4346_v19 = vmul.f32 -1.442695, %v2756_v4  ;;  %v2507_v46 = vsel %vm2379_vm15, %v2293_v29, %v2443_v45  ;;  %v4581_v22 = vpop.eup %4580 }
 0x356   : > { %v2126_v30 = vpop.f32.mrf.mxu3  ;;  %v3510_v51 = vmul.f32 %v4579_v3, %v3509_v8  ;;  %v2575_v33 = vmul.f32 %v6147_v25, %v2507_v46  ;;  %v4583_v54 = vpop.eup %4582  ;;  %v3523_v49 = vmul.f32 %v4581_v22, %v6216_v34  ;;  %vm3528_vm6 = vweird.f32 %v4581_v22 }
 0x357   : > { %v2127_v53 = vadd.f32 %v6132_v35, %v2126_v30  ;;  %4584 = vpow2.f32 %v4346_v19  ;;  %v6229_v62 = vadd.f32 1.0, %v4583_v54  ;;  %vm3529_vm8 = vmor %vm3527_vm7, %vm3528_vm6 }
 0x358   : > { %v3511_v23 = vadd.f32 %v4579_v3, %v3510_v51  ;;  %2688 = vadd.xlane.f32.xlu1 %v2575_v33  ;;  %v3524_v11 = vsub.f32 1.0, %v3523_v49 }
 0x359   : > { %v2296_v58 = vadd.f32 %v2295_v39, %v2127_v53  ;;  %4586 = vrcp.f32 %v6229_v62  ;;  %v3546_v28 = vand.u32 2147483647, %v6229_v62  ;;  %v3548_v6 = vand.u32 2147483648, %v6229_v62 }
 0x35a   : > { %v2297_v44 = vpop.f32.mrf.mxu0  ;;  %v3515_v31 = vsel %vm3514_vm3, %v4579_v3, %v3511_v23  ;;  %v2661_v32 = vpop.xlane.xlu2 %2660  ;;  %v3525_v12 = vmul.f32 %v4581_v22, %v3524_v11  ;;  %vm3542_vm1 = vweird.f32 %v6229_v62 }
 0x35b   : > { %vm2380_vm4 = vcmp.gt.f32.partialorder %v2296_v58, 0.0  ;;  %v2444_v2 = vmul.f32 0.2, %v2296_v58  ;;  %v3520_v18 = vsel %vm3517_vm5, %v3519_v61, %v3515_v31  ;;  %v2757_v13 = vadd.f32 %v6028_v10, %v2661_v32 }
 0x35c   : > { %4034 = vst.msk [vmem:[%s5481_s27 + $0xf8] sm:$0xff] %vm4002_vm13, %v3520_v18  ;;  %v3526_v56 = vadd.f32 %v4581_v22, %v3525_v12  ;;  %vm3547_vm12 = vcmp.eq.f32.partialorder %v3546_v28, 8.507059e+37  ;;  %v3549_v4 = vor.u32 1.1754944e-38, %v3548_v6 }
 0x35d   : > { %v2508_v52 = vsel %vm2380_vm4, %v2296_v58, %v2444_v2  ;;  %v4585_v1 = vpop.eup %4584  ;;  %v4347_v9 = vmul.f32 -1.442695, %v2757_v13 }
 0x35e   : > { %v2128_v42 = vpop.f32.mrf.mxu3  ;;  %v2576_v59 = vmul.f32 %v6147_v25, %v2508_v52  ;;  %v6240_v0 = vadd.f32 1.0, %v4585_v1  ;;  %v3530_v20 = vsel %vm3529_vm8, %v4581_v22, %v3526_v56 }
 0x35f   : > { %v2129_v24 = vadd.f32 %v6132_v35, %v2128_v42  ;;  %v4587_v36 = vpop.eup %4586  ;;  %v3535_v7 = vsel %vm3532_vm9, %v3534_v50, %v3530_v20 }
 0x360   : > { %2690 = vadd.xlane.f32.xlu2 %v2576_v59  ;;  %4588 = vrcp.f32 %v6240_v0  ;;  %4035 = vst.msk [vmem:[%s5481_s27 + $0x100] sm:$0xff] %vm4002_vm13, %v3535_v7  ;;  %v3538_v48 = vmul.f32 %v4587_v36, %v6229_v62  ;;  %vm3543_vm11 = vweird.f32 %v4587_v36  ;;  %v3561_v19 = vand.u32 2147483647, %v6240_v0 }
 0x361   : > { %v2298_v17 = vadd.f32 %v2297_v44, %v2129_v24  ;;  %4590 = vpow2.f32 %v4347_v9  ;;  %vm3544_vm14 = vmor %vm3542_vm1, %vm3543_vm11  ;;  %v3563_v53 = vand.u32 2147483648, %v6240_v0  ;;  %vm3557_vm2 = vweird.f32 %v6240_v0 }
 0x362   : > { %v2300_v47 = vpop.f32.mrf.mxu0  ;;  %v3539_v16 = vsub.f32 1.0, %v3538_v48  ;;  %vm3562_vm4 = vcmp.eq.f32.partialorder %v3561_v19, 8.507059e+37 }
 0x363   : > { %vm2381_vm10 = vcmp.gt.f32.partialorder %v2298_v17, 0.0  ;;  %v2445_v14 = vmul.f32 0.2, %v2298_v17  ;;  %v2663_v26 = vpop.xlane.xlu0 %2662  ;;  %v3564_v62 = vor.u32 1.1754944e-38, %v3563_v53 }
 0x364   : > { %v2758_v27 = vadd.f32 %v6028_v10, %v2663_v26  ;;  %v3540_v29 = vmul.f32 %v4587_v36, %v3539_v16 }
 0x365   : > { %v2509_v63 = vsel %vm2381_vm10, %v2298_v17, %v2445_v14 }
 0x366   : > { %v2131_v60 = vpop.f32.mrf.mxu3  ;;  %v2577_v34 = vmul.f32 %v6147_v25, %v2509_v63  ;;  %v4589_v41 = vpop.eup %4588  ;;  %v4348_v21 = vmul.f32 -1.442695, %v2758_v27  ;;  %v3541_v55 = vadd.f32 %v4587_v36, %v3540_v29 }
 0x367   : > { %v2132_v38 = vadd.f32 %v6132_v35, %v2131_v60  ;;  %v4591_v3 = vpop.eup %4590  ;;  %v3553_v40 = vmul.f32 %v4589_v41, %v6240_v0  ;;  %vm3558_vm0 = vweird.f32 %v4589_v41 }
 0x368   : > { %2692 = vadd.xlane.f32.xlu0 %v2577_v34  ;;  %v3013_v5 = vadd.f32 1.0, %v4591_v3  ;;  %4592 = vpow2.f32 %v4348_v21  ;;  %v3545_v43 = vsel %vm3544_vm14, %v4587_v36, %v3541_v55  ;;  %vm3559_vm3 = vmor %vm3557_vm2, %vm3558_vm0  ;;  %v6277_v55 = vld [vmem:[#allocation2] ss:$0 sm:$0xff] }
 0x369   : > { %v2301_v39 = vadd.f32 %v2300_v47, %v2132_v38  ;;  %v3554_v45 = vsub.f32 1.0, %v3553_v40  ;;  %v3550_v46 = vsel %vm3547_vm12, %v3549_v4, %v3545_v43 }
 0x36a   : > { %v2302_v8 = vpop.f32.mrf.mxu0  ;;  %4594 = vrcp.f32 %v3013_v5  ;;  %4036 = vst.msk [vmem:[%s5481_s27 + $0x108] sm:$0xff] %vm4002_vm13, %v3550_v46  ;;  %v3576_v52 = vand.u32 2147483647, %v3013_v5  ;;  %v3578_v1 = vand.u32 2147483648, %v3013_v5  ;;  %vm3572_vm7 = vweird.f32 %v3013_v5 }
 0x36b   : > { %vm2382_vm15 = vcmp.gt.f32.partialorder %v2301_v39, 0.0  ;;  %v2446_v30 = vmul.f32 0.2, %v2301_v39  ;;  %v3555_v51 = vmul.f32 %v4589_v41, %v3554_v45  ;;  %v2665_v33 = vpop.xlane.xlu1 %2664 }
 0x36c   : > { %v2759_v23 = vadd.f32 %v6028_v10, %v2665_v33  ;;  %vm3577_vm9 = vcmp.eq.f32.partialorder %v3576_v52, 8.507059e+37  ;;  %v3579_v48 = vor.u32 1.1754944e-38, %v3578_v1 }
 0x36d   : > { %v2510_v15 = vsel %vm2382_vm15, %v2301_v39, %v2446_v30  ;;  %v3556_v54 = vadd.f32 %v4589_v41, %v3555_v51 }
 0x36e   : > { %v2133_v22 = vpop.f32.mrf.mxu3  ;;  %v2578_v58 = vmul.f32 %v6147_v25, %v2510_v15  ;;  %v4593_v61 = vpop.eup %4592  ;;  %v4349_v31 = vmul.f32 -1.442695, %v2759_v23 }
 0x36f   : > { %v2134_v49 = vadd.f32 %v6132_v35, %v2133_v22  ;;  %v3560_v44 = vsel %vm3559_vm3, %v4589_v41, %v3556_v54  ;;  %v6261_v2 = vadd.f32 1.0, %v4593_v61 }
 0x370   : > { %2694 = vadd.xlane.f32.xlu1 %v2578_v58  ;;  %v4595_v32 = vpop.eup %4594  ;;  %v3565_v18 = vsel %vm3562_vm4, %v3564_v62, %v3560_v44 }
 0x371   : > { %v2303_v11 = vadd.f32 %v2302_v8, %v2134_v49  ;;  %4037 = vst.msk [vmem:[%s5481_s27 + $0x110] sm:$0xff] %vm4002_vm13, %v3565_v18  ;;  %v3568_v57 = vmul.f32 %v4595_v32, %v3013_v5  ;;  %4596 = vrcp.f32 %v6261_v2  ;;  %vm3573_vm6 = vweird.f32 %v4595_v32 }
 0x372   : > { %v2305_v37 = vpop.f32.mrf.mxu0  ;;  %4598 = vpow2.f32 %v4349_v31  ;;  %vm3574_vm8 = vmor %vm3572_vm7, %vm3573_vm6  ;;  %v3593_v63 = vand.u32 2147483648, %v6261_v2  ;;  %v3591_v38 = vand.u32 2147483647, %v6261_v2  ;;  %vm3587_vm1 = vweird.f32 %v6261_v2 }
 0x373   : > { %vm2383_vm5 = vcmp.gt.f32.partialorder %v2303_v11, 0.0  ;;  %v3569_v12 = vsub.f32 1.0, %v3568_v57  ;;  %v2667_v13 = vpop.xlane.xlu2 %2666  ;;  %v2447_v42 = vmul.f32 0.2, %v2303_v11 }
 0x374   : > { %v2760_v24 = vadd.f32 %v6028_v10, %v2667_v13  ;;  %v3594_v4 = vor.u32 1.1754944e-38, %v3593_v63  ;;  %vm3592_vm14 = vcmp.eq.f32.partialorder %v3591_v38, 8.507059e+37 }
 0x375   : > { %v3570_v56 = vmul.f32 %v4595_v32, %v3569_v12  ;;  %v2511_v9 = vsel %vm2383_vm5, %v2303_v11, %v2447_v42 }
 0x376   : > { %v2136_v59 = vpop.f32.mrf.mxu3  ;;  %v4350_v50 = vmul.f32 -1.442695, %v2760_v24  ;;  %v2579_v17 = vmul.f32 %v6147_v25, %v2511_v9 }
 0x377   : > { %v2137_v0 = vadd.f32 %v6132_v35, %v2136_v59  ;;  %v4597_v20 = vpop.eup %4596  ;;  %v3571_v36 = vadd.f32 %v4595_v32, %v3570_v56 }
 0x378   : > { %v4599_v47 = vpop.eup %4598  ;;  %v3583_v10 = vmul.f32 %v4597_v20, %v6261_v2  ;;  %4600 = vpow2.f32 %v4350_v50  ;;  %2696 = vadd.xlane.f32.xlu2 %v2579_v17  ;;  %vm3588_vm11 = vweird.f32 %v4597_v20 }
 0x379   : > { %v2306_v7 = vadd.f32 %v2305_v37, %v2137_v0  ;;  %v3575_v14 = vsel %vm3574_vm8, %v4595_v32, %v3571_v36  ;;  %v3015_v26 = vadd.f32 1.0, %v4599_v47  ;;  %vm3589_vm12 = vmor %vm3587_vm1, %vm3588_vm11 }
 0x37a   : > { %v2307_v16 = vpop.f32.mrf.mxu0  ;;  %v3580_v27 = vsel %vm3577_vm9, %v3579_v48, %v3575_v14  ;;  %v3584_v60 = vsub.f32 1.0, %v3583_v10 }
 0x37b   : > { %vm2384_vm10 = vcmp.gt.f32.partialorder %v2306_v7, 0.0  ;;  %v2448_v28 = vmul.f32 0.2, %v2306_v7  ;;  %4038 = vst.msk [vmem:[%s5481_s27 + $0x118] sm:$0xff] %vm4002_vm13, %v3580_v27  ;;  %4602 = vrcp.f32 %v3015_v26  ;;  %v3606_v58 = vand.u32 2147483647, %v3015_v26 }
 0x37c   : > { %v3585_v6 = vmul.f32 %v4597_v20, %v3584_v60  ;;  %v2669_v29 = vpop.xlane.xlu0 %2668  ;;  %v3608_v54 = vand.u32 2147483648, %v3015_v26  ;;  %vm3602_vm2 = vweird.f32 %v3015_v26 }
 0x37d   : > { %v2512_v41 = vsel %vm2384_vm10, %v2306_v7, %v2448_v28  ;;  %v2761_v5 = vadd.f32 %v6277_v55, %v2669_v29  ;;  %vm3607_vm4 = vcmp.eq.f32.partialorder %v3606_v58, 8.507059e+37 }
 0x37e   : > { %v2138_v34 = vpop.f32.mrf.mxu3  ;;  %v2580_v3 = vmul.f32 %v6147_v25, %v2512_v41  ;;  %v4601_v40 = vpop.eup %4600  ;;  %v3586_v39 = vadd.f32 %v4597_v20, %v3585_v6  ;;  %v3609_v12 = vor.u32 1.1754944e-38, %v3608_v54 }
 0x37f   : > { %v2139_v21 = vadd.f32 %v6132_v35, %v2138_v34  ;;  %v3016_v45 = vadd.f32 1.0, %v4601_v40  ;;  %v4351_v43 = vmul.f32 -1.442695, %v2761_v5 }
 0x380   : > { %2698 = vadd.xlane.f32.xlu0 %v2580_v3  ;;  %v3590_v30 = vsel %vm3589_vm12, %v4597_v20, %v3586_v39 }
 0x381   : > { %v2308_v8 = vadd.f32 %v2307_v16, %v2139_v21  ;;  %v4603_v19 = vpop.eup %4602  ;;  %v3595_v53 = vsel %vm3592_vm14, %v3594_v4, %v3590_v30  ;;  %4604 = vrcp.f32 %v3016_v45  ;;  %v3621_v56 = vand.u32 2147483647, %v3016_v45 }
 0x382   : > { %4039 = vst.msk [vmem:[%s5481_s27 + $0x120] sm:$0xff] %vm4002_vm13, %v3595_v53  ;;  %v3598_v46 = vmul.f32 %v4603_v19, %v3015_v26  ;;  %4606 = vpow2.f32 %v4351_v43  ;;  %v2310_v51 = vpop.f32.mrf.mxu0  ;;  %vm3603_vm0 = vweird.f32 %v4603_v19  ;;  %v3623_v0 = vand.u32 2147483648, %v3016_v45 }
 0x383   : > { %vm2385_vm15 = vcmp.gt.f32.partialorder %v2308_v8, 0.0  ;;  %v2449_v15 = vmul.f32 0.2, %v2308_v8  ;;  %v2671_v22 = vpop.xlane.xlu1 %2670  ;;  %vm3604_vm3 = vmor %vm3602_vm2, %vm3603_vm0  ;;  %vm3617_vm7 = vweird.f32 %v3016_v45  ;;  %vm3622_vm9 = vcmp.eq.f32.partialorder %v3621_v56, 8.507059e+37 }
 0x384   : > { %v3599_v33 = vsub.f32 1.0, %v3598_v46  ;;  %v2762_v23 = vadd.f32 %v6277_v55, %v2671_v22  ;;  %v3624_v48 = vor.u32 1.1754944e-38, %v3623_v0 }
 0x385   : > { %v2513_v61 = vsel %vm2385_vm15, %v2308_v8, %v2449_v15 }
 0x386   : > { %v2141_v49 = vpop.f32.mrf.mxu3  ;;  %v3600_v62 = vmul.f32 %v4603_v19, %v3599_v33  ;;  %v2581_v2 = vmul.f32 %v6147_v25, %v2513_v61  ;;  %v4352_v11 = vmul.f32 -1.442695, %v2762_v23 }
 0x387   : > { %v2142_v44 = vadd.f32 %v6132_v35, %v2141_v49  ;;  %v4605_v31 = vpop.eup %4604 }
 0x388   : > { %v4607_v32 = vpop.eup %4606  ;;  %v3601_v18 = vadd.f32 %v4603_v19, %v3600_v62  ;;  %v3613_v57 = vmul.f32 %v4605_v31, %v3016_v45  ;;  %2700 = vadd.xlane.f32.xlu1 %v2581_v2  ;;  %4608 = vpow2.f32 %v4352_v11  ;;  %vm3618_vm6 = vweird.f32 %v4605_v31 }
 0x389   : > { %v2311_v37 = vadd.f32 %v2310_v51, %v2142_v44  ;;  %v3017_v13 = vadd.f32 1.0, %v4607_v32  ;;  %vm3619_vm8 = vmor %vm3617_vm7, %vm3618_vm6 }
 0x38a   : > { %v3605_v42 = vsel %vm3604_vm3, %v4603_v19, %v3601_v18  ;;  %v3614_v52 = vsub.f32 1.0, %v3613_v57  ;;  %v2312_v1 = vpop.f32.mrf.mxu0 }
 0x38b   : > { %vm2386_vm5 = vcmp.gt.f32.partialorder %v2311_v37, 0.0  ;;  %v2450_v24 = vmul.f32 0.2, %v2311_v37  ;;  %v3610_v59 = vsel %vm3607_vm4, %v3609_v12, %v3605_v42  ;;  %4610 = vrcp.f32 %v3017_v13 }
 0x38c   : > { %4040 = vst.msk [vmem:[%s5481_s27 + $0x128] sm:$0xff] %vm4002_vm13, %v3610_v59  ;;  %v3615_v9 = vmul.f32 %v4605_v31, %v3614_v52  ;;  %v2673_v10 = vpop.xlane.xlu2 %2672  ;;  %v3638_v29 = vand.u32 2147483648, %v3017_v13  ;;  %v3636_v3 = vand.u32 2147483647, %v3017_v13  ;;  %vm3632_vm1 = vweird.f32 %v3017_v13 }
 0x38d   : > { %v2514_v50 = vsel %vm2386_vm5, %v2311_v37, %v2450_v24  ;;  %v2763_v16 = vadd.f32 %v6277_v55, %v2673_v10 }
 0x38e   : > { %v2143_v17 = vpop.f32.mrf.mxu3  ;;  %v2582_v20 = vmul.f32 %v6147_v25, %v2514_v50  ;;  %v3616_v36 = vadd.f32 %v4605_v31, %v3615_v9  ;;  %v4609_v47 = vpop.eup %4608  ;;  %v3639_v30 = vor.u32 1.1754944e-38, %v3638_v29  ;;  %vm3637_vm14 = vcmp.eq.f32.partialorder %v3636_v3, 8.507059e+37 }
 0x38f   : > { %v2144_v7 = vadd.f32 %v6132_v35, %v2143_v17  ;;  %v3018_v26 = vadd.f32 1.0, %v4609_v47  ;;  %v4353_v6 = vmul.f32 -1.442695, %v2763_v16 }
 0x390   : > { %2702 = vadd.xlane.f32.xlu2 %v2582_v20  ;;  %v3620_v14 = vsel %vm3619_vm8, %v4605_v31, %v3616_v36 }
 0x391   : > { %v2313_v28 = vadd.f32 %v2312_v1, %v2144_v7  ;;  %v4611_v27 = vpop.eup %4610  ;;  %v3625_v60 = vsel %vm3622_vm9, %v3624_v48, %v3620_v14  ;;  %4612 = vrcp.f32 %v3018_v26  ;;  %v3651_v54 = vand.u32 2147483647, %v3018_v26 }
 0x392   : > { %4041 = vst.msk [vmem:[%s5481_s27 + $0x130] sm:$0xff] %vm4002_vm13, %v3625_v60  ;;  %v3628_v63 = vmul.f32 %v4611_v27, %v3017_v13  ;;  %v2315_v38 = vpop.f32.mrf.mxu0  ;;  %4614 = vpow2.f32 %v4353_v6  ;;  %vm3633_vm11 = vweird.f32 %v4611_v27  ;;  %v3653_v23 = vand.u32 2147483648, %v3018_v26 }
 0x393   : > { %vm2387_vm10 = vcmp.gt.f32.partialorder %v2313_v28, 0.0  ;;  %v2451_v41 = vmul.f32 0.2, %v2313_v28  ;;  %vm3634_vm12 = vmor %vm3632_vm1, %vm3633_vm11  ;;  %vm3647_vm2 = vweird.f32 %v3018_v26  ;;  %vm3652_vm4 = vcmp.eq.f32.partialorder %v3651_v54, 8.507059e+37 }
 0x394   : > { %v3629_v34 = vsub.f32 1.0, %v3628_v63  ;;  %v3654_v32 = vor.u32 1.1754944e-38, %v3653_v23 }
 0x395   : > { %v2515_v40 = vsel %vm2387_vm10, %v2313_v28, %v2451_v41  ;;  %v2675_v45 = vpop.xlane.xlu0 %2674 }
 0x396   : > { %v3630_v21 = vmul.f32 %v4611_v27, %v3629_v34  ;;  %v2583_v39 = vmul.f32 %v6147_v25, %v2515_v40  ;;  %v2146_v8 = vpop.f32.mrf.mxu3  ;;  %v2764_v19 = vadd.f32 %v6277_v55, %v2675_v45 }
 0x397   : > { %v4613_v5 = vpop.eup %4612  ;;  %v2147_v53 = vadd.f32 %v6132_v35, %v2146_v8 }
 0x398   : > { %v3631_v4 = vadd.f32 %v4611_v27, %v3630_v21  ;;  %v3643_v43 = vmul.f32 %v4613_v5, %v3018_v26  ;;  %2704 = vadd.xlane.f32.xlu0 %v2583_v39  ;;  %v4615_v51 = vpop.eup %4614  ;;  %v4354_v22 = vmul.f32 -1.442695, %v2764_v19  ;;  %vm3648_vm15 = vweird.f32 %v4613_v5  ;;  %v6310_v26 = vld [vmem:[%s6426_s6] ss:$0 sm:$0xff] }
 0x399   : > { %v2316_v58 = vadd.f32 %v2315_v38, %v2147_v53  ;;  %v3019_v49 = vadd.f32 1.0, %v4615_v51  ;;  %vm3649_vm3 = vmor %vm3647_vm2, %vm3648_vm15 }
 0x39a   : > { %v3635_v46 = vsel %vm3634_vm12, %v4611_v27, %v3631_v4  ;;  %v3644_v33 = vsub.f32 1.0, %v3643_v43  ;;  %4616 = vpow2.f32 %v4354_v22  ;;  %v2317_v62 = vpop.f32.mrf.mxu0  ;;  %v6327_v22 = vld [vmem:[%s6427_s7] ss:$0 sm:$0xff] }
 0x39b   : > { %v3640_v15 = vsel %vm3637_vm14, %v3639_v30, %v3635_v46  ;;  %vm2388_vm0 = vcmp.gt.f32.partialorder %v2316_v58, 0.0  ;;  %v2452_v44 = vmul.f32 0.2, %v2316_v58  ;;  %4618 = vrcp.f32 %v3019_v49 }
 0x39c   : > { %4042 = vst.msk [vmem:[%s5481_s27 + $0x138] sm:$0xff] %vm4002_vm13, %v3640_v15  ;;  %v3645_v61 = vmul.f32 %v4613_v5, %v3644_v33  ;;  %v3668_v36 = vand.u32 2147483648, %v3019_v49  ;;  %vm3662_vm7 = vweird.f32 %v3019_v49 }
 0x39d   : > { %v2516_v11 = vsel %vm2388_vm0, %v2316_v58, %v2452_v44 }
 0x39e   : > { %v3646_v2 = vadd.f32 %v4613_v5, %v3645_v61  ;;  %v2148_v57 = vpop.f32.mrf.mxu3  ;;  %v2584_v37 = vmul.f32 %v6147_v25, %v2516_v11  ;;  %v3669_v38 = vor.u32 1.1754944e-38, %v3668_v36 }
 0x39f   : > { %v2677_v31 = vpop.xlane.xlu1 %2676  ;;  %v2149_v13 = vadd.f32 %v6132_v35, %v2148_v57  ;;  %v3666_v35 = vand.u32 2147483647, %v3019_v49 }
 0x3a0   : > { %v2765_v18 = vadd.f32 %v6277_v55, %v2677_v31  ;;  %v3650_v12 = vsel %vm3649_vm3, %v4613_v5, %v3646_v2  ;;  %2706 = vadd.xlane.f32.xlu1 %v2584_v37  ;;  %v4617_v1 = vpop.eup %4616 }
 0x3a1   : > { %v3655_v42 = vsel %vm3652_vm4, %v3654_v32, %v3650_v12  ;;  %v2318_v24 = vadd.f32 %v2317_v62, %v2149_v13  ;;  %v4619_v59 = vpop.eup %4618  ;;  %v6302_v56 = vadd.f32 1.0, %v4617_v1  ;;  %vm3667_vm9 = vcmp.eq.f32.partialorder %v3666_v35, 8.507059e+37 }
 0x3a2   : > { %v4355_v52 = vmul.f32 -1.442695, %v2765_v18  ;;  %4043 = vst.msk [vmem:[%s5481_s27 + $0x140] sm:$0xff] %vm4002_vm13, %v3655_v42  ;;  %v3658_v0 = vmul.f32 %v4619_v59, %v3019_v49  ;;  %v2320_v17 = vpop.f32.mrf.mxu0  ;;  %vm3663_vm6 = vweird.f32 %v4619_v59 }
 0x3a3   : > { %vm2389_vm5 = vcmp.gt.f32.partialorder %v2318_v24, 0.0  ;;  %v2453_v9 = vmul.f32 0.2, %v2318_v24  ;;  %vm3664_vm8 = vmor %vm3662_vm7, %vm3663_vm6  ;;  %v3681_v39 = vand.u32 2147483647, %v6302_v56  ;;  %v3683_v5 = vand.u32 2147483648, %v6302_v56 }
 0x3a4   : > { %4620 = vpow2.f32 %v4355_v52  ;;  %v3659_v50 = vsub.f32 1.0, %v3658_v0  ;;  %v2679_v7 = vpop.xlane.xlu2 %2678  ;;  %vm3677_vm1 = vweird.f32 %v6302_v56 }
 0x3a5   : > { %4622 = vrcp.f32 %v6302_v56  ;;  %v2517_v20 = vsel %vm2389_vm5, %v2318_v24, %v2453_v9  ;;  %v2766_v14 = vadd.f32 %v6277_v55, %v2679_v7  ;;  %v3684_v54 = vor.u32 1.1754944e-38, %v3683_v5 }
 0x3a6   : > { %v2151_v47 = vpop.f32.mrf.mxu3  ;;  %v2585_v48 = vmul.f32 %v6147_v25, %v2517_v20  ;;  %v3660_v10 = vmul.f32 %v4619_v59, %v3659_v50  ;;  %vm3682_vm14 = vcmp.eq.f32.partialorder %v3681_v39, 8.507059e+37 }
 0x3a7   : > { %v2152_v16 = vadd.f32 %v6310_v26, %v2151_v47  ;;  %v4356_v63 = vmul.f32 -1.442695, %v2766_v14 }
 0x3a8   : > { %2708 = vadd.xlane.f32.xlu2 %v2585_v48  ;;  %v3661_v27 = vadd.f32 %v4619_v59, %v3660_v10 }
 0x3a9   : > { %v2321_v25 = vadd.f32 %v2320_v17, %v2152_v16 }
 0x3aa   : > { %v4621_v28 = vpop.eup %4620  ;;  %v3665_v41 = vsel %vm3664_vm8, %v4619_v59, %v3661_v27  ;;  %v2322_v19 = vpop.f32.mrf.mxu0 }
 0x3ab   : > { %v6313_v60 = vadd.f32 1.0, %v4621_v28  ;;  %v4623_v6 = vpop.eup %4622  ;;  %v2681_v34 = vpop.xlane.xlu0 %2680  ;;  %v3670_v21 = vsel %vm3667_vm9, %v3669_v38, %v3665_v41  ;;  %vm2390_vm10 = vcmp.gt.f32.partialorder %v2321_v25, 0.0  ;;  %v2454_v45 = vmul.f32 0.2, %v2321_v25 }
 0x3ac   : > { %v3673_v29 = vmul.f32 %v4623_v6, %v6302_v56  ;;  %4044 = vst.msk [vmem:[%s5481_s27 + $0x148] sm:$0xff] %vm4002_vm13, %v3670_v21  ;;  %v2767_v40 = vadd.f32 %v6277_v55, %v2681_v34  ;;  %vm3678_vm11 = vweird.f32 %v4623_v6 }
 0x3ad   : > { %4624 = vrcp.f32 %v6313_v60  ;;  %v2518_v53 = vsel %vm2390_vm10, %v2321_v25, %v2454_v45  ;;  %vm3679_vm12 = vmor %vm3677_vm1, %vm3678_vm11  ;;  %v3698_v18 = vand.u32 2147483648, %v6313_v60  ;;  %v3696_v12 = vand.u32 2147483647, %v6313_v60 }
 0x3ae   : > { %v3674_v3 = vsub.f32 1.0, %v3673_v29  ;;  %4626 = vpow2.f32 %v4356_v63  ;;  %v2153_v4 = vpop.f32.mrf.mxu3  ;;  %v4357_v30 = vmul.f32 -1.442695, %v2767_v40  ;;  %v2586_v58 = vmul.f32 %v6327_v22, %v2518_v53 }
 0x3af   : > { %v2154_v43 = vadd.f32 %v6310_v26, %v2153_v4  ;;  %vm3692_vm2 = vweird.f32 %v6313_v60  ;;  %v3699_v59 = vor.u32 1.1754944e-38, %v3698_v18  ;;  %vm3697_vm4 = vcmp.eq.f32.partialorder %v3696_v12, 8.507059e+37 }
 0x3b0   : > { %v3675_v8 = vmul.f32 %v4623_v6, %v3674_v3  ;;  %4628 = vpow2.f32 %v4357_v30  ;;  %2710 = vadd.xlane.f32.xlu0 %v2586_v58 }
 0x3b1   : > { %v2323_v33 = vadd.f32 %v2322_v19, %v2154_v43 }
 0x3b2   : > { %v3676_v15 = vadd.f32 %v4623_v6, %v3675_v8 }
 0x3b3   : > { %v2683_v46 = vpop.xlane.xlu1 %2682  ;;  %v4625_v51 = vpop.eup %4624  ;;  %vm2391_vm15 = vcmp.gt.f32.partialorder %v2323_v33, 0.0  ;;  %v2455_v44 = vmul.f32 0.2, %v2323_v33 }
 0x3b4   : > { %v3688_v23 = vmul.f32 %v4625_v51, %v6313_v60  ;;  %v2768_v49 = vadd.f32 %v6277_v55, %v2683_v46  ;;  %v4627_v61 = vpop.eup %4626  ;;  %v3680_v62 = vsel %vm3679_vm12, %v4623_v6, %v3676_v15  ;;  %vm3693_vm0 = vweird.f32 %v4625_v51 }
 0x3b5   : > { %v3685_v2 = vsel %vm3682_vm14, %v3684_v54, %v3680_v62  ;;  %v3022_v11 = vadd.f32 1.0, %v4627_v61  ;;  %v2519_v57 = vsel %vm2391_vm15, %v2323_v33, %v2455_v44  ;;  %vm3694_vm3 = vmor %vm3692_vm2, %vm3693_vm0 }
 0x3b6   : > { %v3689_v31 = vsub.f32 1.0, %v3688_v23  ;;  %v4358_v32 = vmul.f32 -1.442695, %v2768_v49  ;;  %4045 = vst.msk [vmem:[%s5481_s27 + $0x150] sm:$0xff] %vm4002_vm13, %v3685_v2  ;;  %v2156_v13 = vpop.f32.mrf.mxu3  ;;  %v4629_v42 = vpop.eup %4628  ;;  %v2587_v52 = vmul.f32 %v6327_v22, %v2519_v57 }
 0x3b7   : > { %4630 = vrcp.f32 %v3022_v11  ;;  %v3023_v24 = vadd.f32 1.0, %v4629_v42  ;;  %v3711_v14 = vand.u32 2147483647, %v3022_v11  ;;  %v3713_v16 = vand.u32 2147483648, %v3022_v11 }
 0x3b8   : > { %v3690_v37 = vmul.f32 %v4625_v51, %v3689_v31  ;;  %4632 = vpow2.f32 %v4358_v32  ;;  %2712 = vadd.xlane.f32.xlu1 %v2587_v52  ;;  %vm3707_vm6 = vweird.f32 %v3022_v11  ;;  %v2157_v38 = vadd.f32 %v6310_v26, %v2156_v13 }
 0x3b9   : > { %4634 = vrcp.f32 %v3023_v24  ;;  %vm3712_vm8 = vcmp.eq.f32.partialorder %v3711_v14, 8.507059e+37  ;;  %v3714_v41 = vor.u32 1.1754944e-38, %v3713_v16  ;;  %v3726_v29 = vand.u32 2147483647, %v3023_v24 }
 0x3ba   : > { %v3691_v1 = vadd.f32 %v4625_v51, %v3690_v37  ;;  %v3728_v21 = vand.u32 2147483648, %v3023_v24  ;;  %vm3722_vm10 = vweird.f32 %v3023_v24 }
 0x3bb   : > { %v2685_v56 = vpop.xlane.xlu2 %2684  ;;  %vm3727_vm1 = vcmp.eq.f32.partialorder %v3726_v29, 8.507059e+37 }
 0x3bc   : > { %v3695_v0 = vsel %vm3694_vm3, %v4625_v51, %v3691_v1  ;;  %v2769_v50 = vadd.f32 %v6277_v55, %v2685_v56  ;;  %v3729_v53 = vor.u32 1.1754944e-38, %v3728_v21 }
 0x3bd   : > { %v3700_v9 = vsel %vm3697_vm4, %v3699_v59, %v3695_v0  ;;  %v4631_v17 = vpop.eup %4630 }
 0x3be   : > { %4046 = vst.msk [vmem:[%s5481_s27 + $0x158] sm:$0xff] %vm4002_vm13, %v3700_v9  ;;  %v4633_v20 = vpop.eup %4632  ;;  %v3703_v35 = vmul.f32 %v4631_v17, %v3022_v11  ;;  %v4359_v36 = vmul.f32 -1.442695, %v2769_v50  ;;  %v2158_v47 = vpop.f32.mrf.mxu3  ;;  %vm3708_vm5 = vweird.f32 %v4631_v17 }
 0x3bf   : > { %v6341_v7 = vadd.f32 1.0, %v4633_v20  ;;  %v4635_v10 = vpop.eup %4634  ;;  %vm3709_vm7 = vmor %vm3707_vm6, %vm3708_vm5  ;;  %v2159_v37 = vadd.f32 %v6310_v26, %v2158_v47 }
 0x3c0   : > { %v3704_v48 = vsub.f32 1.0, %v3703_v35  ;;  %4636 = vpow2.f32 %v4359_v36  ;;  %v3718_v60 = vmul.f32 %v4635_v10, %v3023_v24  ;;  %vm3723_vm9 = vweird.f32 %v4635_v10 }
 0x3c1   : > { %4638 = vrcp.f32 %v6341_v7  ;;  %vm3724_vm11 = vmor %vm3722_vm10, %vm3723_vm9  ;;  %v3743_v54 = vand.u32 2147483648, %v6341_v7  ;;  %v3741_v62 = vand.u32 2147483647, %v6341_v7  ;;  %vm3737_vm15 = vweird.f32 %v6341_v7 }
 0x3c2   : > { %v3705_v27 = vmul.f32 %v4631_v17, %v3704_v48  ;;  %v3719_v6 = vsub.f32 1.0, %v3718_v60 }
 0x3c3   : > { %v2687_v28 = vpop.xlane.xlu0 %2686  ;;  %v3744_v57 = vor.u32 1.1754944e-38, %v3743_v54  ;;  %vm3742_vm2 = vcmp.eq.f32.partialorder %v3741_v62, 8.507059e+37 }
 0x3c4   : > { %v2770_v63 = vadd.f32 %v6277_v55, %v2687_v28  ;;  %v3706_v25 = vadd.f32 %v4631_v17, %v3705_v27  ;;  %v3720_v39 = vmul.f32 %v4635_v10, %v3719_v6 }
 0x3c6   : > { %v4360_v34 = vmul.f32 -1.442695, %v2770_v63  ;;  %v4637_v3 = vpop.eup %4636  ;;  %v3710_v40 = vsel %vm3709_vm7, %v4631_v17, %v3706_v25  ;;  %v2325_v8 = vpop.f32.mrf.mxu3  ;;  %v3721_v30 = vadd.f32 %v4635_v10, %v3720_v39 }
 0x3c7   : > { %v4639_v5 = vpop.eup %4638  ;;  %v3715_v4 = vsel %vm3712_vm8, %v3714_v41, %v3710_v40  ;;  %v6346_v45 = vadd.f32 1.0, %v4637_v3  ;;  %v2326_v19 = vadd.f32 %v2325_v8, %v2157_v38 }
 0x3c8   : > { %4640 = vpow2.f32 %v4360_v34  ;;  %4047 = vst.msk [vmem:[%s5481_s27 + $0x160] sm:$0xff] %vm4002_vm13, %v3715_v4  ;;  %v3733_v43 = vmul.f32 %v4639_v5, %v6341_v7  ;;  %v3725_v46 = vsel %vm3724_vm11, %v4635_v10, %v3721_v30  ;;  %vm3738_vm14 = vweird.f32 %v4639_v5 }
 0x3c9   : > { %4642 = vrcp.f32 %v6346_v45  ;;  %v2456_v15 = vmul.f32 0.2, %v2326_v19  ;;  %vm2392_vm12 = vcmp.gt.f32.partialorder %v2326_v19, 0.0  ;;  %v3730_v58 = vsel %vm3727_vm1, %v3729_v53, %v3725_v46  ;;  %vm3739_vm0 = vmor %vm3737_vm15, %vm3738_vm14 }
 0x3ca   : > { %v3734_v51 = vsub.f32 1.0, %v3733_v43  ;;  %4048 = vst.msk [vmem:[%s5481_s27 + $0x168] sm:$0xff] %vm4002_vm13, %v3730_v58  ;;  %v3758_v0 = vand.u32 2147483648, %v6346_v45  ;;  %v3756_v50 = vand.u32 2147483647, %v6346_v45  ;;  %vm3752_vm5 = vweird.f32 %v6346_v45 }
 0x3cb   : > { %v2689_v33 = vpop.xlane.xlu1 %2688  ;;  %v2520_v44 = vsel %vm2392_vm12, %v2326_v19, %v2456_v15 }
 0x3cc   : > { %v2771_v23 = vadd.f32 %v6277_v55, %v2689_v33  ;;  %v3735_v61 = vmul.f32 %v4639_v5, %v3734_v51  ;;  %v2588_v11 = vmul.f32 %v6327_v22, %v2520_v44  ;;  %v3759_v48 = vor.u32 1.1754944e-38, %v3758_v0 }
 0x3cd   : > { %vm3757_vm7 = vcmp.eq.f32.partialorder %v3756_v50, 8.507059e+37 }
 0x3ce   : > { %v4641_v49 = vpop.eup %4640  ;;  %v4361_v31 = vmul.f32 -1.442695, %v2771_v23  ;;  %v3736_v32 = vadd.f32 %v4639_v5, %v3735_v61  ;;  %v2327_v12 = vpop.f32.mrf.mxu3  ;;  %2714 = vadd.xlane.f32.xlu2 %v2588_v11 }
 0x3cf   : > { %v3026_v2 = vadd.f32 1.0, %v4641_v49  ;;  %v4643_v18 = vpop.eup %4642  ;;  %v2328_v1 = vadd.f32 %v2327_v12, %v2159_v37 }
 0x3d0   : > { %v3740_v13 = vsel %vm3739_vm0, %v4639_v5, %v3736_v32  ;;  %v3748_v42 = vmul.f32 %v4643_v18, %v6346_v45  ;;  %vm3753_vm4 = vweird.f32 %v4643_v18 }
 0x3d1   : > { %4644 = vrcp.f32 %v3026_v2  ;;  %v3745_v52 = vsel %vm3742_vm2, %v3744_v57, %v3740_v13  ;;  %v2457_v9 = vmul.f32 0.2, %v2328_v1  ;;  %vm2393_vm3 = vcmp.gt.f32.partialorder %v2328_v1, 0.0  ;;  %vm3754_vm6 = vmor %vm3752_vm5, %vm3753_vm4 }
 0x3d2   : > { %4646 = vpow2.f32 %v4361_v31  ;;  %4049 = vst.msk [vmem:[%s5481_s27 + $0x170] sm:$0xff] %vm4002_vm13, %v3745_v52  ;;  %v3749_v59 = vsub.f32 1.0, %v3748_v42  ;;  %v3773_v60 = vand.u32 2147483648, %v3026_v2  ;;  %v3771_v6 = vand.u32 2147483647, %v3026_v2 }
 0x3d3   : > { %v2691_v24 = vpop.xlane.xlu2 %2690  ;;  %v2521_v35 = vsel %vm2393_vm3, %v2328_v1, %v2457_v9  ;;  %vm3767_vm9 = vweird.f32 %v3026_v2 }
 0x3d4   : > { %v2772_v56 = vadd.f32 %v6277_v55, %v2691_v24  ;;  %v3750_v26 = vmul.f32 %v4643_v18, %v3749_v59  ;;  %v2589_v14 = vmul.f32 %v6327_v22, %v2521_v35  ;;  %v3774_v29 = vor.u32 1.1754944e-38, %v3773_v60 }
 0x3d5   : > { %vm3772_vm11 = vcmp.eq.f32.partialorder %v3771_v6, 8.507059e+37 }
 0x3d6   : > { %v4362_v17 = vmul.f32 -1.442695, %v2772_v56  ;;  %v3751_v7 = vadd.f32 %v4643_v18, %v3750_v26  ;;  %2716 = vadd.xlane.f32.xlu0 %v2589_v14 }
 0x3d7   : > { %v4645_v20 = vpop.eup %4644 }
 0x3d8   : > { %v4647_v36 = vpop.eup %4646  ;;  %v3763_v47 = vmul.f32 %v4645_v20, %v3026_v2  ;;  %4648 = vpow2.f32 %v4362_v17  ;;  %v3755_v16 = vsel %vm3754_vm6, %v4643_v18, %v3751_v7  ;;  %vm3768_vm8 = vweird.f32 %v4645_v20 }
 0x3d9   : > { %v3027_v10 = vadd.f32 1.0, %v4647_v36  ;;  %v3760_v27 = vsel %vm3757_vm7, %v3759_v48, %v3755_v16  ;;  %vm3769_vm10 = vmor %vm3767_vm9, %vm3768_vm8 }
 0x3da   : > { %v3764_v28 = vsub.f32 1.0, %v3763_v47  ;;  %4050 = vst.msk [vmem:[%s5481_s27 + $0x178] sm:$0xff] %vm4002_vm13, %v3760_v27 }
 0x3db   : > { %4650 = vrcp.f32 %v3027_v10  ;;  %v2693_v63 = vpop.xlane.xlu0 %2692  ;;  %v3788_v30 = vand.u32 2147483648, %v3027_v10  ;;  %v3786_v46 = vand.u32 2147483647, %v3027_v10  ;;  %vm3782_vm12 = vweird.f32 %v3027_v10 }
 0x3dc   : > { %v3765_v25 = vmul.f32 %v4645_v20, %v3764_v28  ;;  %v2773_v38 = vadd.f32 %v6277_v55, %v2693_v63 }
 0x3dd   : > { %v3789_v54 = vor.u32 1.1754944e-38, %v3788_v30  ;;  %vm3787_vm15 = vcmp.eq.f32.partialorder %v3786_v46, 8.507059e+37 }
 0x3de   : > { %v4649_v34 = vpop.eup %4648  ;;  %v3766_v41 = vadd.f32 %v4645_v20, %v3765_v25  ;;  %v4363_v22 = vmul.f32 -1.442695, %v2773_v38 }
 0x3df   : > { %v3028_v21 = vadd.f32 1.0, %v4649_v34 }
 0x3e0   : > { %v3770_v3 = vsel %vm3769_vm10, %v4645_v20, %v3766_v41  ;;  %4652 = vpow2.f32 %v4363_v22 }
 0x3e1   : > { %v4651_v40 = vpop.eup %4650  ;;  %v3775_v39 = vsel %vm3772_vm11, %v3774_v29, %v3770_v3  ;;  %4654 = vrcp.f32 %v3028_v21  ;;  %v3803_v62 = vand.u32 2147483648, %v3028_v21  ;;  %v3801_v2 = vand.u32 2147483647, %v3028_v21 }
 0x3e2   : > { %4051 = vst.msk [vmem:[%s5481_s27 + $0x180] sm:$0xff] %vm4002_vm13, %v3775_v39  ;;  %v3778_v5 = vmul.f32 %v4651_v40, %v3027_v10  ;;  %vm3783_vm1 = vweird.f32 %v4651_v40  ;;  %vm3797_vm2 = vweird.f32 %v3028_v21 }
 0x3e3   : > { %v2695_v4 = vpop.xlane.xlu1 %2694  ;;  %vm3784_vm14 = vmor %vm3782_vm12, %vm3783_vm1  ;;  %v3804_v12 = vor.u32 1.1754944e-38, %v3803_v62  ;;  %vm3802_vm4 = vcmp.eq.f32.partialorder %v3801_v2, 8.507059e+37 }
 0x3e4   : > { %v2774_v45 = vadd.f32 %v6277_v55, %v2695_v4  ;;  %v3779_v8 = vsub.f32 1.0, %v3778_v5 }
 0x3e6   : > { %v4364_v43 = vmul.f32 -1.442695, %v2774_v45  ;;  %v4653_v19 = vpop.eup %4652  ;;  %v3780_v53 = vmul.f32 %v4651_v40, %v3779_v8 }
 0x3e7   : > { %v4655_v51 = vpop.eup %4654  ;;  %v3029_v15 = vadd.f32 1.0, %v4653_v19 }
 0x3e8   : > { %4656 = vpow2.f32 %v4364_v43  ;;  %v3781_v33 = vadd.f32 %v4651_v40, %v3780_v53  ;;  %v3793_v58 = vmul.f32 %v4655_v51, %v3028_v21  ;;  %vm3798_vm0 = vweird.f32 %v4655_v51 }
 0x3e9   : > { %4658 = vrcp.f32 %v3029_v15  ;;  %vm3799_vm3 = vmor %vm3797_vm2, %vm3798_vm0  ;;  %v3818_v59 = vand.u32 2147483648, %v3029_v15  ;;  %v3816_v9 = vand.u32 2147483647, %v3029_v15  ;;  %vm3812_vm6 = vweird.f32 %v3029_v15 }
 0x3ea   : > { %v3785_v23 = vsel %vm3784_vm14, %v4651_v40, %v3781_v33  ;;  %v3794_v49 = vsub.f32 1.0, %v3793_v58 }
 0x3eb   : > { %v3790_v61 = vsel %vm3787_vm15, %v3789_v54, %v3785_v23  ;;  %v2697_v31 = vpop.xlane.xlu2 %2696  ;;  %v3819_v35 = vor.u32 1.1754944e-38, %v3818_v59  ;;  %vm3817_vm8 = vcmp.eq.f32.partialorder %v3816_v9, 8.507059e+37 }
 0x3ec   : > { %4052 = vst.msk [vmem:[%s5481_s27 + $0x188] sm:$0xff] %vm4002_vm13, %v3790_v61  ;;  %v3795_v44 = vmul.f32 %v4655_v51, %v3794_v49  ;;  %v2775_v32 = vadd.f32 %v6277_v55, %v2697_v31 }
 0x3ee   : > { %v4657_v11 = vpop.eup %4656  ;;  %v3796_v18 = vadd.f32 %v4655_v51, %v3795_v44  ;;  %v4365_v13 = vmul.f32 -1.442695, %v2775_v32 }
 0x3ef   : > { %v3030_v57 = vadd.f32 1.0, %v4657_v11  ;;  %v4659_v37 = vpop.eup %4658 }
 0x3f0   : > { %v3800_v42 = vsel %vm3799_vm3, %v4655_v51, %v3796_v18  ;;  %v3808_v52 = vmul.f32 %v4659_v37, %v3029_v15  ;;  %vm3813_vm5 = vweird.f32 %v4659_v37 }
 0x3f1   : > { %4660 = vrcp.f32 %v3030_v57  ;;  %v3805_v1 = vsel %vm3802_vm4, %v3804_v12, %v3800_v42  ;;  %vm3814_vm7 = vmor %vm3812_vm6, %vm3813_vm5  ;;  %v3833_v16 = vand.u32 2147483648, %v3030_v57  ;;  %v3831_v27 = vand.u32 2147483647, %v3030_v57 }
 0x3f2   : > { %4053 = vst.msk [vmem:[%s5481_s27 + $0x190] sm:$0xff] %vm4002_vm13, %v3805_v1  ;;  %v3809_v24 = vsub.f32 1.0, %v3808_v52  ;;  %4662 = vpow2.f32 %v4365_v13  ;;  %vm3827_vm10 = vweird.f32 %v3030_v57 }
 0x3f3   : > { %v2699_v56 = vpop.xlane.xlu0 %2698  ;;  %v3834_v38 = vor.u32 1.1754944e-38, %v3833_v16  ;;  %vm3832_vm1 = vcmp.eq.f32.partialorder %v3831_v27, 8.507059e+37  ;;  %v6394_v27 = vld [vmem:[#allocation2] ss:$0 sm:$0xff] }
 0x3f4   : > { %v3810_v0 = vmul.f32 %v4659_v37, %v3809_v24  ;;  %v2776_v26 = vadd.f32 %v6277_v55, %v2699_v56 }
 0x3f6   : > { %v3811_v17 = vadd.f32 %v4659_v37, %v3810_v0  ;;  %v4366_v20 = vmul.f32 -1.442695, %v2776_v26 }
 0x3f7   : > { %v4661_v50 = vpop.eup %4660 }
 0x3f8   : > { %v3823_v36 = vmul.f32 %v4661_v50, %v3030_v57  ;;  %v4663_v7 = vpop.eup %4662  ;;  %v3815_v47 = vsel %vm3814_vm7, %v4659_v37, %v3811_v17  ;;  %4664 = vpow2.f32 %v4366_v20  ;;  %vm3828_vm9 = vweird.f32 %v4661_v50 }
 0x3f9   : > { %v3820_v48 = vsel %vm3817_vm8, %v3819_v35, %v3815_v47  ;;  %v3031_v14 = vadd.f32 1.0, %v4663_v7  ;;  %vm3829_vm11 = vmor %vm3827_vm10, %vm3828_vm9 }
 0x3fa   : > { %v3824_v10 = vsub.f32 1.0, %v3823_v36  ;;  %4054 = vst.msk [vmem:[%s5481_s27 + $0x198] sm:$0xff] %vm4002_vm13, %v3820_v48 }
 0x3fb   : > { %4666 = vrcp.f32 %v3031_v14  ;;  %v2701_v60 = vpop.xlane.xlu1 %2700  ;;  %v3848_v4 = vand.u32 2147483648, %v3031_v14  ;;  %v3846_v8 = vand.u32 2147483647, %v3031_v14  ;;  %vm3842_vm14 = vweird.f32 %v3031_v14 }
 0x3fc   : > { %v3825_v28 = vmul.f32 %v4661_v50, %v3824_v10  ;;  %v2777_v25 = vadd.f32 %v6277_v55, %v2701_v60 }
 0x3fd   : > { %v3849_v51 = vor.u32 1.1754944e-38, %v3848_v4  ;;  %vm3847_vm0 = vcmp.eq.f32.partialorder %v3846_v8, 8.507059e+37 }
 0x3fe   : > { %v3826_v63 = vadd.f32 %v4661_v50, %v3825_v28  ;;  %v4665_v6 = vpop.eup %4664  ;;  %v4367_v22 = vmul.f32 -1.442695, %v2777_v25 }
 0x3ff   : > { %v3032_v41 = vadd.f32 1.0, %v4665_v6 }
 0x400   : > { %v3830_v34 = vsel %vm3829_vm11, %v4661_v50, %v3826_v63 }
 0x401   : > { %v3835_v29 = vsel %vm3832_vm1, %v3834_v38, %v3830_v34  ;;  %v4667_v21 = vpop.eup %4666  ;;  %4668 = vrcp.f32 %v3032_v41  ;;  %v3863_v23 = vand.u32 2147483648, %v3032_v41  ;;  %v3861_v61 = vand.u32 2147483647, %v3032_v41 }
 0x402   : > { %4055 = vst.msk [vmem:[%s5481_s27 + $0x1a0] sm:$0xff] %vm4002_vm13, %v3835_v29  ;;  %v3838_v3 = vmul.f32 %v4667_v21, %v3031_v14  ;;  %4670 = vpow2.f32 %v4367_v22  ;;  %vm3843_vm12 = vweird.f32 %v4667_v21  ;;  %vm3857_vm3 = vweird.f32 %v3032_v41 }
 0x403   : > { %v2703_v40 = vpop.xlane.xlu2 %2702  ;;  %vm3844_vm15 = vmor %vm3842_vm14, %vm3843_vm12  ;;  %v3864_v11 = vor.u32 1.1754944e-38, %v3863_v23  ;;  %vm3862_vm5 = vcmp.eq.f32.partialorder %v3861_v61, 8.507059e+37 }
 0x404   : > { %v3839_v39 = vsub.f32 1.0, %v3838_v3  ;;  %v2778_v5 = vadd.f32 %v6277_v55, %v2703_v40 }
 0x406   : > { %v3840_v45 = vmul.f32 %v4667_v21, %v3839_v39  ;;  %v4368_v30 = vmul.f32 -1.442695, %v2778_v5 }
 0x407   : > { %v4669_v43 = vpop.eup %4668 }
 0x408   : > { %v4671_v19 = vpop.eup %4670  ;;  %v3841_v53 = vadd.f32 %v4667_v21, %v3840_v45  ;;  %v3853_v46 = vmul.f32 %v4669_v43, %v3032_v41  ;;  %4672 = vpow2.f32 %v4368_v30  ;;  %vm3858_vm2 = vweird.f32 %v4669_v43 }
 0x409   : > { %v3033_v15 = vadd.f32 1.0, %v4671_v19  ;;  %vm3859_vm4 = vmor %vm3857_vm3, %vm3858_vm2 }
 0x40a   : > { %v3845_v33 = vsel %vm3844_vm15, %v4667_v21, %v3841_v53  ;;  %v3854_v58 = vsub.f32 1.0, %v3853_v46 }
 0x40b   : > { %v3850_v54 = vsel %vm3847_vm0, %v3849_v51, %v3845_v33  ;;  %4674 = vrcp.f32 %v3033_v15  ;;  %v2705_v62 = vpop.xlane.xlu0 %2704  ;;  %v3878_v52 = vand.u32 2147483648, %v3033_v15  ;;  %v3876_v24 = vand.u32 2147483647, %v3033_v15 }
 0x40c   : > { %4056 = vst.msk [vmem:[%s5481_s27 + $0x1a8] sm:$0xff] %vm4002_vm13, %v3850_v54  ;;  %v3855_v49 = vmul.f32 %v4669_v43, %v3854_v58  ;;  %v2779_v31 = vadd.f32 %v6277_v55, %v2705_v62  ;;  %vm3872_vm7 = vweird.f32 %v3033_v15 }
 0x40d   : > { %v3879_v17 = vor.u32 1.1754944e-38, %v3878_v52  ;;  %vm3877_vm9 = vcmp.eq.f32.partialorder %v3876_v24, 8.507059e+37 }
 0x40e   : > { %v4673_v44 = vpop.eup %4672  ;;  %v3856_v2 = vadd.f32 %v4669_v43, %v3855_v49  ;;  %v4369_v57 = vmul.f32 -1.442695, %v2779_v31 }
 0x40f   : > { %v3034_v32 = vadd.f32 1.0, %v4673_v44 }
 0x410   : > { %v3860_v18 = vsel %vm3859_vm4, %v4669_v43, %v3856_v2 }
 0x411   : > { %v4675_v37 = vpop.eup %4674  ;;  %v3865_v12 = vsel %vm3862_vm5, %v3864_v11, %v3860_v18  ;;  %4676 = vrcp.f32 %v3034_v32  ;;  %v3893_v48 = vand.u32 2147483648, %v3034_v32  ;;  %vm3887_vm11 = vweird.f32 %v3034_v32 }
 0x412   : > { %4057 = vst.msk [vmem:[%s5481_s27 + $0x1b0] sm:$0xff] %vm4002_vm13, %v3865_v12  ;;  %v3868_v13 = vmul.f32 %v4675_v37, %v3033_v15  ;;  %4678 = vpow2.f32 %v4369_v57  ;;  %vm3873_vm6 = vweird.f32 %v4675_v37 }
 0x413   : > { %v2707_v59 = vpop.xlane.xlu1 %2706  ;;  %vm3874_vm8 = vmor %vm3872_vm7, %vm3873_vm6  ;;  %v3894_v28 = vor.u32 1.1754944e-38, %v3893_v48 }
 0x414   : > { %v3869_v42 = vsub.f32 1.0, %v3868_v13  ;;  %v2780_v0 = vadd.f32 %v6277_v55, %v2707_v59  ;;  %v3891_v55 = vand.u32 2147483647, %v3034_v32 }
 0x416   : > { %v3870_v1 = vmul.f32 %v4675_v37, %v3869_v42  ;;  %v4370_v35 = vmul.f32 -1.442695, %v2780_v0  ;;  %vm3892_vm12 = vcmp.eq.f32.partialorder %v3891_v55, 8.507059e+37 }
 0x417   : > { %v4677_v56 = vpop.eup %4676 }
 0x418   : > { %v4679_v9 = vpop.eup %4678  ;;  %v3871_v26 = vadd.f32 %v4675_v37, %v3870_v1  ;;  %v3883_v50 = vmul.f32 %v4677_v56, %v3034_v32  ;;  %vm3888_vm10 = vweird.f32 %v4677_v56 }
 0x419   : > { %v3035_v20 = vadd.f32 1.0, %v4679_v9  ;;  %vm3889_vm1 = vmor %vm3887_vm11, %vm3888_vm10 }
 0x41a   : > { %v3875_v36 = vsel %vm3874_vm8, %v4675_v37, %v3871_v26  ;;  %v3884_v7 = vsub.f32 1.0, %v3883_v50 }
 0x41b   : > { %v3880_v47 = vsel %vm3877_vm9, %v3879_v17, %v3875_v36  ;;  %4680 = vrcp.f32 %v3035_v20  ;;  %v2709_v16 = vpop.xlane.xlu2 %2708  ;;  %v3908_v21 = vand.u32 2147483648, %v3035_v20  ;;  %v3906_v40 = vand.u32 2147483647, %v3035_v20 }
 0x41c   : > { %4058 = vst.msk [vmem:[%s5481_s27 + $0x1b8] sm:$0xff] %vm4002_vm13, %v3880_v47  ;;  %v3885_v10 = vmul.f32 %v4677_v56, %v3884_v7  ;;  %4682 = vpow2.f32 %v4370_v35  ;;  %v2781_v60 = vadd.f32 %v6394_v27, %v2709_v16  ;;  %vm3902_vm15 = vweird.f32 %v3035_v20 }
 0x41d   : > { %v3909_v4 = vor.u32 1.1754944e-38, %v3908_v21  ;;  %vm3907_vm2 = vcmp.eq.f32.partialorder %v3906_v40, 8.507059e+37 }
 0x41e   : > { %v3886_v14 = vadd.f32 %v4677_v56, %v3885_v10  ;;  %v4371_v38 = vmul.f32 -1.442695, %v2781_v60 }
 0x420   : > { %v3890_v63 = vsel %vm3889_vm1, %v4677_v56, %v3886_v14  ;;  %4684 = vpow2.f32 %v4371_v38 }
 0x421   : > { %v4681_v25 = vpop.eup %4680  ;;  %v3895_v6 = vsel %vm3892_vm12, %v3894_v28, %v3890_v63 }
 0x422   : > { %v4683_v34 = vpop.eup %4682  ;;  %4059 = vst.msk [vmem:[%s5481_s27 + $0x1c0] sm:$0xff] %vm4002_vm13, %v3895_v6  ;;  %v3898_v41 = vmul.f32 %v4681_v25, %v3035_v20  ;;  %vm3903_vm14 = vweird.f32 %v4681_v25 }
 0x423   : > { %v3036_v22 = vadd.f32 1.0, %v4683_v34  ;;  %vm3904_vm0 = vmor %vm3902_vm15, %vm3903_vm14  ;;  %v2711_v45 = vpop.xlane.xlu0 %2710 }
 0x424   : > { %v3899_v29 = vsub.f32 1.0, %v3898_v41  ;;  %v2782_v43 = vadd.f32 %v6394_v27, %v2711_v45 }
 0x425   : > { %4686 = vrcp.f32 %v3036_v22  ;;  %v3923_v33 = vand.u32 2147483648, %v3036_v22  ;;  %v3921_v23 = vand.u32 2147483647, %v3036_v22  ;;  %vm3917_vm4 = vweird.f32 %v3036_v22 }
 0x426   : > { %v3900_v3 = vmul.f32 %v4681_v25, %v3899_v29  ;;  %v4685_v5 = vpop.eup %4684  ;;  %v4372_v51 = vmul.f32 -1.442695, %v2782_v43 }
 0x427   : > { %v3037_v30 = vadd.f32 1.0, %v4685_v5  ;;  %v3924_v2 = vor.u32 1.1754944e-38, %v3923_v33  ;;  %vm3922_vm6 = vcmp.eq.f32.partialorder %v3921_v23, 8.507059e+37 }
 0x428   : > { %v3901_v39 = vadd.f32 %v4681_v25, %v3900_v3 }
 0x429   : > { %4688 = vrcp.f32 %v3037_v30  ;;  %v3938_v37 = vand.u32 2147483648, %v3037_v30  ;;  %v3936_v42 = vand.u32 2147483647, %v3037_v30  ;;  %vm3932_vm8 = vweird.f32 %v3037_v30 }
 0x42a   : > { %v3905_v8 = vsel %vm3904_vm0, %v4681_v25, %v3901_v39  ;;  %4690 = vpow2.f32 %v4372_v51 }
 0x42b   : > { %v4687_v19 = vpop.eup %4686  ;;  %v3910_v53 = vsel %vm3907_vm2, %v3909_v4, %v3905_v8  ;;  %v2713_v58 = vpop.xlane.xlu1 %2712  ;;  %v3939_v24 = vor.u32 1.1754944e-38, %v3938_v37  ;;  %vm3937_vm10 = vcmp.eq.f32.partialorder %v3936_v42, 8.507059e+37 }
 0x42c   : > { %4060 = vst.msk [vmem:[%s5481_s27 + $0x1c8] sm:$0xff] %vm4002_vm13, %v3910_v53  ;;  %v3913_v46 = vmul.f32 %v4687_v19, %v3036_v22  ;;  %vm3918_vm3 = vweird.f32 %v4687_v19  ;;  %v2783_v49 = vadd.f32 %v6394_v27, %v2713_v58 }
 0x42d   : > { %vm3919_vm5 = vmor %vm3917_vm4, %vm3918_vm3 }
 0x42e   : > { %v3914_v15 = vsub.f32 1.0, %v3913_v46  ;;  %v4373_v44 = vmul.f32 -1.442695, %v2783_v49 }
 0x42f   : > { %v4689_v61 = vpop.eup %4688 }
 0x430   : > { %v3915_v54 = vmul.f32 %v4687_v19, %v3914_v15  ;;  %v3928_v31 = vmul.f32 %v4689_v61, %v3037_v30  ;;  %4692 = vpow2.f32 %v4373_v44  ;;  %v4691_v32 = vpop.eup %4690  ;;  %vm3933_vm7 = vweird.f32 %v4689_v61 }
 0x431   : > { %v3038_v12 = vadd.f32 1.0, %v4691_v32  ;;  %vm3934_vm9 = vmor %vm3932_vm8, %vm3933_vm7 }
 0x432   : > { %v3916_v62 = vadd.f32 %v4687_v19, %v3915_v54  ;;  %v3929_v57 = vsub.f32 1.0, %v3928_v31 }
 0x433   : > { %4694 = vrcp.f32 %v3038_v12  ;;  %v3953_v17 = vand.u32 2147483648, %v3038_v12  ;;  %v3951_v36 = vand.u32 2147483647, %v3038_v12  ;;  %vm3947_vm1 = vweird.f32 %v3038_v12 }
 0x434   : > { %v3920_v11 = vsel %vm3919_vm5, %v4687_v19, %v3916_v62  ;;  %v3930_v13 = vmul.f32 %v4689_v61, %v3929_v57 }
 0x435   : > { %v3925_v18 = vsel %vm3922_vm6, %v3924_v2, %v3920_v11  ;;  %v3954_v55 = vor.u32 1.1754944e-38, %v3953_v17  ;;  %vm3952_vm14 = vcmp.eq.f32.partialorder %v3951_v36, 8.507059e+37 }
 0x436   : > { %4061 = vst.msk [vmem:[%s5481_s27 + $0x1d0] sm:$0xff] %vm4002_vm13, %v3925_v18  ;;  %v3931_v52 = vadd.f32 %v4689_v61, %v3930_v13  ;;  %v4693_v1 = vpop.eup %4692 }
 0x437   : > { %v3039_v56 = vadd.f32 1.0, %v4693_v1 }
 0x438   : > { %v3935_v59 = vsel %vm3934_vm9, %v4689_v61, %v3931_v52 }
 0x439   : > { %v3940_v0 = vsel %vm3937_vm10, %v3939_v24, %v3935_v59  ;;  %4696 = vrcp.f32 %v3039_v56  ;;  %v4695_v9 = vpop.eup %4694  ;;  %v3968_v28 = vand.u32 2147483648, %v3039_v56  ;;  %v3966_v6 = vand.u32 2147483647, %v3039_v56 }
 0x43a   : > { %4062 = vst.msk [vmem:[%s5481_s27 + $0x1d8] sm:$0xff] %vm4002_vm13, %v3940_v0  ;;  %v3943_v26 = vmul.f32 %v4695_v9, %v3038_v12  ;;  %vm3948_vm11 = vweird.f32 %v4695_v9  ;;  %vm3962_vm0 = vweird.f32 %v3039_v56 }
 0x43b   : > { %vm3949_vm12 = vmor %vm3947_vm1, %vm3948_vm11  ;;  %v3969_v34 = vor.u32 1.1754944e-38, %v3968_v28  ;;  %vm3967_vm3 = vcmp.eq.f32.partialorder %v3966_v6, 8.507059e+37 }
 0x43c   : > { %v3944_v50 = vsub.f32 1.0, %v3943_v26 }
 0x43e   : > { %v3945_v35 = vmul.f32 %v4695_v9, %v3944_v50 }
 0x43f   : > { %v4697_v20 = vpop.eup %4696 }
 0x440   : > { %v3958_v7 = vmul.f32 %v4697_v20, %v3039_v56  ;;  %v3946_v48 = vadd.f32 %v4695_v9, %v3945_v35  ;;  %vm3963_vm15 = vweird.f32 %v4697_v20 }
 0x441   : > { %v2715_v47 = vpop.xlane.xlu2 %2714  ;;  %vm3964_vm2 = vmor %vm3962_vm0, %vm3963_vm15 }
 0x442   : > { %v2784_v10 = vadd.f32 %v6394_v27, %v2715_v47  ;;  %v3959_v14 = vsub.f32 1.0, %v3958_v7  ;;  %v3950_v16 = vsel %vm3949_vm12, %v4695_v9, %v3946_v48 }
 0x443   : > { %v3955_v63 = vsel %vm3952_vm14, %v3954_v55, %v3950_v16 }
 0x444   : > { %v4374_v60 = vmul.f32 -1.442695, %v2784_v10  ;;  %v3960_v25 = vmul.f32 %v4697_v20, %v3959_v14  ;;  %4063 = vst.msk [vmem:[%s5481_s27 + $0x1e0] sm:$0xff] %vm4002_vm13, %v3955_v63 }
 0x446   : > { %4698 = vpow2.f32 %v4374_v60  ;;  %v3961_v38 = vadd.f32 %v4697_v20, %v3960_v25 }
 0x448   : > { %v3965_v41 = vsel %vm3964_vm2, %v4697_v20, %v3961_v38 }
 0x449   : > { %v3970_v22 = vsel %vm3967_vm3, %v3969_v34, %v3965_v41  ;;  %v2717_v29 = vpop.xlane.xlu0 %2716 }
 0x44a   : > { %4064 = vst.msk [vmem:[%s5481_s27 + $0x1e8] sm:$0xff] %vm4002_vm13, %v3970_v22  ;;  %v2785_v3 = vadd.f32 %v6394_v27, %v2717_v29 }
 0x44c   : > { %v4699_v21 = vpop.eup %4698  ;;  %v4375_v39 = vmul.f32 -1.442695, %v2785_v3 }
 0x44d   : > { %v3040_v40 = vadd.f32 1.0, %v4699_v21 }
 0x44f   : > { %4700 = vrcp.f32 %v3040_v40  ;;  %v3983_v43 = vand.u32 2147483648, %v3040_v40  ;;  %v3981_v53 = vand.u32 2147483647, %v3040_v40  ;;  %vm3977_vm5 = vweird.f32 %v3040_v40 }
 0x450   : > { %4702 = vpow2.f32 %v4375_v39 }
 0x451   : > { %v3984_v51 = vor.u32 1.1754944e-38, %v3983_v43  ;;  %vm3982_vm7 = vcmp.eq.f32.partialorder %v3981_v53, 8.507059e+37 }
 0x455   : > { %v4701_v5 = vpop.eup %4700 }
 0x456   : > { %v4703_v4 = vpop.eup %4702  ;;  %v3973_v45 = vmul.f32 %v4701_v5, %v3040_v40  ;;  %vm3978_vm4 = vweird.f32 %v4701_v5 }
 0x457   : > { %v3041_v8 = vadd.f32 1.0, %v4703_v4  ;;  %vm3979_vm6 = vmor %vm3977_vm5, %vm3978_vm4 }
 0x458   : > { %v3974_v30 = vsub.f32 1.0, %v3973_v45 }
 0x459   : > { %4704 = vrcp.f32 %v3041_v8  ;;  %v3998_v23 = vand.u32 2147483648, %v3041_v8  ;;  %v3996_v61 = vand.u32 2147483647, %v3041_v8  ;;  %vm3992_vm9 = vweird.f32 %v3041_v8 }
 0x45a   : > { %v3975_v19 = vmul.f32 %v4701_v5, %v3974_v30 }
 0x45b   : > { %v3999_v44 = vor.u32 1.1754944e-38, %v3998_v23  ;;  %vm3997_vm11 = vcmp.eq.f32.partialorder %v3996_v61, 8.507059e+37 }
 0x45c   : > { %v3976_v46 = vadd.f32 %v4701_v5, %v3975_v19 }
 0x45e   : > { %v3980_v27 = vsel %vm3979_vm6, %v4701_v5, %v3976_v46 }
 0x45f   : > { %v4705_v15 = vpop.eup %4704  ;;  %v3985_v33 = vsel %vm3982_vm7, %v3984_v51, %v3980_v27 }
 0x460   : > { %4065 = vst.msk [vmem:[%s5481_s27 + $0x1f0] sm:$0xff] %vm4002_vm13, %v3985_v33  ;;  %v3988_v58 = vmul.f32 %v4705_v15, %v3041_v8  ;;  %vm3993_vm8 = vweird.f32 %v4705_v15 }
 0x461   : > { %vm3994_vm10 = vmor %vm3992_vm9, %vm3993_vm8 }
 0x462   : > { %v3989_v54 = vsub.f32 1.0, %v3988_v58 }
 0x464   : > { %v3990_v49 = vmul.f32 %v4705_v15, %v3989_v54 }
 0x466   : > { %v3991_v62 = vadd.f32 %v4705_v15, %v3990_v49 }
 0x468   : > { %v3995_v2 = vsel %vm3994_vm10, %v4705_v15, %v3991_v62 }
 0x469   : > { %v4000_v31 = vsel %vm3997_vm11, %v3999_v44, %v3995_v2 }
 0x46a   : > { %4066 = vst.msk [vmem:[%s5481_s27 + $0x1f8] sm:$0xff] %vm4002_vm13, %v4000_v31 }
 0x46b PF: > { %s21_s11 = sadd.s32 1, %s4725_s11  }
 0x46c   : > { %p18_p4 = scmp.ge.s32.totalorder %s21_s11, 4  }
 0x46e   :  { %20 = sbr.rel (!%p18_p4) target bundleno = 3 (0x3), region = 86 }

</bundles_post_ra>
